<compile_context>
chip_gen: v7x
topology: tpu7x:2x2x1
jax: 0.10.0
libtpu: 0.0.40
codegen_flags: <defaults>
</compile_context>

<pallas_src>
import numpy as np

import jax
import jax.numpy as jnp
from jax import lax
from jax.experimental import pallas as pl
from jax.experimental.pallas import tpu as pltpu


LANE = 128      # lane-dense output width: conv OC padded to this
TILE_M = 512    # row tile for the gridded conv matmuls (fits v7x 64 MiB VMEM)


# ---------------------------------------------------------------------------
# Pallas kernels
# ---------------------------------------------------------------------------
def conv_matmul_kernel(x_ref, w_ref, b_ref, o_ref):
    # One M-tile of relu(x @ w + b).  x:(tm,K) bf16, w:(K,N) bf16, b:(1,N) f32.
    acc = jnp.dot(x_ref[...], w_ref[...], preferred_element_type=jnp.float32)
    acc = jnp.maximum(acc + b_ref[...], 0.0)
    o_ref[...] = acc.astype(o_ref.dtype)


def fc_head_kernel(f_ref, w1_ref, b1_ref, wv_ref, bv_ref, wa_ref, ba_ref, o_ref):
    # Fused value+advantage streams + dueling combine.
    #   f:(B,F) bf16, w1:(F,1024) bf16 = [val1 | adv1], b1:(1,1024) f32,
    #   wv:(1024,1) / wa:(1024,A) bf16 block-diagonal heads, bv/ba f32 biases.
    #   q = v + (a - mean(a))  with a GLOBAL mean (matches torch `.mean()`).
    h = jnp.dot(f_ref[...], w1_ref[...], preferred_element_type=jnp.float32)
    h = jnp.maximum(h + b1_ref[...], 0.0).astype(jnp.bfloat16)
    v = jnp.dot(h, wv_ref[...], preferred_element_type=jnp.float32) + bv_ref[...]
    a = jnp.dot(h, wa_ref[...], preferred_element_type=jnp.float32) + ba_ref[...]
    o_ref[...] = (v + (a - jnp.mean(a))).astype(o_ref.dtype)


# ---------------------------------------------------------------------------
# Pallas wrappers
# ---------------------------------------------------------------------------
def _vmem_limit_bytes(tm, K, N, out_itemsize):
    need = (2 * tm * K * 2            # double-buffered bf16 x tiles
            + K * N * 2               # resident bf16 weights
            + 2 * N * 4               # bias
            + 2 * tm * N * out_itemsize)  # double-buffered out tiles
    return int(min(max(2 * need + (4 << 20), 16 << 20), 48 << 20))


def pallas_conv_matmul(x, w, b, out_dtype=jnp.bfloat16):
    M, K = x.shape
    Kw, N = w.shape
    assert K == Kw and N % LANE == 0
    tm = M if M <= TILE_M else TILE_M            # full-extent block if small, else 512-row tiles
    grid = (pl.cdiv(M, tm),)
    out_itemsize = np.dtype(out_dtype).itemsize
    return pl.pallas_call(
        conv_matmul_kernel,
        out_shape=jax.ShapeDtypeStruct((M, N), out_dtype),
        grid_spec=pltpu.PrefetchScalarGridSpec(
            num_scalar_prefetch=0,
            grid=grid,
            in_specs=[
                pl.BlockSpec((tm, K), lambda i: (i, 0)),   # row tiles, pipelined
                pl.BlockSpec((K, N), lambda i: (0, 0)),    # weights resident
                pl.BlockSpec((1, N), lambda i: (0, 0)),    # bias resident
            ],
            out_specs=pl.BlockSpec((tm, N), lambda i: (i, 0)),
        ),
        compiler_params=pltpu.CompilerParams(
            dimension_semantics=("parallel",),             # independent row tiles
            vmem_limit_bytes=_vmem_limit_bytes(tm, K, N, out_itemsize),
        ),
    )(x.astype(jnp.bfloat16), w.astype(jnp.bfloat16),
      b.reshape(1, N).astype(jnp.float32))


def pallas_fc_head(feats, w1, b1, wv, bv, wa, ba):
    # The dueling combine's global mean couples all batch rows, so the whole
    # post-conv net runs as one un-gridded block (everything fits VMEM easily).
    B = feats.shape[0]
    A = wa.shape[1]
    return pl.pallas_call(
        fc_head_kernel,
        out_shape=jax.ShapeDtypeStruct((B, A), jnp.float32),
        in_specs=[pl.BlockSpec(memory_space=pltpu.MemorySpace.VMEM)] * 7,
        out_specs=pl.BlockSpec(memory_space=pltpu.MemorySpace.VMEM),
    )(feats.astype(jnp.bfloat16), w1, b1, wv, bv, wa, ba)


# ---------------------------------------------------------------------------
# Conv = im2col glue (bf16) + gridded Pallas matmul
# ---------------------------------------------------------------------------
def extract_patches_nhwc(x, kh, kw, stride):
    # x: (B, H, W, C) -> (B, OH, OW, kh*kw*C); patch element order = (kh, kw, c).
    B, H, W, C = x.shape
    oh = (H - kh) // stride + 1
    ow = (W - kw) // stride + 1
    pieces = []
    for i in range(kh):
        for j in range(kw):
            pieces.append(x[:, i:i + stride * oh:stride, j:j + stride * ow:stride, :])
    p = jnp.stack(pieces, axis=3)                 # (B, oh, ow, kh*kw, C)
    return p.reshape(B, oh, ow, kh * kw * C), oh, ow


def conv2d_relu(x_nhwc, w2d, b, kh, kw, stride):
    B = x_nhwc.shape[0]
    patches, oh, ow = extract_patches_nhwc(x_nhwc, kh, kw, stride)
    K = patches.shape[-1]
    y = pallas_conv_matmul(patches.reshape(B * oh * ow, K), w2d, b)
    return y.reshape(B, oh, ow, w2d.shape[1])


# ---------------------------------------------------------------------------
# Parameters: PyTorch-layout init + one-time kernel-layout packing
# ---------------------------------------------------------------------------
def init_params(key, input_dim, output_dim):
    C, H, W = input_dim
    assert C == 4
    ks = jax.random.split(key, 14)

    def w_init(k, shape, fan_in):
        return jax.random.normal(k, shape, jnp.float32) / jnp.sqrt(float(fan_in))

    def b_init(k, shape):
        return 0.05 * jax.random.normal(k, shape, jnp.float32)

    h1 = (H - 8) // 4 + 1; w1 = (W - 8) // 4 + 1
    h2 = (h1 - 4) // 2 + 1; w2 = (w1 - 4) // 2 + 1
    h3 = (h2 - 3) // 1 + 1; w3 = (w2 - 3) // 1 + 1
    fc_in = 64 * h3 * w3

    return dict(
        conv1_w=w_init(ks[0], (32, 4, 8, 8), 4 * 8 * 8),   conv1_b=b_init(ks[1], (32,)),
        conv2_w=w_init(ks[2], (64, 32, 4, 4), 32 * 4 * 4), conv2_b=b_init(ks[3], (64,)),
        conv3_w=w_init(ks[4], (64, 64, 3, 3), 64 * 3 * 3), conv3_b=b_init(ks[5], (64,)),
        val1_w=w_init(ks[6], (fc_in, 512), fc_in),  val1_b=b_init(ks[7], (512,)),
        val2_w=w_init(ks[8], (512, 1), 512),        val2_b=b_init(ks[9], (1,)),
        adv1_w=w_init(ks[10], (fc_in, 512), fc_in), adv1_b=b_init(ks[11], (512,)),
        adv2_w=w_init(ks[12], (512, output_dim), 512),
        adv2_b=b_init(ks[13], (output_dim,)),
    )


def _pack_conv(w_oihw, b, ic_pad, oc_pad):
    OC, IC, KH, KW = w_oihw.shape
    w = jnp.pad(w_oihw, ((0, 0), (0, ic_pad - IC), (0, 0), (0, 0)))       # pad input channels
    w2d = jnp.transpose(w, (2, 3, 1, 0)).reshape(KH * KW * ic_pad, OC)    # rows = (kh, kw, ic)
    w2d = jnp.pad(w2d, ((0, 0), (0, oc_pad - OC)))                        # lane-dense output
    bp = jnp.pad(b, (0, oc_pad - OC))
    return w2d.astype(jnp.bfloat16), bp.astype(jnp.float32)


def _pack_fc1(w_in_out, c, h3, w3, c_pad):
    # Rows are ordered like PyTorch's NCHW flatten (c, h3, w3); permute them once to the
    # kernel's NHWC channel-padded flatten (h3, w3, c_pad) so no runtime transpose is needed.
    n = w_in_out.shape[1]
    w4 = w_in_out.reshape(c, h3, w3, n)
    w4 = jnp.pad(w4, ((0, c_pad - c), (0, 0), (0, 0), (0, 0)))
    return jnp.transpose(w4, (1, 2, 0, 3)).reshape(h3 * w3 * c_pad, n)


def pack_params(p, input_dim, output_dim):
    C, H, W = input_dim
    h1 = (H - 8) // 4 + 1; w1 = (W - 8) // 4 + 1
    h2 = (h1 - 4) // 2 + 1; w2 = (w1 - 4) // 2 + 1
    h3 = (h2 - 3) // 1 + 1; w3 = (w2 - 3) // 1 + 1
    A = output_dim

    c1_w, c1_b = _pack_conv(p["conv1_w"], p["conv1_b"], ic_pad=4,    oc_pad=LANE)
    c2_w, c2_b = _pack_conv(p["conv2_w"], p["conv2_b"], ic_pad=LANE, oc_pad=LANE)
    c3_w, c3_b = _pack_conv(p["conv3_w"], p["conv3_b"], ic_pad=LANE, oc_pad=LANE)

    # Fused fc1: [value | advantage] -> one (F, 1024) matmul.
    v1 = _pack_fc1(p["val1_w"], 64, h3, w3, LANE)
    a1 = _pack_fc1(p["adv1_w"], 64, h3, w3, LANE)
    w1f = jnp.concatenate([v1, a1], axis=1).astype(jnp.bfloat16)
    b1f = jnp.concatenate([p["val1_b"], p["adv1_b"]]).reshape(1, 1024).astype(jnp.float32)

    # Block-diagonal second-stage heads over the fused 1024-wide hidden.
    wv = jnp.concatenate([p["val2_w"], jnp.zeros((512, 1), jnp.float32)], axis=0)
    wa = jnp.concatenate([jnp.zeros((512, A), jnp.float32), p["adv2_w"]], axis=0)

    return dict(
        c1_w=c1_w, c1_b=c1_b, c2_w=c2_w, c2_b=c2_b, c3_w=c3_w, c3_b=c3_b,
        w1=w1f, b1=b1f,
        wv=wv.astype(jnp.bfloat16), bv=p["val2_b"].reshape(1, 1).astype(jnp.float32),
        wa=wa.astype(jnp.bfloat16), ba=p["adv2_b"].reshape(1, A).astype(jnp.float32),
    )


# ---------------------------------------------------------------------------
# Forward (Pallas) and pure-JAX f32 reference
# ---------------------------------------------------------------------------
def forward(packed, state_nchw):
    # state: (B, 4, H, W) like PyTorch; kernels run NHWC with channel-padded (128) maps.
    x = jnp.transpose(state_nchw, (0, 2, 3, 1)).astype(jnp.bfloat16)
    x = conv2d_relu(x, packed["c1_w"], packed["c1_b"], 8, 8, 4)
    x = conv2d_relu(x, packed["c2_w"], packed["c2_b"], 4, 4, 2)
    x = conv2d_relu(x, packed["c3_w"], packed["c3_b"], 3, 3, 1)
    B = x.shape[0]
    feats = x.reshape(B, -1)   # NHWC flatten; fc1 weight rows were pre-permuted for this order
    return pallas_fc_head(feats, packed["w1"], packed["b1"],
                          packed["wv"], packed["bv"], packed["wa"], packed["ba"])


def forward_ref(p, state_nchw):
    x = state_nchw.astype(jnp.float32)

    def conv(x, w, b, stride):
        y = lax.conv_general_dilated(x, w, (stride, stride), "VALID",
                                     dimension_numbers=("NCHW", "OIHW", "NCHW"))
        return jnp.maximum(y + b[None, :, None, None], 0.0)

    x = conv(x, p["conv1_w"], p["conv1_b"], 4)
    x = conv(x, p["conv2_w"], p["conv2_b"], 2)
    x = conv(x, p["conv3_w"], p["conv3_b"], 1)
    feats = x.reshape(x.shape[0], -1)
    vh = jnp.maximum(feats @ p["val1_w"] + p["val1_b"], 0.0)
    values = vh @ p["val2_w"] + p["val2_b"]
    ah = jnp.maximum(feats @ p["adv1_w"] + p["adv1_b"], 0.0)
    advantages = ah @ p["adv2_w"] + p["adv2_b"]
    return values + (advantages - advantages.mean())


if __name__ == "__main__":
    # 52x52 is small but survives the three valid convs with a non-trivial 3x3 final
    # spatial map, so the NHWC-flatten weight permutation path is actually exercised.
    input_dim = (4, 52, 52)
    output_dim = 6
    batch = 2

    key = jax.random.PRNGKey(0)
    pkey, xkey = jax.random.split(key)
    params = init_params(pkey, input_dim, output_dim)
    packed = pack_params(params, input_dim, output_dim)
    state = jax.random.normal(xkey, (batch, *input_dim), dtype=jnp.float32)

    fwd = jax.jit(forward)
    q = jax.block_until_ready(fwd(packed, state))

    q_ref = jax.block_until_ready(forward_ref(params, state))
    assert q.shape == (batch, output_dim)
    # bf16 operands / f32 accumulation vs. the pure-f32 reference => relaxed tolerance.
    assert bool(jnp.allclose(q, q_ref, atol=7e-2, rtol=7e-2)), (q, q_ref)

    print("KERNEL_OK")
</pallas_src>

<mosaic_0001>
module attributes {stable_mosaic.version = 11 : i64} {
  func.func @conv_matmul_kernel(%arg0: i32, %arg1: memref<288x256xbf16, #tpu.memory_space<vmem>>, %arg2: memref<256x128xbf16, #tpu.memory_space<vmem>>, %arg3: memref<1x128xf32, #tpu.memory_space<vmem>>, %arg4: memref<288x128xbf16, #tpu.memory_space<vmem>>) attributes {dimension_semantics = [#tpu.dimension_semantics<parallel>], iteration_bounds = array<i64: 1>, scalar_prefetch = 0 : i64, scratch_operands = 0 : i64, tpu.core_type = #tpu.core_type<tc>, window_params = [{transform_indices = @transform_0, window_bounds = array<i64: 288, 256>}, {pipeline_mode = #tpu.pipeline_mode<synchronous>, transform_indices = @transform_1, window_bounds = array<i64: 256, 128>}, {pipeline_mode = #tpu.pipeline_mode<synchronous>, transform_indices = @transform_2, window_bounds = array<i64: 1, 128>}, {transform_indices = @transform_3, window_bounds = array<i64: 288, 128>}]} {
    %c0 = arith.constant 0 : index
    %c0_0 = arith.constant 0 : index
    %0 = vector.load %arg1[%c0, %c0_0] : memref<288x256xbf16, #tpu.memory_space<vmem>>, vector<288x256xbf16>
    %c0_1 = arith.constant 0 : index
    %c0_2 = arith.constant 0 : index
    %1 = vector.load %arg2[%c0_1, %c0_2] : memref<256x128xbf16, #tpu.memory_space<vmem>>, vector<256x128xbf16>
    %cst = arith.constant dense<0.000000e+00> : vector<288x128xf32>
    %2 = tpu.matmul %0, %1, %cst {dimension_numbers = #tpu.dot_dimension_numbers<[1], [0], [0], [1], [0, 0, 1, 1], [], []>} : vector<288x256xbf16>, vector<256x128xbf16>, vector<288x128xf32> -> vector<288x128xf32>
    %c0_3 = arith.constant 0 : index
    %c0_4 = arith.constant 0 : index
    %3 = vector.load %arg3[%c0_3, %c0_4] : memref<1x128xf32, #tpu.memory_space<vmem>>, vector<1x128xf32>
    %4 = vector.broadcast %3 : vector<1x128xf32> to vector<288x128xf32>
    %5 = arith.addf %2, %4 : vector<288x128xf32>
    %cst_5 = arith.constant 0.000000e+00 : f32
    %6 = vector.broadcast %cst_5 : f32 to vector<288x128xf32>
    %7 = arith.maximumf %5, %6 : vector<288x128xf32>
    %8 = arith.truncf %7 : vector<288x128xf32> to vector<288x128xbf16>
    %c0_6 = arith.constant 0 : index
    %c0_7 = arith.constant 0 : index
    %9 = vector.load %arg4[%c0_6, %c0_7] : memref<288x128xbf16, #tpu.memory_space<vmem>>, vector<288x128xbf16>
    tpu.vector_store %arg4[%c0_6, %c0_7], %8 {strides = array<i32>} : memref<288x128xbf16, #tpu.memory_space<vmem>>, vector<288x128xbf16>,
    return
  }
  func.func @transform_0(%arg0: i32) -> (i32, i32) {
    %c0_i32 = arith.constant 0 : i32
    %c0_i32_0 = arith.constant 0 : i32
    return %arg0, %c0_i32 : i32, i32
  }
  func.func @transform_1(%arg0: i32) -> (i32, i32) {
    %c0_i32 = arith.constant 0 : i32
    %c0_i32_0 = arith.constant 0 : i32
    %c0_i32_1 = arith.constant 0 : i32
    return %c0_i32, %c0_i32_0 : i32, i32
  }
  func.func @transform_2(%arg0: i32) -> (i32, i32) {
    %c0_i32 = arith.constant 0 : i32
    %c0_i32_0 = arith.constant 0 : i32
    %c0_i32_1 = arith.constant 0 : i32
    return %c0_i32, %c0_i32_0 : i32, i32
  }
  func.func @transform_3(%arg0: i32) -> (i32, i32) {
    %c0_i32 = arith.constant 0 : i32
    %c0_i32_0 = arith.constant 0 : i32
    return %arg0, %c0_i32 : i32, i32
  }
}

module attributes {stable_mosaic.version = 11 : i64} {
  func.func @conv_matmul_kernel(%arg0: i32, %arg1: memref<50x2048xbf16, #tpu.memory_space<vmem>>, %arg2: memref<2048x128xbf16, #tpu.memory_space<vmem>>, %arg3: memref<1x128xf32, #tpu.memory_space<vmem>>, %arg4: memref<50x128xbf16, #tpu.memory_space<vmem>>) attributes {dimension_semantics = [#tpu.dimension_semantics<parallel>], iteration_bounds = array<i64: 1>, scalar_prefetch = 0 : i64, scratch_operands = 0 : i64, tpu.core_type = #tpu.core_type<tc>, window_params = [{transform_indices = @transform_0, window_bounds = array<i64: 50, 2048>}, {pipeline_mode = #tpu.pipeline_mode<synchronous>, transform_indices = @transform_1, window_bounds = array<i64: 2048, 128>}, {pipeline_mode = #tpu.pipeline_mode<synchronous>, transform_indices = @transform_2, window_bounds = array<i64: 1, 128>}, {transform_indices = @transform_3, window_bounds = array<i64: 50, 128>}]} {
    %c0 = arith.constant 0 : index
    %c0_0 = arith.constant 0 : index
    %0 = vector.load %arg1[%c0, %c0_0] : memref<50x2048xbf16, #tpu.memory_space<vmem>>, vector<50x2048xbf16>
    %c0_1 = arith.constant 0 : index
    %c0_2 = arith.constant 0 : index
    %1 = vector.load %arg2[%c0_1, %c0_2] : memref<2048x128xbf16, #tpu.memory_space<vmem>>, vector<2048x128xbf16>
    %cst = arith.constant dense<0.000000e+00> : vector<50x128xf32>
    %2 = tpu.matmul %0, %1, %cst {dimension_numbers = #tpu.dot_dimension_numbers<[1], [0], [0], [1], [0, 0, 1, 1], [], []>} : vector<50x2048xbf16>, vector<2048x128xbf16>, vector<50x128xf32> -> vector<50x128xf32>
    %c0_3 = arith.constant 0 : index
    %c0_4 = arith.constant 0 : index
    %3 = vector.load %arg3[%c0_3, %c0_4] : memref<1x128xf32, #tpu.memory_space<vmem>>, vector<1x128xf32>
    %4 = vector.broadcast %3 : vector<1x128xf32> to vector<50x128xf32>
    %5 = arith.addf %2, %4 : vector<50x128xf32>
    %cst_5 = arith.constant 0.000000e+00 : f32
    %6 = vector.broadcast %cst_5 : f32 to vector<50x128xf32>
    %7 = arith.maximumf %5, %6 : vector<50x128xf32>
    %8 = arith.truncf %7 : vector<50x128xf32> to vector<50x128xbf16>
    %c0_6 = arith.constant 0 : index
    %c0_7 = arith.constant 0 : index
    %9 = vector.load %arg4[%c0_6, %c0_7] : memref<50x128xbf16, #tpu.memory_space<vmem>>, vector<50x128xbf16>
    tpu.vector_store %arg4[%c0_6, %c0_7], %8 {strides = array<i32>} : memref<50x128xbf16, #tpu.memory_space<vmem>>, vector<50x128xbf16>,
    return
  }
  func.func @transform_0(%arg0: i32) -> (i32, i32) {
    %c0_i32 = arith.constant 0 : i32
    %c0_i32_0 = arith.constant 0 : i32
    return %arg0, %c0_i32 : i32, i32
  }
  func.func @transform_1(%arg0: i32) -> (i32, i32) {
    %c0_i32 = arith.constant 0 : i32
    %c0_i32_0 = arith.constant 0 : i32
    %c0_i32_1 = arith.constant 0 : i32
    return %c0_i32, %c0_i32_0 : i32, i32
  }
  func.func @transform_2(%arg0: i32) -> (i32, i32) {
    %c0_i32 = arith.constant 0 : i32
    %c0_i32_0 = arith.constant 0 : i32
    %c0_i32_1 = arith.constant 0 : i32
    return %c0_i32, %c0_i32_0 : i32, i32
  }
  func.func @transform_3(%arg0: i32) -> (i32, i32) {
    %c0_i32 = arith.constant 0 : i32
    %c0_i32_0 = arith.constant 0 : i32
    return %arg0, %c0_i32 : i32, i32
  }
}

module attributes {stable_mosaic.version = 11 : i64} {
  func.func @conv_matmul_kernel(%arg0: i32, %arg1: memref<18x1152xbf16, #tpu.memory_space<vmem>>, %arg2: memref<1152x128xbf16, #tpu.memory_space<vmem>>, %arg3: memref<1x128xf32, #tpu.memory_space<vmem>>, %arg4: memref<18x128xbf16, #tpu.memory_space<vmem>>) attributes {dimension_semantics = [#tpu.dimension_semantics<parallel>], iteration_bounds = array<i64: 1>, scalar_prefetch = 0 : i64, scratch_operands = 0 : i64, tpu.core_type = #tpu.core_type<tc>, window_params = [{transform_indices = @transform_0, window_bounds = array<i64: 18, 1152>}, {pipeline_mode = #tpu.pipeline_mode<synchronous>, transform_indices = @transform_1, window_bounds = array<i64: 1152, 128>}, {pipeline_mode = #tpu.pipeline_mode<synchronous>, transform_indices = @transform_2, window_bounds = array<i64: 1, 128>}, {transform_indices = @transform_3, window_bounds = array<i64: 18, 128>}]} {
    %c0 = arith.constant 0 : index
    %c0_0 = arith.constant 0 : index
    %0 = vector.load %arg1[%c0, %c0_0] : memref<18x1152xbf16, #tpu.memory_space<vmem>>, vector<18x1152xbf16>
    %c0_1 = arith.constant 0 : index
    %c0_2 = arith.constant 0 : index
    %1 = vector.load %arg2[%c0_1, %c0_2] : memref<1152x128xbf16, #tpu.memory_space<vmem>>, vector<1152x128xbf16>
    %cst = arith.constant dense<0.000000e+00> : vector<18x128xf32>
    %2 = tpu.matmul %0, %1, %cst {dimension_numbers = #tpu.dot_dimension_numbers<[1], [0], [0], [1], [0, 0, 1, 1], [], []>} : vector<18x1152xbf16>, vector<1152x128xbf16>, vector<18x128xf32> -> vector<18x128xf32>
    %c0_3 = arith.constant 0 : index
    %c0_4 = arith.constant 0 : index
    %3 = vector.load %arg3[%c0_3, %c0_4] : memref<1x128xf32, #tpu.memory_space<vmem>>, vector<1x128xf32>
    %4 = vector.broadcast %3 : vector<1x128xf32> to vector<18x128xf32>
    %5 = arith.addf %2, %4 : vector<18x128xf32>
    %cst_5 = arith.constant 0.000000e+00 : f32
    %6 = vector.broadcast %cst_5 : f32 to vector<18x128xf32>
    %7 = arith.maximumf %5, %6 : vector<18x128xf32>
    %8 = arith.truncf %7 : vector<18x128xf32> to vector<18x128xbf16>
    %c0_6 = arith.constant 0 : index
    %c0_7 = arith.constant 0 : index
    %9 = vector.load %arg4[%c0_6, %c0_7] : memref<18x128xbf16, #tpu.memory_space<vmem>>, vector<18x128xbf16>
    tpu.vector_store %arg4[%c0_6, %c0_7], %8 {strides = array<i32>} : memref<18x128xbf16, #tpu.memory_space<vmem>>, vector<18x128xbf16>,
    return
  }
  func.func @transform_0(%arg0: i32) -> (i32, i32) {
    %c0_i32 = arith.constant 0 : i32
    %c0_i32_0 = arith.constant 0 : i32
    return %arg0, %c0_i32 : i32, i32
  }
  func.func @transform_1(%arg0: i32) -> (i32, i32) {
    %c0_i32 = arith.constant 0 : i32
    %c0_i32_0 = arith.constant 0 : i32
    %c0_i32_1 = arith.constant 0 : i32
    return %c0_i32, %c0_i32_0 : i32, i32
  }
  func.func @transform_2(%arg0: i32) -> (i32, i32) {
    %c0_i32 = arith.constant 0 : i32
    %c0_i32_0 = arith.constant 0 : i32
    %c0_i32_1 = arith.constant 0 : i32
    return %c0_i32, %c0_i32_0 : i32, i32
  }
  func.func @transform_3(%arg0: i32) -> (i32, i32) {
    %c0_i32 = arith.constant 0 : i32
    %c0_i32_0 = arith.constant 0 : i32
    return %arg0, %c0_i32 : i32, i32
  }
}

module attributes {stable_mosaic.version = 11 : i64} {
  func.func @fc_head_kernel(%arg0: memref<2x1152xbf16, #tpu.memory_space<vmem>>, %arg1: memref<1152x1024xbf16, #tpu.memory_space<vmem>>, %arg2: memref<1x1024xf32, #tpu.memory_space<vmem>>, %arg3: memref<1024x1xbf16, #tpu.memory_space<vmem>>, %arg4: memref<1x1xf32, #tpu.memory_space<vmem>>, %arg5: memref<1024x6xbf16, #tpu.memory_space<vmem>>, %arg6: memref<1x6xf32, #tpu.memory_space<vmem>>, %arg7: memref<2x6xf32, #tpu.memory_space<vmem>>) attributes {dimension_semantics = [], scalar_prefetch = 0 : i64, scratch_operands = 0 : i64, tpu.core_type = #tpu.core_type<tc>} {
    %c0 = arith.constant 0 : index
    %c0_0 = arith.constant 0 : index
    %0 = vector.load %arg0[%c0, %c0_0] : memref<2x1152xbf16, #tpu.memory_space<vmem>>, vector<2x1152xbf16>
    %c0_1 = arith.constant 0 : index
    %c0_2 = arith.constant 0 : index
    %1 = vector.load %arg1[%c0_1, %c0_2] : memref<1152x1024xbf16, #tpu.memory_space<vmem>>, vector<1152x1024xbf16>
    %cst = arith.constant dense<0.000000e+00> : vector<2x1024xf32>
    %2 = tpu.matmul %0, %1, %cst {dimension_numbers = #tpu.dot_dimension_numbers<[1], [0], [0], [1], [0, 0, 1, 1], [], []>} : vector<2x1152xbf16>, vector<1152x1024xbf16>, vector<2x1024xf32> -> vector<2x1024xf32>
    %c0_3 = arith.constant 0 : index
    %c0_4 = arith.constant 0 : index
    %3 = vector.load %arg2[%c0_3, %c0_4] : memref<1x1024xf32, #tpu.memory_space<vmem>>, vector<1x1024xf32>
    %4 = vector.broadcast %3 : vector<1x1024xf32> to vector<2x1024xf32>
    %5 = arith.addf %2, %4 : vector<2x1024xf32>
    %cst_5 = arith.constant 0.000000e+00 : f32
    %6 = vector.broadcast %cst_5 : f32 to vector<2x1024xf32>
    %7 = arith.maximumf %5, %6 : vector<2x1024xf32>
    %8 = arith.truncf %7 : vector<2x1024xf32> to vector<2x1024xbf16>
    %c0_6 = arith.constant 0 : index
    %c0_7 = arith.constant 0 : index
    %9 = vector.load %arg3[%c0_6, %c0_7] : memref<1024x1xbf16, #tpu.memory_space<vmem>>, vector<1024x1xbf16>
    %cst_8 = arith.constant dense<0.000000e+00> : vector<2x1xf32>
    %10 = tpu.matmul %8, %9, %cst_8 {dimension_numbers = #tpu.dot_dimension_numbers<[1], [0], [0], [1], [0, 0, 1, 1], [], []>} : vector<2x1024xbf16>, vector<1024x1xbf16>, vector<2x1xf32> -> vector<2x1xf32>
    %c0_9 = arith.constant 0 : index
    %c0_10 = arith.constant 0 : index
    %11 = vector.load %arg4[%c0_9, %c0_10] : memref<1x1xf32, #tpu.memory_space<vmem>>, vector<1x1xf32>
    %12 = vector.broadcast %11 : vector<1x1xf32> to vector<2x1xf32>
    %13 = arith.addf %10, %12 : vector<2x1xf32>
    %c0_11 = arith.constant 0 : index
    %c0_12 = arith.constant 0 : index
    %14 = vector.load %arg5[%c0_11, %c0_12] : memref<1024x6xbf16, #tpu.memory_space<vmem>>, vector<1024x6xbf16>
    %cst_13 = arith.constant dense<0.000000e+00> : vector<2x6xf32>
    %15 = tpu.matmul %8, %14, %cst_13 {dimension_numbers = #tpu.dot_dimension_numbers<[1], [0], [0], [1], [0, 0, 1, 1], [], []>} : vector<2x1024xbf16>, vector<1024x6xbf16>, vector<2x6xf32> -> vector<2x6xf32>
    %c0_14 = arith.constant 0 : index
    %c0_15 = arith.constant 0 : index
    %16 = vector.load %arg6[%c0_14, %c0_15] : memref<1x6xf32, #tpu.memory_space<vmem>>, vector<1x6xf32>
    %17 = vector.broadcast %16 : vector<1x6xf32> to vector<2x6xf32>
    %18 = arith.addf %15, %17 : vector<2x6xf32>
    %19 = vector.shape_cast %18 : vector<2x6xf32> to vector<1x2x6xf32>
    %cst_16 = arith.constant dense<0.000000e+00> : vector<1xf32>
    %20 = vector.multi_reduction <add>, %19, %cst_16 [1, 2] : vector<1x2x6xf32> to vector<1xf32>
    %21 = vector.shape_cast %20 : vector<1xf32> to vector<1x1x1xf32>
    %22 = vector.extract %21[0, 0, 0] : f32 from vector<1x1x1xf32>
    %cst_17 = arith.constant 1.200000e+01 : f32
    %23 = arith.divf %22, %cst_17 : f32
    %24 = vector.broadcast %23 : f32 to vector<2x6xf32>
    %25 = arith.subf %18, %24 : vector<2x6xf32>
    %26 = vector.broadcast %13 : vector<2x1xf32> to vector<2x6xf32>
    %27 = arith.addf %26, %25 : vector<2x6xf32>
    %c0_18 = arith.constant 0 : index
    %c0_19 = arith.constant 0 : index
    %28 = vector.load %arg7[%c0_18, %c0_19] : memref<2x6xf32, #tpu.memory_space<vmem>>, vector<2x6xf32>
    tpu.vector_store %arg7[%c0_18, %c0_19], %27 {strides = array<i32>} : memref<2x6xf32, #tpu.memory_space<vmem>>, vector<2x6xf32>,
    return
  }
}

</mosaic_0001>

<bundles_post_ra>
// kernel: forward.4
= control target key start
LH: loop header
LB: loop body
LE: loop exit
PB: predicated region body
PF: predicated region fallthrough
CT: control target
= control target key end

     0   :  { %v1098_v0 = vmov 0   ;;  %s1402_s1 = inlined_call_operand.vmem [shape: bf16[256,128], index: 1, kind: input, shape index: {}]   ;;  %s1403_s0 = inlined_call_operand.vmem [shape: bf16[288,256], index: 0, kind: input, shape index: {}]   ;;  %s1404_s2 = inlined_call_operand.vmem [shape: f32[1,128], index: 2, kind: input, shape index: {}]   ;;  %s1405_s3 = inlined_call_operand.vmem [shape: bf16[288,128], index: 3, kind: output, shape index: {}]  }
   0x1   :  { %366 = vmatprep.subr.bf16.mxu0 %v1098_v0  ;;  %995 = vmatprep.subr.bf16.mxu1 %v1098_v0  ;;  %v1028_v1 = vld [vmem:[%s1402_s1] sm:$0xff]   ;;  %v1029_v2 = vld [vmem:[%s1402_s1 + $0x8] sm:$0xff]   ;;  %v1030_v3 = vld [vmem:[%s1402_s1 + $0x10] sm:$0xff]  }
   0x2   :  { %367 = vmatpush1.bf16.msra.mxu0 %v1028_v1  ;;  %1011 = vmatpush1.bf16.msra.mxu1 %v1028_v1  ;;  %v1031_v4 = vld [vmem:[%s1402_s1 + $0x18] sm:$0xff]   ;;  %v1032_v5 = vld [vmem:[%s1402_s1 + $0x20] sm:$0xff]   ;;  %v1033_v7 = vld [vmem:[%s1402_s1 + $0x28] sm:$0xff]  }
   0x3   :  { %368 = vmatprep.subr.bf16.mxu0 %v1098_v0  ;;  %996 = vmatprep.subr.bf16.mxu1 %v1098_v0  ;;  %v1046_v6 = vld [vmem:[%s1403_s0 + $0x4] ss:$8 sps:$4 sm:$0xff]   ;;  %v1049_v8 = vld [vmem:[%s1403_s0 + $0x94] ss:$8 sps:$4 sm:$0xff]   ;;  %v1044_v19 = vld [vmem:[%s1403_s0] ss:$8 sps:$4 sm:$0xff]  }
   0x4   :  { %398 = vmatprep.mubr.bf16.mxu0 %v1046_v6  ;;  %470 = vmatprep.mubr.bf16.mxu1 %v1049_v8  ;;  %v1034_v9 = vld [vmem:[%s1402_s1 + $0x30] sm:$0xff]   ;;  %v1035_v10 = vld [vmem:[%s1402_s1 + $0x38] sm:$0xff]   ;;  %v1036_v11 = vld [vmem:[%s1402_s1 + $0x40] sm:$0xff]  }
   0x5   :  { %v1037_v12 = vld [vmem:[%s1402_s1 + $0x48] sm:$0xff]   ;;  %v1038_v13 = vld [vmem:[%s1402_s1 + $0x50] sm:$0xff]   ;;  %v1039_v14 = vld [vmem:[%s1402_s1 + $0x58] sm:$0xff]  }
   0x6   :  { %369 = vmatpush1.bf16.msra.mxu0 %v1029_v2  ;;  %1012 = vmatpush1.bf16.msra.mxu1 %v1029_v2  ;;  %v1040_v15 = vld [vmem:[%s1402_s1 + $0x60] sm:$0xff]   ;;  %v1041_v16 = vld [vmem:[%s1402_s1 + $0x68] sm:$0xff]   ;;  %v1042_v17 = vld [vmem:[%s1402_s1 + $0x70] sm:$0xff]  }
   0x7   :  { %370 = vmatprep.subr.bf16.mxu0 %v1098_v0  ;;  %997 = vmatprep.subr.bf16.mxu1 %v1098_v0  ;;  %v1043_v18 = vld [vmem:[%s1402_s1 + $0x78] sm:$0xff]   ;;  %v1052_v22 = vld [vmem:[%s1403_s0 + $0xa4] ss:$8 sps:$4 sm:$0xff]   ;;  %v1055_v24 = vld [vmem:[%s1403_s0 + $0xa0] ss:$8 sps:$4 sm:$0xff]  }
   0x8   :  { %v1047_v20 = vld [vmem:[%s1403_s0 + $0x90] ss:$8 sps:$4 sm:$0xff]   ;;  %v1050_v21 = vld [vmem:[%s1403_s0 + $0x14] ss:$8 sps:$4 sm:$0xff]   ;;  %v1056_v25 = vld [vmem:[%s1403_s0 + $0x24] ss:$8 sps:$4 sm:$0xff]  }
   0x9   :  { %v1054_v23 = vld [vmem:[%s1403_s0 + $0x10] ss:$8 sps:$4 sm:$0xff]   ;;  %v1058_v26 = vld [vmem:[%s1403_s0 + $0xb4] ss:$8 sps:$4 sm:$0xff]   ;;  %v1060_v27 = vld [vmem:[%s1403_s0 + $0x20] ss:$8 sps:$4 sm:$0xff]  }
   0xa   :  { %371 = vmatpush1.bf16.msra.mxu0 %v1030_v3  ;;  %1013 = vmatpush1.bf16.msra.mxu1 %v1030_v3  ;;  %v1061_v28 = vld [vmem:[%s1403_s0 + $0xb0] ss:$8 sps:$4 sm:$0xff]   ;;  %v1062_v29 = vld [vmem:[%s1403_s0 + $0x34] ss:$8 sps:$4 sm:$0xff]   ;;  %v1064_v30 = vld [vmem:[%s1403_s0 + $0xc4] ss:$8 sps:$4 sm:$0xff]  }
   0xb   :  { %372 = vmatprep.subr.bf16.mxu0 %v1098_v0  ;;  %998 = vmatprep.subr.bf16.mxu1 %v1098_v0  ;;  %v1066_v31 = vld [vmem:[%s1403_s0 + $0x30] ss:$8 sps:$4 sm:$0xff]   ;;  %v1067_v32 = vld [vmem:[%s1403_s0 + $0xc0] ss:$8 sps:$4 sm:$0xff]   ;;  %v1068_v33 = vld [vmem:[%s1403_s0 + $0x44] ss:$8 sps:$4 sm:$0xff]  }
   0xc   :  { %v1070_v34 = vld [vmem:[%s1403_s0 + $0xd4] ss:$8 sps:$4 sm:$0xff]   ;;  %v1072_v35 = vld [vmem:[%s1403_s0 + $0x40] ss:$8 sps:$4 sm:$0xff]   ;;  %v1073_v36 = vld [vmem:[%s1403_s0 + $0xd0] ss:$8 sps:$4 sm:$0xff]  }
   0xd   :  { %v1074_v37 = vld [vmem:[%s1403_s0 + $0x54] ss:$8 sps:$4 sm:$0xff]   ;;  %v1076_v38 = vld [vmem:[%s1403_s0 + $0xe4] ss:$8 sps:$4 sm:$0xff]   ;;  %v1078_v39 = vld [vmem:[%s1403_s0 + $0x50] ss:$8 sps:$4 sm:$0xff]  }
   0xe   :  { %373 = vmatpush1.bf16.msra.mxu0 %v1031_v4  ;;  %1014 = vmatpush1.bf16.msra.mxu1 %v1031_v4  ;;  %v1079_v40 = vld [vmem:[%s1403_s0 + $0xe0] ss:$8 sps:$4 sm:$0xff]   ;;  %v1080_v41 = vld [vmem:[%s1403_s0 + $0x64] ss:$8 sps:$4 sm:$0xff]   ;;  %v1082_v42 = vld [vmem:[%s1403_s0 + $0xf4] ss:$8 sps:$4 sm:$0xff]  }
   0xf   :  { %374 = vmatprep.subr.bf16.mxu0 %v1098_v0  ;;  %999 = vmatprep.subr.bf16.mxu1 %v1098_v0  ;;  %v1084_v43 = vld [vmem:[%s1403_s0 + $0x60] ss:$8 sps:$4 sm:$0xff]   ;;  %v1085_v44 = vld [vmem:[%s1403_s0 + $0xf0] ss:$8 sps:$4 sm:$0xff]   ;;  %v1086_v45 = vld [vmem:[%s1403_s0 + $0x74] ss:$8 sps:$4 sm:$0xff]  }
  0x10   :  { %v1088_v46 = vld [vmem:[%s1403_s0 + $0x104] ss:$8 sps:$4 sm:$0xff]   ;;  %v1090_v47 = vld [vmem:[%s1403_s0 + $0x70] ss:$8 sps:$4 sm:$0xff]   ;;  %v1091_v48 = vld [vmem:[%s1403_s0 + $0x100] ss:$8 sps:$4 sm:$0xff]  }
  0x11   :  { %v1092_v49 = vld [vmem:[%s1403_s0 + $0x84] ss:$8 sps:$4 sm:$0xff]   ;;  %v1094_v50 = vld [vmem:[%s1403_s0 + $0x114] ss:$8 sps:$4 sm:$0xff]   ;;  %v1096_v51 = vld [vmem:[%s1403_s0 + $0x80] ss:$8 sps:$4 sm:$0xff]  }
  0x12   :  { %375 = vmatpush1.bf16.msra.mxu0 %v1032_v5  ;;  %1015 = vmatpush1.bf16.msra.mxu1 %v1032_v5  ;;  %v1097_v52 = vld [vmem:[%s1403_s0 + $0x110] ss:$8 sps:$4 sm:$0xff]   ;;  %v1310_v53 = vld [vmem:[%s1404_s2] ss:$0 sm:$0xff] }
  0x13   :  { %376 = vmatprep.subr.bf16.mxu0 %v1098_v0  ;;  %1000 = vmatprep.subr.bf16.mxu1 %v1098_v0 }
  0x16   :  { %377 = vmatpush1.bf16.msra.mxu0 %v1033_v7  ;;  %1016 = vmatpush1.bf16.msra.mxu1 %v1033_v7 }
  0x17   :  { %378 = vmatprep.subr.bf16.mxu0 %v1098_v0  ;;  %1001 = vmatprep.subr.bf16.mxu1 %v1098_v0 }
  0x1a   :  { %379 = vmatpush1.bf16.msra.mxu0 %v1034_v9  ;;  %1017 = vmatpush1.bf16.msra.mxu1 %v1034_v9 }
  0x1b   :  { %380 = vmatprep.subr.bf16.mxu0 %v1098_v0  ;;  %1002 = vmatprep.subr.bf16.mxu1 %v1098_v0 }
  0x1e   :  { %381 = vmatpush1.bf16.msra.mxu0 %v1035_v10  ;;  %1018 = vmatpush1.bf16.msra.mxu1 %v1035_v10 }
  0x1f   :  { %382 = vmatprep.subr.bf16.mxu0 %v1098_v0  ;;  %1003 = vmatprep.subr.bf16.mxu1 %v1098_v0 }
  0x22   :  { %383 = vmatpush1.bf16.msra.mxu0 %v1036_v11  ;;  %1019 = vmatpush1.bf16.msra.mxu1 %v1036_v11 }
  0x23   :  { %384 = vmatprep.subr.bf16.mxu0 %v1098_v0  ;;  %1004 = vmatprep.subr.bf16.mxu1 %v1098_v0 }
  0x26   :  { %385 = vmatpush1.bf16.msra.mxu0 %v1037_v12  ;;  %1020 = vmatpush1.bf16.msra.mxu1 %v1037_v12 }
  0x27   :  { %386 = vmatprep.subr.bf16.mxu0 %v1098_v0  ;;  %1005 = vmatprep.subr.bf16.mxu1 %v1098_v0 }
  0x2a   :  { %387 = vmatpush1.bf16.msra.mxu0 %v1038_v13  ;;  %1021 = vmatpush1.bf16.msra.mxu1 %v1038_v13 }
  0x2b   :  { %388 = vmatprep.subr.bf16.mxu0 %v1098_v0  ;;  %1006 = vmatprep.subr.bf16.mxu1 %v1098_v0 }
  0x2e   :  { %389 = vmatpush1.bf16.msra.mxu0 %v1039_v14  ;;  %1022 = vmatpush1.bf16.msra.mxu1 %v1039_v14 }
  0x2f   :  { %390 = vmatprep.subr.bf16.mxu0 %v1098_v0  ;;  %1007 = vmatprep.subr.bf16.mxu1 %v1098_v0 }
  0x32   :  { %391 = vmatpush1.bf16.msra.mxu0 %v1040_v15  ;;  %1023 = vmatpush1.bf16.msra.mxu1 %v1040_v15 }
  0x33   :  { %392 = vmatprep.subr.bf16.mxu0 %v1098_v0  ;;  %1008 = vmatprep.subr.bf16.mxu1 %v1098_v0 }
  0x36   :  { %393 = vmatpush1.bf16.msra.mxu0 %v1041_v16  ;;  %1024 = vmatpush1.bf16.msra.mxu1 %v1041_v16 }
  0x37   :  { %394 = vmatprep.subr.bf16.mxu0 %v1098_v0  ;;  %1009 = vmatprep.subr.bf16.mxu1 %v1098_v0 }
  0x3a   :  { %395 = vmatpush1.bf16.msra.mxu0 %v1042_v17  ;;  %1025 = vmatpush1.bf16.msra.mxu1 %v1042_v17 }
  0x3b   :  { %396 = vmatprep.subr.bf16.mxu0 %v1098_v0  ;;  %1010 = vmatprep.subr.bf16.mxu1 %v1098_v0 }
  0x3e   :  { %397 = vmatpush1.bf16.msra.mxu0 %v1043_v18  ;;  %1026 = vmatpush1.bf16.msra.mxu1 %v1043_v18 }
  0x41   :  { %399 = vmatmul.mubr.bf16.vlgmr.msra.gmra.mrb[0].mxu0 %v1044_v19  ;;  %471 = vmatmul.mubr.bf16.vlgmr.msra.gmra.mrb[0].mxu1 %v1047_v20 }
  0x42   :  { %406 = vmatprep.mubr.bf16.mxu0 %v1050_v21  ;;  %478 = vmatprep.mubr.bf16.mxu1 %v1052_v22 }
  0x49   :  { %407 = vmatmul.mubr.bf16.gmra.mrb[4].mxu0 %v1054_v23  ;;  %479 = vmatmul.mubr.bf16.gmra.mrb[4].mxu1 %v1055_v24 }
  0x4a   :  { %414 = vmatprep.mubr.bf16.mxu0 %v1056_v25  ;;  %486 = vmatprep.mubr.bf16.mxu1 %v1058_v26 }
  0x51   :  { %415 = vmatmul.mubr.bf16.gmra.mrb[8].mxu0 %v1060_v27  ;;  %487 = vmatmul.mubr.bf16.gmra.mrb[8].mxu1 %v1061_v28 }
  0x52   :  { %422 = vmatprep.mubr.bf16.mxu0 %v1062_v29  ;;  %494 = vmatprep.mubr.bf16.mxu1 %v1064_v30 }
  0x59   :  { %423 = vmatmul.mubr.bf16.gmra.mrb[12].mxu0 %v1066_v31  ;;  %495 = vmatmul.mubr.bf16.gmra.mrb[12].mxu1 %v1067_v32 }
  0x5a   :  { %430 = vmatprep.mubr.bf16.mxu0 %v1068_v33  ;;  %502 = vmatprep.mubr.bf16.mxu1 %v1070_v34 }
  0x61   :  { %431 = vmatmul.mubr.bf16.gmra.mrb[16].mxu0 %v1072_v35  ;;  %503 = vmatmul.mubr.bf16.gmra.mrb[16].mxu1 %v1073_v36 }
  0x62   :  { %438 = vmatprep.mubr.bf16.mxu0 %v1074_v37  ;;  %510 = vmatprep.mubr.bf16.mxu1 %v1076_v38 }
  0x69   :  { %439 = vmatmul.mubr.bf16.gmra.mrb[20].mxu0 %v1078_v39  ;;  %511 = vmatmul.mubr.bf16.gmra.mrb[20].mxu1 %v1079_v40 }
  0x6a   :  { %446 = vmatprep.mubr.bf16.mxu0 %v1080_v41  ;;  %518 = vmatprep.mubr.bf16.mxu1 %v1082_v42 }
  0x71   :  { %447 = vmatmul.mubr.bf16.gmra.mrb[24].mxu0 %v1084_v43  ;;  %519 = vmatmul.mubr.bf16.gmra.mrb[24].mxu1 %v1085_v44 }
  0x72   :  { %454 = vmatprep.mubr.bf16.mxu0 %v1086_v45  ;;  %526 = vmatprep.mubr.bf16.mxu1 %v1088_v46 }
  0x79   :  { %455 = vmatmul.mubr.bf16.gmra.mrb[28].mxu0 %v1090_v47  ;;  %527 = vmatmul.mubr.bf16.gmra.mrb[28].mxu1 %v1091_v48 }
  0x7a   :  { %462 = vmatprep.mubr.bf16.mxu0 %v1092_v49  ;;  %534 = vmatprep.mubr.bf16.mxu1 %v1094_v50 }
  0x81   :  { %463 = vmatmul.mubr.bf16.gmra.mrb[32].mxu0 %v1096_v51  ;;  %535 = vmatmul.mubr.bf16.gmra.mrb[32].mxu1 %v1097_v52 }
 0x114   :  { %v400_v54 = vpop.f32.mrb[0].mxu0  ;;  %v472_v55 = vpop.f32.mrb[0].mxu1 }
 0x115   :  { %v401_v56 = vadd.f32 %v1310_v53, %v400_v54  ;;  %v473_v57 = vadd.f32 %v1310_v53, %v472_v55  ;;  %v402_v58 = vpop.f32.mrb[1].mxu0  ;;  %v474_v59 = vpop.f32.mrb[1].mxu1 }
 0x116   :  { %v403_v60 = vpop.f32.mrb[2].mxu0  ;;  %v475_v61 = vpop.f32.mrb[2].mxu1 }
 0x117   :  { %v404_v62 = vadd.f32 %v1310_v53, %v403_v60  ;;  %v476_v63 = vadd.f32 %v1310_v53, %v475_v61  ;;  %v405_v0 = vpop.f32.mrb[3].mxu0  ;;  %v477_v1 = vpop.f32.mrb[3].mxu1  ;;  %v543_v2 = vmax.f32 %v401_v56, 0.0  ;;  %v561_v3 = vmax.f32 %v473_v57, 0.0 }
 0x119   :  { %v544_v4 = vmax.f32 %v404_v62, 0.0  ;;  %v562_v5 = vmax.f32 %v476_v63, 0.0 }
 0x11b   :  { %v891_v6 = vpack.c.bf16 %v544_v4, %v543_v2  ;;  %v936_v7 = vpack.c.bf16 %v562_v5, %v561_v3 }
 0x11c   :  { %v408_v8 = vpop.f32.mrb[4].mxu0  ;;  %v480_v9 = vpop.f32.mrb[4].mxu1 }
 0x11d   :  { %892 = vst [vmem:[%s1405_s3] sm:$0xff] %v891_v6   ;;  %986 = vst [vmem:[%s1405_s3 + $0x48] sm:$0xff] %v936_v7   ;;  %v409_v10 = vadd.f32 %v1310_v53, %v408_v8  ;;  %v481_v11 = vadd.f32 %v1310_v53, %v480_v9  ;;  %v410_v12 = vpop.f32.mrb[5].mxu0  ;;  %v482_v13 = vpop.f32.mrb[5].mxu1 }
 0x11e   :  { %v411_v14 = vpop.f32.mrb[6].mxu0  ;;  %v483_v15 = vpop.f32.mrb[6].mxu1 }
 0x11f   :  { %v412_v16 = vadd.f32 %v1310_v53, %v411_v14  ;;  %v484_v17 = vadd.f32 %v1310_v53, %v483_v15  ;;  %v413_v18 = vpop.f32.mrb[7].mxu0  ;;  %v485_v19 = vpop.f32.mrb[7].mxu1  ;;  %v545_v20 = vmax.f32 %v409_v10, 0.0  ;;  %v563_v21 = vmax.f32 %v481_v11, 0.0 }
 0x121   :  { %v546_v22 = vmax.f32 %v412_v16, 0.0  ;;  %v564_v23 = vmax.f32 %v484_v17, 0.0 }
 0x123   :  { %v896_v24 = vpack.c.bf16 %v546_v22, %v545_v20  ;;  %v941_v25 = vpack.c.bf16 %v564_v23, %v563_v21 }
 0x124   :  { %v416_v26 = vpop.f32.mrb[8].mxu0  ;;  %v488_v27 = vpop.f32.mrb[8].mxu1 }
 0x125   :  { %978 = vst [vmem:[%s1405_s3 + $0x8] sm:$0xff] %v896_v24   ;;  %987 = vst [vmem:[%s1405_s3 + $0x50] sm:$0xff] %v941_v25   ;;  %v417_v28 = vadd.f32 %v1310_v53, %v416_v26  ;;  %v489_v29 = vadd.f32 %v1310_v53, %v488_v27  ;;  %v418_v30 = vpop.f32.mrb[9].mxu0  ;;  %v490_v31 = vpop.f32.mrb[9].mxu1 }
 0x126   :  { %v419_v32 = vpop.f32.mrb[10].mxu0  ;;  %v491_v33 = vpop.f32.mrb[10].mxu1 }
 0x127   :  { %v420_v34 = vadd.f32 %v1310_v53, %v419_v32  ;;  %v492_v35 = vadd.f32 %v1310_v53, %v491_v33  ;;  %v421_v36 = vpop.f32.mrb[11].mxu0  ;;  %v493_v37 = vpop.f32.mrb[11].mxu1  ;;  %v547_v38 = vmax.f32 %v417_v28, 0.0  ;;  %v565_v39 = vmax.f32 %v489_v29, 0.0 }
 0x129   :  { %v548_v40 = vmax.f32 %v420_v34, 0.0  ;;  %v566_v41 = vmax.f32 %v492_v35, 0.0 }
 0x12b   :  { %v901_v42 = vpack.c.bf16 %v548_v40, %v547_v38  ;;  %v946_v43 = vpack.c.bf16 %v566_v41, %v565_v39 }
 0x12c   :  { %v424_v44 = vpop.f32.mrb[12].mxu0  ;;  %v496_v45 = vpop.f32.mrb[12].mxu1 }
 0x12d   :  { %979 = vst [vmem:[%s1405_s3 + $0x10] sm:$0xff] %v901_v42   ;;  %988 = vst [vmem:[%s1405_s3 + $0x58] sm:$0xff] %v946_v43   ;;  %v425_v46 = vadd.f32 %v1310_v53, %v424_v44  ;;  %v497_v47 = vadd.f32 %v1310_v53, %v496_v45  ;;  %v426_v48 = vpop.f32.mrb[13].mxu0  ;;  %v498_v49 = vpop.f32.mrb[13].mxu1 }
 0x12e   :  { %v427_v50 = vpop.f32.mrb[14].mxu0  ;;  %v499_v51 = vpop.f32.mrb[14].mxu1 }
 0x12f   :  { %v428_v52 = vadd.f32 %v1310_v53, %v427_v50  ;;  %v500_v54 = vadd.f32 %v1310_v53, %v499_v51  ;;  %v429_v55 = vpop.f32.mrb[15].mxu0  ;;  %v501_v56 = vpop.f32.mrb[15].mxu1  ;;  %v549_v57 = vmax.f32 %v425_v46, 0.0  ;;  %v567_v58 = vmax.f32 %v497_v47, 0.0 }
 0x131   :  { %v550_v59 = vmax.f32 %v428_v52, 0.0  ;;  %v568_v60 = vmax.f32 %v500_v54, 0.0 }
 0x133   :  { %v906_v61 = vpack.c.bf16 %v550_v59, %v549_v57  ;;  %v951_v62 = vpack.c.bf16 %v568_v60, %v567_v58 }
 0x134   :  { %v432_v63 = vpop.f32.mrb[16].mxu0  ;;  %v504_v0 = vpop.f32.mrb[16].mxu1 }
 0x135   :  { %980 = vst [vmem:[%s1405_s3 + $0x18] sm:$0xff] %v906_v61   ;;  %989 = vst [vmem:[%s1405_s3 + $0x60] sm:$0xff] %v951_v62   ;;  %v433_v1 = vadd.f32 %v1310_v53, %v432_v63  ;;  %v505_v2 = vadd.f32 %v1310_v53, %v504_v0  ;;  %v434_v3 = vpop.f32.mrb[17].mxu0  ;;  %v506_v4 = vpop.f32.mrb[17].mxu1 }
 0x136   :  { %v435_v5 = vpop.f32.mrb[18].mxu0  ;;  %v507_v6 = vpop.f32.mrb[18].mxu1 }
 0x137   :  { %v436_v7 = vadd.f32 %v1310_v53, %v435_v5  ;;  %v508_v8 = vadd.f32 %v1310_v53, %v507_v6  ;;  %v437_v9 = vpop.f32.mrb[19].mxu0  ;;  %v509_v10 = vpop.f32.mrb[19].mxu1  ;;  %v551_v11 = vmax.f32 %v433_v1, 0.0  ;;  %v569_v12 = vmax.f32 %v505_v2, 0.0 }
 0x139   :  { %v552_v13 = vmax.f32 %v436_v7, 0.0  ;;  %v570_v14 = vmax.f32 %v508_v8, 0.0 }
 0x13b   :  { %v911_v15 = vpack.c.bf16 %v552_v13, %v551_v11  ;;  %v956_v16 = vpack.c.bf16 %v570_v14, %v569_v12 }
 0x13c   :  { %v440_v17 = vpop.f32.mrb[20].mxu0  ;;  %v512_v18 = vpop.f32.mrb[20].mxu1 }
 0x13d   :  { %981 = vst [vmem:[%s1405_s3 + $0x20] sm:$0xff] %v911_v15   ;;  %990 = vst [vmem:[%s1405_s3 + $0x68] sm:$0xff] %v956_v16   ;;  %v441_v19 = vadd.f32 %v1310_v53, %v440_v17  ;;  %v513_v20 = vadd.f32 %v1310_v53, %v512_v18  ;;  %v442_v21 = vpop.f32.mrb[21].mxu0  ;;  %v514_v22 = vpop.f32.mrb[21].mxu1 }
 0x13e   :  { %v443_v23 = vpop.f32.mrb[22].mxu0  ;;  %v515_v24 = vpop.f32.mrb[22].mxu1 }
 0x13f   :  { %v444_v25 = vadd.f32 %v1310_v53, %v443_v23  ;;  %v516_v26 = vadd.f32 %v1310_v53, %v515_v24  ;;  %v445_v27 = vpop.f32.mrb[23].mxu0  ;;  %v517_v28 = vpop.f32.mrb[23].mxu1  ;;  %v553_v29 = vmax.f32 %v441_v19, 0.0  ;;  %v571_v30 = vmax.f32 %v513_v20, 0.0 }
 0x141   :  { %v554_v31 = vmax.f32 %v444_v25, 0.0  ;;  %v572_v32 = vmax.f32 %v516_v26, 0.0 }
 0x143   :  { %v916_v33 = vpack.c.bf16 %v554_v31, %v553_v29  ;;  %v961_v34 = vpack.c.bf16 %v572_v32, %v571_v30 }
 0x144   :  { %v448_v35 = vpop.f32.mrb[24].mxu0  ;;  %v520_v36 = vpop.f32.mrb[24].mxu1 }
 0x145   :  { %982 = vst [vmem:[%s1405_s3 + $0x28] sm:$0xff] %v916_v33   ;;  %991 = vst [vmem:[%s1405_s3 + $0x70] sm:$0xff] %v961_v34   ;;  %v449_v37 = vadd.f32 %v1310_v53, %v448_v35  ;;  %v521_v38 = vadd.f32 %v1310_v53, %v520_v36  ;;  %v450_v39 = vpop.f32.mrb[25].mxu0  ;;  %v522_v40 = vpop.f32.mrb[25].mxu1 }
 0x146   :  { %v451_v41 = vpop.f32.mrb[26].mxu0  ;;  %v523_v42 = vpop.f32.mrb[26].mxu1 }
 0x147   :  { %v452_v43 = vadd.f32 %v1310_v53, %v451_v41  ;;  %v524_v44 = vadd.f32 %v1310_v53, %v523_v42  ;;  %v453_v45 = vpop.f32.mrb[27].mxu0  ;;  %v525_v46 = vpop.f32.mrb[27].mxu1  ;;  %v555_v47 = vmax.f32 %v449_v37, 0.0  ;;  %v573_v48 = vmax.f32 %v521_v38, 0.0 }
 0x149   :  { %v556_v49 = vmax.f32 %v452_v43, 0.0  ;;  %v574_v50 = vmax.f32 %v524_v44, 0.0 }
 0x14b   :  { %v921_v51 = vpack.c.bf16 %v556_v49, %v555_v47  ;;  %v966_v52 = vpack.c.bf16 %v574_v50, %v573_v48 }
 0x14c   :  { %v456_v54 = vpop.f32.mrb[28].mxu0  ;;  %v528_v55 = vpop.f32.mrb[28].mxu1 }
 0x14d   :  { %983 = vst [vmem:[%s1405_s3 + $0x30] sm:$0xff] %v921_v51   ;;  %992 = vst [vmem:[%s1405_s3 + $0x78] sm:$0xff] %v966_v52   ;;  %v457_v56 = vadd.f32 %v1310_v53, %v456_v54  ;;  %v529_v57 = vadd.f32 %v1310_v53, %v528_v55  ;;  %v458_v58 = vpop.f32.mrb[29].mxu0  ;;  %v530_v59 = vpop.f32.mrb[29].mxu1 }
 0x14e   :  { %v459_v60 = vpop.f32.mrb[30].mxu0  ;;  %v531_v61 = vpop.f32.mrb[30].mxu1 }
 0x14f   :  { %v460_v62 = vadd.f32 %v1310_v53, %v459_v60  ;;  %v532_v63 = vadd.f32 %v1310_v53, %v531_v61  ;;  %v461_v0 = vpop.f32.mrb[31].mxu0  ;;  %v533_v1 = vpop.f32.mrb[31].mxu1  ;;  %v557_v2 = vmax.f32 %v457_v56, 0.0  ;;  %v575_v3 = vmax.f32 %v529_v57, 0.0 }
 0x151   :  { %v558_v4 = vmax.f32 %v460_v62, 0.0  ;;  %v576_v5 = vmax.f32 %v532_v63, 0.0 }
 0x153   :  { %v926_v6 = vpack.c.bf16 %v558_v4, %v557_v2  ;;  %v971_v7 = vpack.c.bf16 %v576_v5, %v575_v3 }
 0x154   :  { %v464_v8 = vpop.f32.mrb[32].mxu0  ;;  %v536_v9 = vpop.f32.mrb[32].mxu1 }
 0x155   :  { %984 = vst [vmem:[%s1405_s3 + $0x38] sm:$0xff] %v926_v6   ;;  %993 = vst [vmem:[%s1405_s3 + $0x80] sm:$0xff] %v971_v7   ;;  %v465_v10 = vadd.f32 %v1310_v53, %v464_v8  ;;  %v537_v11 = vadd.f32 %v1310_v53, %v536_v9  ;;  %v466_v12 = vpop.f32.mrb[33].mxu0  ;;  %v538_v13 = vpop.f32.mrb[33].mxu1 }
 0x156   :  { %v467_v14 = vpop.f32.mrb[34].mxu0  ;;  %v539_v15 = vpop.f32.mrb[34].mxu1 }
 0x157   :  { %v468_v16 = vadd.f32 %v1310_v53, %v467_v14  ;;  %v540_v17 = vadd.f32 %v1310_v53, %v539_v15  ;;  %v469_v18 = vpop.f32.mrb[35].mxu0  ;;  %v541_v19 = vpop.f32.mrb[35].mxu1  ;;  %v559_v20 = vmax.f32 %v465_v10, 0.0  ;;  %v577_v21 = vmax.f32 %v537_v11, 0.0 }
 0x159   :  { %v560_v22 = vmax.f32 %v468_v16, 0.0  ;;  %v578_v23 = vmax.f32 %v540_v17, 0.0 }
 0x15b   :  { %v931_v24 = vpack.c.bf16 %v560_v22, %v559_v20  ;;  %v976_v25 = vpack.c.bf16 %v578_v23, %v577_v21 }
 0x15d   :  { %985 = vst [vmem:[%s1405_s3 + $0x40] sm:$0xff] %v931_v24   ;;  %994 = vst [vmem:[%s1405_s3 + $0x88] sm:$0xff] %v976_v25  }

// kernel: forward.5
= control target key start
LH: loop header
LB: loop body
LE: loop exit
PB: predicated region body
PF: predicated region fallthrough
CT: control target
= control target key end

     0   :  { %s3244_s1 = inlined_call_operand.vmem [shape: bf16[2048,128], index: 1, kind: input, shape index: {}]   ;;  %s3245_s0 = inlined_call_operand.vmem [shape: bf16[50,2048], index: 0, kind: input, shape index: {}]   ;;  %s3246_s2 = inlined_call_operand.vmem [shape: f32[1,128], index: 2, kind: input, shape index: {}]   ;;  %s3247_s3 = inlined_call_operand.vmem [shape: bf16[50,128], index: 3, kind: output, shape index: {}]  }
   0x1   :  { %v2501_v0 = vld [vmem:[%s3244_s1 + $0x40] sm:$0xff]   ;;  %v2505_v4 = vld [vmem:[%s3244_s1 + $0x48] sm:$0xff]   ;;  %v2509_v8 = vld [vmem:[%s3244_s1 + $0x50] sm:$0xff]  }
   0x2   :  { %v2502_v1 = vld [vmem:[%s3244_s1 + $0xc0] sm:$0xff]   ;;  %2181 = vmatprep.subr.bf16.mxu0 %v2501_v0  ;;  %v2506_v5 = vld [vmem:[%s3244_s1 + $0xc8] sm:$0xff]   ;;  %v2510_v9 = vld [vmem:[%s3244_s1 + $0xd0] sm:$0xff]  }
   0x3   :  { %v2503_v2 = vld [vmem:[%s3244_s1] sm:$0xff]   ;;  %2221 = vmatprep.subr.bf16.mxu1 %v2502_v1  ;;  %v2507_v6 = vld [vmem:[%s3244_s1 + $0x8] sm:$0xff]   ;;  %v2511_v10 = vld [vmem:[%s3244_s1 + $0x10] sm:$0xff]  }
   0x4   :  { %v2504_v3 = vld [vmem:[%s3244_s1 + $0x80] sm:$0xff]   ;;  %2182 = vmatpush3.bf16.msra.mxu0 %v2503_v2  ;;  %v2508_v7 = vld [vmem:[%s3244_s1 + $0x88] sm:$0xff]   ;;  %v2512_v11 = vld [vmem:[%s3244_s1 + $0x90] sm:$0xff]  }
   0x5   :  { %2222 = vmatpush3.bf16.msra.mxu1 %v2504_v3  ;;  %2183 = vmatprep.subr.bf16.mxu0 %v2505_v4  ;;  %v2513_v12 = vld [vmem:[%s3244_s1 + $0x58] sm:$0xff]   ;;  %v2517_v16 = vld [vmem:[%s3244_s1 + $0x60] sm:$0xff]   ;;  %v2521_v20 = vld [vmem:[%s3244_s1 + $0x68] sm:$0xff]  }
   0x6   :  { %2223 = vmatprep.subr.bf16.mxu1 %v2506_v5  ;;  %v2514_v13 = vld [vmem:[%s3244_s1 + $0xd8] sm:$0xff]   ;;  %v2518_v17 = vld [vmem:[%s3244_s1 + $0xe0] sm:$0xff]   ;;  %v2522_v21 = vld [vmem:[%s3244_s1 + $0xe8] sm:$0xff]  }
   0x7   :  { %v2515_v14 = vld [vmem:[%s3244_s1 + $0x18] sm:$0xff]   ;;  %v2519_v18 = vld [vmem:[%s3244_s1 + $0x20] sm:$0xff]   ;;  %v2523_v22 = vld [vmem:[%s3244_s1 + $0x28] sm:$0xff]  }
   0x8   :  { %2184 = vmatpush3.bf16.msra.mxu0 %v2507_v6  ;;  %v2516_v15 = vld [vmem:[%s3244_s1 + $0x98] sm:$0xff]   ;;  %v2520_v19 = vld [vmem:[%s3244_s1 + $0xa0] sm:$0xff]   ;;  %v2524_v23 = vld [vmem:[%s3244_s1 + $0xa8] sm:$0xff]  }
   0x9   :  { %2224 = vmatpush3.bf16.msra.mxu1 %v2508_v7  ;;  %2185 = vmatprep.subr.bf16.mxu0 %v2509_v8  ;;  %v2525_v24 = vld [vmem:[%s3244_s1 + $0x70] sm:$0xff]   ;;  %v2529_v28 = vld [vmem:[%s3244_s1 + $0x78] sm:$0xff]   ;;  %v15_v32 = vld [vmem:[%s3245_s0] sm:$0xff] }
   0xa   :  { %2225 = vmatprep.subr.bf16.mxu1 %v2510_v9  ;;  %v2526_v25 = vld [vmem:[%s3244_s1 + $0xf0] sm:$0xff]   ;;  %v2530_v29 = vld [vmem:[%s3244_s1 + $0xf8] sm:$0xff]   ;;  %v23_v33 = vld [vmem:[%s3245_s0 + $0x40] sm:$0xff] }
   0xb   :  { %v2527_v26 = vld [vmem:[%s3244_s1 + $0x30] sm:$0xff]   ;;  %v2531_v30 = vld [vmem:[%s3244_s1 + $0x38] sm:$0xff]   ;;  %v16_v34 = vld [vmem:[%s3245_s0 + $0x8] sm:$0xff]  ;;  %v1958_v35 = vcombine.low %v15_v32, %v23_v33  ;;  %v1959_v36 = vcombine.high %v15_v32, %v23_v33 }
   0xc   :  { %2186 = vmatpush3.bf16.msra.mxu0 %v2511_v10  ;;  %v2528_v27 = vld [vmem:[%s3244_s1 + $0xb0] sm:$0xff]   ;;  %v2532_v31 = vld [vmem:[%s3244_s1 + $0xb8] sm:$0xff]   ;;  %v24_v37 = vld [vmem:[%s3245_s0 + $0x48] sm:$0xff] }
   0xd   :  { %2226 = vmatpush3.bf16.msra.mxu1 %v2512_v11  ;;  %2187 = vmatprep.subr.bf16.mxu0 %v2513_v12  ;;  %v1960_v38 = vcombine.low %v16_v34, %v24_v37  ;;  %v1961_v39 = vcombine.high %v16_v34, %v24_v37  ;;  %v2533_v40 = vld [vmem:[%s3244_s1 + $0x140] sm:$0xff]   ;;  %v2537_v44 = vld [vmem:[%s3244_s1 + $0x148] sm:$0xff]   ;;  %v2541_v56 = vld [vmem:[%s3244_s1 + $0x150] sm:$0xff]  }
   0xe   :  { %2227 = vmatprep.subr.bf16.mxu1 %v2514_v13  ;;  %1430 = vmatprep.mubr.bf16.mxu0 %v1959_v36  ;;  %v2534_v41 = vld [vmem:[%s3244_s1 + $0x1c0] sm:$0xff]   ;;  %v2538_v45 = vld [vmem:[%s3244_s1 + $0x1c8] sm:$0xff]   ;;  %v2542_v57 = vld [vmem:[%s3244_s1 + $0x1d0] sm:$0xff]  }
   0xf   :  { %1494 = vmatprep.mubr.bf16.mxu1 %v1961_v39  ;;  %v2535_v42 = vld [vmem:[%s3244_s1 + $0x100] sm:$0xff]   ;;  %v2539_v46 = vld [vmem:[%s3244_s1 + $0x108] sm:$0xff]   ;;  %v2543_v58 = vld [vmem:[%s3244_s1 + $0x110] sm:$0xff]  }
  0x10   :  { %2188 = vmatpush3.bf16.msra.mxu0 %v2515_v14  ;;  %v2536_v43 = vld [vmem:[%s3244_s1 + $0x180] sm:$0xff]   ;;  %v2540_v47 = vld [vmem:[%s3244_s1 + $0x188] sm:$0xff]   ;;  %v2544_v59 = vld [vmem:[%s3244_s1 + $0x190] sm:$0xff]  }
  0x11   :  { %2228 = vmatpush3.bf16.msra.mxu1 %v2516_v15  ;;  %2189 = vmatprep.subr.bf16.mxu0 %v2517_v16  ;;  %v31_v48 = vld [vmem:[%s3245_s0 + $0x80] sm:$0xff]  ;;  %v32_v51 = vld [vmem:[%s3245_s0 + $0x88] sm:$0xff]  ;;  %v2545_v60 = vld [vmem:[%s3244_s1 + $0x158] sm:$0xff]  }
  0x12   :  { %2229 = vmatprep.subr.bf16.mxu1 %v2518_v17  ;;  %v39_v49 = vld [vmem:[%s3245_s0 + $0xc0] sm:$0xff]  ;;  %v40_v52 = vld [vmem:[%s3245_s0 + $0xc8] sm:$0xff]  ;;  %v2546_v61 = vld [vmem:[%s3244_s1 + $0x1d8] sm:$0xff]  }
  0x13   :  { %v1975_v50 = vcombine.high %v31_v48, %v39_v49  ;;  %v1974_v53 = vcombine.low %v31_v48, %v39_v49  ;;  %v1977_v54 = vcombine.high %v32_v51, %v40_v52  ;;  %v1976_v55 = vcombine.low %v32_v51, %v40_v52  ;;  %v2547_v62 = vld [vmem:[%s3244_s1 + $0x118] sm:$0xff]   ;;  %v47_v0 = vld [vmem:[%s3245_s0 + $0x100] sm:$0xff]  ;;  %v48_v2 = vld [vmem:[%s3245_s0 + $0x108] sm:$0xff] }
  0x14   :  { %2190 = vmatpush3.bf16.msra.mxu0 %v2519_v18  ;;  %v2548_v63 = vld [vmem:[%s3244_s1 + $0x198] sm:$0xff]   ;;  %v55_v1 = vld [vmem:[%s3245_s0 + $0x140] sm:$0xff]  ;;  %v56_v3 = vld [vmem:[%s3245_s0 + $0x148] sm:$0xff] }
  0x15   :  { %2230 = vmatpush3.bf16.msra.mxu1 %v2520_v19  ;;  %2191 = vmatprep.subr.bf16.mxu0 %v2521_v20  ;;  %v1991_v4 = vcombine.high %v47_v0, %v55_v1  ;;  %v1993_v5 = vcombine.high %v48_v2, %v56_v3  ;;  %v1990_v6 = vcombine.low %v47_v0, %v55_v1  ;;  %v2549_v8 = vld [vmem:[%s3244_s1 + $0x160] sm:$0xff]   ;;  %v2553_v12 = vld [vmem:[%s3244_s1 + $0x168] sm:$0xff]   ;;  %v18_v32 = vld [vmem:[%s3245_s0 + $0x18] sm:$0xff] }
  0x16   :  { %2231 = vmatprep.subr.bf16.mxu1 %v2522_v21  ;;  %v1992_v7 = vcombine.low %v48_v2, %v56_v3  ;;  %v2550_v9 = vld [vmem:[%s3244_s1 + $0x1e0] sm:$0xff]   ;;  %v2554_v13 = vld [vmem:[%s3244_s1 + $0x1e8] sm:$0xff]   ;;  %v2561_v21 = vld [vmem:[%s3244_s1 + $0x170] sm:$0xff]  }
  0x17   :  { %v2551_v10 = vld [vmem:[%s3244_s1 + $0x120] sm:$0xff]   ;;  %v2555_v14 = vld [vmem:[%s3244_s1 + $0x128] sm:$0xff]   ;;  %v26_v33 = vld [vmem:[%s3245_s0 + $0x58] sm:$0xff] }
  0x18   :  { %2192 = vmatpush3.bf16.msra.mxu0 %v2523_v22  ;;  %v2552_v11 = vld [vmem:[%s3244_s1 + $0x1a0] sm:$0xff]   ;;  %v2556_v15 = vld [vmem:[%s3244_s1 + $0x1a8] sm:$0xff]   ;;  %v1964_v36 = vcombine.low %v18_v32, %v26_v33  ;;  %v34_v48 = vld [vmem:[%s3245_s0 + $0x98] sm:$0xff] }
  0x19   :  { %2232 = vmatpush3.bf16.msra.mxu1 %v2524_v23  ;;  %2193 = vmatprep.subr.bf16.mxu0 %v2525_v24  ;;  %v63_v16 = vld [vmem:[%s3245_s0 + $0x180] sm:$0x11]  ;;  %v64_v17 = vld [vmem:[%s3245_s0 + $0x188] sm:$0x11]  ;;  %v2562_v23 = vld [vmem:[%s3244_s1 + $0x1f0] sm:$0xff]  }
  0x1a   :  { %2233 = vmatprep.subr.bf16.mxu1 %v2526_v25  ;;  %v2007_v18 = vcombine.high %v63_v16, %v63_v16  ;;  %v2009_v19 = vcombine.high %v64_v17, %v64_v17  ;;  %v2006_v20 = vcombine.low %v63_v16, %v63_v16  ;;  %v2008_v22 = vcombine.low %v64_v17, %v64_v17  ;;  %v2563_v24 = vld [vmem:[%s3244_s1 + $0x130] sm:$0xff]   ;;  %v2569_v37 = vld [vmem:[%s3244_s1 + $0x240] sm:$0xff]   ;;  %v50_v1 = vld [vmem:[%s3245_s0 + $0x118] sm:$0xff] }
  0x1b   :  { %v2564_v25 = vld [vmem:[%s3244_s1 + $0x1b0] sm:$0xff]   ;;  %v2570_v39 = vld [vmem:[%s3244_s1 + $0x2c0] sm:$0xff]   ;;  %v58_v2 = vld [vmem:[%s3245_s0 + $0x158] sm:$0xff] }
  0x1c   :  { %2194 = vmatpush3.bf16.msra.mxu0 %v2527_v26  ;;  %v2565_v26 = vld [vmem:[%s3244_s1 + $0x178] sm:$0xff]  }
  0x1d   :  { %2234 = vmatpush3.bf16.msra.mxu1 %v2528_v27  ;;  %2195 = vmatprep.subr.bf16.mxu0 %v2529_v28  ;;  %v2566_v27 = vld [vmem:[%s3244_s1 + $0x1f8] sm:$0xff]  }
  0x1e   :  { %2235 = vmatprep.subr.bf16.mxu1 %v2530_v29  ;;  %v2567_v28 = vld [vmem:[%s3244_s1 + $0x138] sm:$0xff]  }
  0x1f   :  { %v2568_v29 = vld [vmem:[%s3244_s1 + $0x1b8] sm:$0xff]  }
  0x20   :  { %2196 = vmatpush3.bf16.msra.mxu0 %v2531_v30  ;;  %v17_v30 = vld [vmem:[%s3245_s0 + $0x10] sm:$0xff]  ;;  %v66_v16 = vld [vmem:[%s3245_s0 + $0x198] sm:$0x11] }
  0x21   :  { %2236 = vmatpush3.bf16.msra.mxu1 %v2532_v31  ;;  %2261 = vmatprep.subr.bf16.mxu0 %v2533_v40  ;;  %v25_v31 = vld [vmem:[%s3245_s0 + $0x50] sm:$0xff]  ;;  %v2571_v40 = vld [vmem:[%s3244_s1 + $0x200] sm:$0xff]  }
  0x22   :  { %2301 = vmatprep.subr.bf16.mxu1 %v2534_v41  ;;  %v1962_v34 = vcombine.low %v17_v30, %v25_v31  ;;  %v2572_v41 = vld [vmem:[%s3244_s1 + $0x280] sm:$0xff]  }
  0x23   :  { %1431 = vmatmul.mubr.bf16.vlgmr.msra.gmra.mrb[0].mxu0 %v1958_v35  ;;  %v1963_v35 = vcombine.high %v17_v30, %v25_v31 }
  0x24   :  { %1495 = vmatmul.mubr.bf16.vlgmr.msra.gmra.mrb[0].mxu1 %v1960_v38  ;;  %2262 = vmatpush3.bf16.msra.mxu0 %v2535_v42  ;;  %v1965_v38 = vcombine.high %v18_v32, %v26_v33  ;;  %v2573_v42 = vld [vmem:[%s3244_s1 + $0x248] sm:$0xff]  }
  0x25   :  { %2302 = vmatpush3.bf16.msra.mxu1 %v2536_v43  ;;  %2263 = vmatprep.subr.bf16.mxu0 %v2537_v44  ;;  %v2574_v43 = vld [vmem:[%s3244_s1 + $0x2c8] sm:$0xff]  }
  0x26   :  { %2303 = vmatprep.subr.bf16.mxu1 %v2538_v45  ;;  %1438 = vmatprep.mubr.bf16.mxu0 %v1975_v50  ;;  %v2575_v44 = vld [vmem:[%s3244_s1 + $0x208] sm:$0xff]   ;;  %v42_v50 = vld [vmem:[%s3245_s0 + $0xd8] sm:$0xff] }
  0x27   :  { %1502 = vmatprep.mubr.bf16.mxu1 %v1977_v54  ;;  %v2576_v45 = vld [vmem:[%s3244_s1 + $0x288] sm:$0xff]   ;;  %v1981_v52 = vcombine.high %v34_v48, %v42_v50  ;;  %v2577_v54 = vld [vmem:[%s3244_s1 + $0x250] sm:$0xff]  }
  0x28   :  { %2264 = vmatpush3.bf16.msra.mxu0 %v2539_v46  ;;  %v33_v46 = vld [vmem:[%s3245_s0 + $0x90] sm:$0xff]  ;;  %v20_v32 = vld [vmem:[%s3245_s0 + $0x28] sm:$0xff] }
  0x29   :  { %2304 = vmatpush3.bf16.msra.mxu1 %v2540_v47  ;;  %2265 = vmatprep.subr.bf16.mxu0 %v2541_v56  ;;  %v41_v47 = vld [vmem:[%s3245_s0 + $0xd0] sm:$0xff]  ;;  %v28_v33 = vld [vmem:[%s3245_s0 + $0x68] sm:$0xff] }
  0x2a   :  { %2305 = vmatprep.subr.bf16.mxu1 %v2542_v57  ;;  %v1979_v49 = vcombine.high %v33_v46, %v41_v47  ;;  %v1978_v51 = vcombine.low %v33_v46, %v41_v47  ;;  %v2579_v56 = vld [vmem:[%s3244_s1 + $0x210] sm:$0xff]   ;;  %v36_v46 = vld [vmem:[%s3245_s0 + $0xa8] sm:$0xff] }
  0x2b   :  { %1439 = vmatmul.mubr.bf16.gmra.mrb[4].mxu0 %v1974_v53  ;;  %v1980_v53 = vcombine.low %v34_v48, %v42_v50  ;;  %v2580_v57 = vld [vmem:[%s3244_s1 + $0x290] sm:$0xff]   ;;  %v44_v47 = vld [vmem:[%s3245_s0 + $0xe8] sm:$0xff] }
  0x2c   :  { %1503 = vmatmul.mubr.bf16.gmra.mrb[4].mxu1 %v1976_v55  ;;  %2266 = vmatpush3.bf16.msra.mxu0 %v2543_v58  ;;  %v2578_v55 = vld [vmem:[%s3244_s1 + $0x2d0] sm:$0xff]   ;;  %v2581_v58 = vld [vmem:[%s3244_s1 + $0x258] sm:$0xff]  }
  0x2d   :  { %2306 = vmatpush3.bf16.msra.mxu1 %v2544_v59  ;;  %2267 = vmatprep.subr.bf16.mxu0 %v2545_v60  ;;  %v2582_v59 = vld [vmem:[%s3244_s1 + $0x2d8] sm:$0xff]  }
  0x2e   :  { %2307 = vmatprep.subr.bf16.mxu1 %v2546_v61  ;;  %1446 = vmatprep.mubr.bf16.mxu0 %v1991_v4  ;;  %v2583_v60 = vld [vmem:[%s3244_s1 + $0x218] sm:$0xff]   ;;  %v1997_v4 = vcombine.high %v50_v1, %v58_v2 }
  0x2f   :  { %1510 = vmatprep.mubr.bf16.mxu1 %v1993_v5  ;;  %v2584_v61 = vld [vmem:[%s3244_s1 + $0x298] sm:$0xff]   ;;  %v1996_v5 = vcombine.low %v50_v1, %v58_v2 }
  0x30   :  { %2268 = vmatpush3.bf16.msra.mxu0 %v2547_v62  ;;  %v49_v62 = vld [vmem:[%s3245_s0 + $0x110] sm:$0xff] }
  0x31   :  { %2308 = vmatpush3.bf16.msra.mxu1 %v2548_v63  ;;  %2269 = vmatprep.subr.bf16.mxu0 %v2549_v8  ;;  %v57_v63 = vld [vmem:[%s3245_s0 + $0x150] sm:$0xff]  ;;  %v2587_v8 = vld [vmem:[%s3244_s1 + $0x220] sm:$0xff]  }
  0x32   :  { %2309 = vmatprep.subr.bf16.mxu1 %v2550_v9  ;;  %v1995_v0 = vcombine.high %v49_v62, %v57_v63  ;;  %v1994_v3 = vcombine.low %v49_v62, %v57_v63  ;;  %v2588_v9 = vld [vmem:[%s3244_s1 + $0x2a0] sm:$0xff]   ;;  %v52_v62 = vld [vmem:[%s3245_s0 + $0x128] sm:$0xff] }
  0x33   :  { %1447 = vmatmul.mubr.bf16.gmra.mrb[8].mxu0 %v1990_v6  ;;  %v2585_v6 = vld [vmem:[%s3244_s1 + $0x260] sm:$0xff]  }
  0x34   :  { %1511 = vmatmul.mubr.bf16.gmra.mrb[8].mxu1 %v1992_v7  ;;  %2270 = vmatpush3.bf16.msra.mxu0 %v2551_v10  ;;  %v2586_v7 = vld [vmem:[%s3244_s1 + $0x2e0] sm:$0xff]   ;;  %v2589_v10 = vld [vmem:[%s3244_s1 + $0x268] sm:$0xff]  }
  0x35   :  { %2310 = vmatpush3.bf16.msra.mxu1 %v2552_v11  ;;  %2271 = vmatprep.subr.bf16.mxu0 %v2553_v12  ;;  %v2590_v11 = vld [vmem:[%s3244_s1 + $0x2e8] sm:$0xff]  }
  0x36   :  { %2311 = vmatprep.subr.bf16.mxu1 %v2554_v13  ;;  %1454 = vmatprep.mubr.bf16.mxu0 %v2007_v18  ;;  %v2591_v12 = vld [vmem:[%s3244_s1 + $0x228] sm:$0xff]   ;;  %v2013_v18 = vcombine.high %v66_v16, %v66_v16 }
  0x37   :  { %1518 = vmatprep.mubr.bf16.mxu1 %v2009_v19  ;;  %v2592_v13 = vld [vmem:[%s3244_s1 + $0x2a8] sm:$0xff]   ;;  %v2012_v19 = vcombine.low %v66_v16, %v66_v16 }
  0x38   :  { %2272 = vmatpush3.bf16.msra.mxu0 %v2555_v14  ;;  %v65_v14 = vld [vmem:[%s3245_s0 + $0x190] sm:$0x11] }
  0x39   :  { %2312 = vmatpush3.bf16.msra.mxu1 %v2556_v15  ;;  %2273 = vmatprep.subr.bf16.mxu0 %v2561_v21  ;;  %v2011_v15 = vcombine.high %v65_v14, %v65_v14  ;;  %v2010_v17 = vcombine.low %v65_v14, %v65_v14  ;;  %v2598_v21 = vld [vmem:[%s3244_s1 + $0x2f0] sm:$0xff]  }
  0x3a   :  { %2313 = vmatprep.subr.bf16.mxu1 %v2562_v23  ;;  %v2600_v23 = vld [vmem:[%s3244_s1 + $0x2b0] sm:$0xff]  }
  0x3b   :  { %1455 = vmatmul.mubr.bf16.gmra.mrb[12].mxu0 %v2006_v20  ;;  %v2597_v20 = vld [vmem:[%s3244_s1 + $0x270] sm:$0xff]  }
  0x3c   :  { %1519 = vmatmul.mubr.bf16.gmra.mrb[12].mxu1 %v2008_v22  ;;  %2274 = vmatpush3.bf16.msra.mxu0 %v2563_v24  ;;  %v2599_v22 = vld [vmem:[%s3244_s1 + $0x230] sm:$0xff]   ;;  %v2601_v24 = vld [vmem:[%s3244_s1 + $0x278] sm:$0xff]  }
  0x3d   :  { %2314 = vmatpush3.bf16.msra.mxu1 %v2564_v25  ;;  %2275 = vmatprep.subr.bf16.mxu0 %v2565_v26  ;;  %v2602_v25 = vld [vmem:[%s3244_s1 + $0x2f8] sm:$0xff]  }
  0x3e   :  { %2315 = vmatprep.subr.bf16.mxu1 %v2566_v27  ;;  %1558 = vmatprep.mubr.bf16.mxu0 %v1963_v35  ;;  %v2603_v26 = vld [vmem:[%s3244_s1 + $0x238] sm:$0xff]   ;;  %v1969_v35 = vcombine.high %v20_v32, %v28_v33 }
  0x3f   :  { %1622 = vmatprep.mubr.bf16.mxu1 %v1965_v38  ;;  %v2604_v27 = vld [vmem:[%s3244_s1 + $0x2b8] sm:$0xff]   ;;  %v2607_v38 = vld [vmem:[%s3244_s1 + $0x300] sm:$0xff]  }
  0x40   :  { %2276 = vmatpush3.bf16.msra.mxu0 %v2567_v28  ;;  %v19_v28 = vld [vmem:[%s3245_s0 + $0x20] sm:$0xff] }
  0x41   :  { %2316 = vmatpush3.bf16.msra.mxu1 %v2568_v29  ;;  %2341 = vmatprep.subr.bf16.mxu0 %v2569_v37  ;;  %v27_v29 = vld [vmem:[%s3245_s0 + $0x60] sm:$0xff] }
  0x42   :  { %2381 = vmatprep.subr.bf16.mxu1 %v2570_v39  ;;  %v1966_v30 = vcombine.low %v19_v28, %v27_v29  ;;  %v1967_v31 = vcombine.high %v19_v28, %v27_v29  ;;  %v2606_v37 = vld [vmem:[%s3244_s1 + $0x3c0] sm:$0xff]   ;;  %v22_v28 = vld [vmem:[%s3245_s0 + $0x38] sm:$0xff] }
  0x43   :  { %1559 = vmatmul.mubr.bf16.vlgmr.msra.gmra.mrb[16].mxu0 %v1962_v34  ;;  %v1968_v34 = vcombine.low %v20_v32, %v28_v33  ;;  %v2608_v39 = vld [vmem:[%s3244_s1 + $0x380] sm:$0xff]   ;;  %v37_v32 = vld [vmem:[%s3245_s0 + $0xb0] sm:$0xff] }
  0x44   :  { %1623 = vmatmul.mubr.bf16.vlgmr.msra.gmra.mrb[16].mxu1 %v1964_v36  ;;  %2342 = vmatpush3.bf16.msra.mxu0 %v2571_v40  ;;  %v2605_v36 = vld [vmem:[%s3244_s1 + $0x340] sm:$0xff]   ;;  %v2609_v40 = vld [vmem:[%s3244_s1 + $0x348] sm:$0xff]   ;;  %v45_v33 = vld [vmem:[%s3245_s0 + $0xf0] sm:$0xff] }
  0x45   :  { %2382 = vmatpush3.bf16.msra.mxu1 %v2572_v41  ;;  %2343 = vmatprep.subr.bf16.mxu0 %v2573_v42  ;;  %v2610_v41 = vld [vmem:[%s3244_s1 + $0x3c8] sm:$0xff]  }
  0x46   :  { %2383 = vmatprep.subr.bf16.mxu1 %v2574_v43  ;;  %1566 = vmatprep.mubr.bf16.mxu0 %v1979_v49  ;;  %v2611_v42 = vld [vmem:[%s3244_s1 + $0x308] sm:$0xff]   ;;  %v1985_v49 = vcombine.high %v36_v46, %v44_v47 }
  0x47   :  { %1630 = vmatprep.mubr.bf16.mxu1 %v1981_v52  ;;  %v2612_v43 = vld [vmem:[%s3244_s1 + $0x388] sm:$0xff]   ;;  %v2613_v52 = vld [vmem:[%s3244_s1 + $0x350] sm:$0xff]  }
  0x48   :  { %2344 = vmatpush3.bf16.msra.mxu0 %v2575_v44  ;;  %v35_v44 = vld [vmem:[%s3245_s0 + $0xa0] sm:$0xff] }
  0x49   :  { %2384 = vmatpush3.bf16.msra.mxu1 %v2576_v45  ;;  %2345 = vmatprep.subr.bf16.mxu0 %v2577_v54  ;;  %v43_v45 = vld [vmem:[%s3245_s0 + $0xe0] sm:$0xff]  ;;  %v2615_v54 = vld [vmem:[%s3244_s1 + $0x310] sm:$0xff]  }
  0x4a   :  { %2385 = vmatprep.subr.bf16.mxu1 %v2578_v55  ;;  %v1983_v48 = vcombine.high %v35_v44, %v43_v45  ;;  %v1982_v50 = vcombine.low %v35_v44, %v43_v45  ;;  %v2616_v55 = vld [vmem:[%s3244_s1 + $0x390] sm:$0xff]   ;;  %v1986_v44 = vcombine.low %v37_v32, %v45_v33 }
  0x4b   :  { %1567 = vmatmul.mubr.bf16.gmra.mrb[20].mxu0 %v1978_v51  ;;  %v1984_v51 = vcombine.low %v36_v46, %v44_v47 }
  0x4c   :  { %1631 = vmatmul.mubr.bf16.gmra.mrb[20].mxu1 %v1980_v53  ;;  %2346 = vmatpush3.bf16.msra.mxu0 %v2579_v56  ;;  %v2614_v53 = vld [vmem:[%s3244_s1 + $0x3d0] sm:$0xff]   ;;  %v2617_v56 = vld [vmem:[%s3244_s1 + $0x358] sm:$0xff]  }
  0x4d   :  { %2386 = vmatpush3.bf16.msra.mxu1 %v2580_v57  ;;  %2347 = vmatprep.subr.bf16.mxu0 %v2581_v58  ;;  %v2618_v57 = vld [vmem:[%s3244_s1 + $0x3d8] sm:$0xff]  }
  0x4e   :  { %2387 = vmatprep.subr.bf16.mxu1 %v2582_v59  ;;  %1574 = vmatprep.mubr.bf16.mxu0 %v1995_v0  ;;  %v2619_v58 = vld [vmem:[%s3244_s1 + $0x318] sm:$0xff]   ;;  %v60_v0 = vld [vmem:[%s3245_s0 + $0x168] sm:$0xff] }
  0x4f   :  { %1638 = vmatprep.mubr.bf16.mxu1 %v1997_v4  ;;  %v2620_v59 = vld [vmem:[%s3244_s1 + $0x398] sm:$0xff]   ;;  %v2001_v2 = vcombine.high %v52_v62, %v60_v0  ;;  %v2621_v4 = vld [vmem:[%s3244_s1 + $0x360] sm:$0xff]  }
  0x50   :  { %2348 = vmatpush3.bf16.msra.mxu0 %v2583_v60  ;;  %v51_v60 = vld [vmem:[%s3245_s0 + $0x120] sm:$0xff] }
  0x51   :  { %2388 = vmatpush3.bf16.msra.mxu1 %v2584_v61  ;;  %2349 = vmatprep.subr.bf16.mxu0 %v2585_v6  ;;  %v59_v61 = vld [vmem:[%s3245_s0 + $0x160] sm:$0xff] }
  0x52   :  { %2389 = vmatprep.subr.bf16.mxu1 %v2586_v7  ;;  %v1999_v63 = vcombine.high %v51_v60, %v59_v61  ;;  %v1998_v1 = vcombine.low %v51_v60, %v59_v61  ;;  %v2623_v6 = vld [vmem:[%s3244_s1 + $0x320] sm:$0xff]  }
  0x53   :  { %1575 = vmatmul.mubr.bf16.gmra.mrb[24].mxu0 %v1994_v3  ;;  %v2000_v3 = vcombine.low %v52_v62, %v60_v0  ;;  %v2624_v7 = vld [vmem:[%s3244_s1 + $0x3a0] sm:$0xff]  }
  0x54   :  { %1639 = vmatmul.mubr.bf16.gmra.mrb[24].mxu1 %v1996_v5  ;;  %2350 = vmatpush3.bf16.msra.mxu0 %v2587_v8  ;;  %v2622_v5 = vld [vmem:[%s3244_s1 + $0x3e0] sm:$0xff]   ;;  %v2625_v8 = vld [vmem:[%s3244_s1 + $0x368] sm:$0xff]  }
  0x55   :  { %2390 = vmatpush3.bf16.msra.mxu1 %v2588_v9  ;;  %2351 = vmatprep.subr.bf16.mxu0 %v2589_v10  ;;  %v2626_v9 = vld [vmem:[%s3244_s1 + $0x3e8] sm:$0xff]  }
  0x56   :  { %2391 = vmatprep.subr.bf16.mxu1 %v2590_v11  ;;  %1582 = vmatprep.mubr.bf16.mxu0 %v2011_v15  ;;  %v2627_v10 = vld [vmem:[%s3244_s1 + $0x328] sm:$0xff]  }
  0x57   :  { %1646 = vmatprep.mubr.bf16.mxu1 %v2013_v18  ;;  %v2628_v11 = vld [vmem:[%s3244_s1 + $0x3a8] sm:$0xff]   ;;  %v2633_v18 = vld [vmem:[%s3244_s1 + $0x370] sm:$0xff]  }
  0x58   :  { %2352 = vmatpush3.bf16.msra.mxu0 %v2591_v12  ;;  %v67_v12 = vld [vmem:[%s3245_s0 + $0x1a0] sm:$0x11] }
  0x59   :  { %2392 = vmatpush3.bf16.msra.mxu1 %v2592_v13  ;;  %2353 = vmatprep.subr.bf16.mxu0 %v2597_v20  ;;  %v68_v13 = vld [vmem:[%s3245_s0 + $0x1a8] sm:$0x11]  ;;  %v2015_v14 = vcombine.high %v67_v12, %v67_v12  ;;  %v2014_v16 = vcombine.low %v67_v12, %v67_v12  ;;  %v2635_v20 = vld [vmem:[%s3244_s1 + $0x330] sm:$0xff]  }
  0x5a   :  { %2393 = vmatprep.subr.bf16.mxu1 %v2598_v21  ;;  %v2017_v15 = vcombine.high %v68_v13, %v68_v13  ;;  %v2636_v21 = vld [vmem:[%s3244_s1 + $0x3b0] sm:$0xff]  }
  0x5b   :  { %1583 = vmatmul.mubr.bf16.gmra.mrb[28].mxu0 %v2010_v17  ;;  %v2016_v17 = vcombine.low %v68_v13, %v68_v13 }
  0x5c   :  { %1647 = vmatmul.mubr.bf16.gmra.mrb[28].mxu1 %v2012_v19  ;;  %2354 = vmatpush3.bf16.msra.mxu0 %v2599_v22  ;;  %v2634_v19 = vld [vmem:[%s3244_s1 + $0x3f0] sm:$0xff]   ;;  %v2637_v22 = vld [vmem:[%s3244_s1 + $0x378] sm:$0xff]  }
  0x5d   :  { %2394 = vmatpush3.bf16.msra.mxu1 %v2600_v23  ;;  %2355 = vmatprep.subr.bf16.mxu0 %v2601_v24  ;;  %v2638_v23 = vld [vmem:[%s3244_s1 + $0x3f8] sm:$0xff]  }
  0x5e   :  { %2395 = vmatprep.subr.bf16.mxu1 %v2602_v25  ;;  %1686 = vmatprep.mubr.bf16.mxu0 %v1967_v31  ;;  %v2639_v24 = vld [vmem:[%s3244_s1 + $0x338] sm:$0xff]  }
  0x5f   :  { %1750 = vmatprep.mubr.bf16.mxu1 %v1969_v35  ;;  %v2640_v25 = vld [vmem:[%s3244_s1 + $0x3b8] sm:$0xff]  }
  0x60   :  { %2356 = vmatpush3.bf16.msra.mxu0 %v2603_v26  ;;  %v21_v26 = vld [vmem:[%s3245_s0 + $0x30] sm:$0xff]  ;;  %v30_v31 = vld [vmem:[%s3245_s0 + $0x78] sm:$0xff] }
  0x61   :  { %2396 = vmatpush3.bf16.msra.mxu1 %v2604_v27  ;;  %2421 = vmatprep.subr.bf16.mxu0 %v2605_v36  ;;  %v29_v27 = vld [vmem:[%s3245_s0 + $0x70] sm:$0xff]  ;;  %v1973_v35 = vcombine.high %v22_v28, %v30_v31  ;;  %v1987_v36 = vcombine.high %v37_v32, %v45_v33 }
  0x62   :  { %2461 = vmatprep.subr.bf16.mxu1 %v2606_v37  ;;  %v1970_v29 = vcombine.low %v21_v26, %v29_v27  ;;  %v38_v37 = vld [vmem:[%s3245_s0 + $0xb8] sm:$0xff] }
  0x63   :  { %1687 = vmatmul.mubr.bf16.vlgmr.msra.gmra.mrb[32].mxu0 %v1966_v30  ;;  %v1971_v30 = vcombine.high %v21_v26, %v29_v27 }
  0x64   :  { %1751 = vmatmul.mubr.bf16.vlgmr.msra.gmra.mrb[32].mxu1 %v1968_v34  ;;  %2422 = vmatpush3.bf16.msra.mxu0 %v2607_v38  ;;  %v1972_v34 = vcombine.low %v22_v28, %v30_v31  ;;  %v46_v38 = vld [vmem:[%s3245_s0 + $0xf8] sm:$0xff] }
  0x65   :  { %2462 = vmatpush3.bf16.msra.mxu1 %v2608_v39  ;;  %2423 = vmatprep.subr.bf16.mxu0 %v2609_v40  ;;  %v1989_v39 = vcombine.high %v38_v37, %v46_v38  ;;  %v53_v40 = vld [vmem:[%s3245_s0 + $0x130] sm:$0xff]  ;;  %v1988_v45 = vcombine.low %v38_v37, %v46_v38 }
  0x66   :  { %2463 = vmatprep.subr.bf16.mxu1 %v2610_v41  ;;  %1694 = vmatprep.mubr.bf16.mxu0 %v1983_v48  ;;  %v61_v41 = vld [vmem:[%s3245_s0 + $0x170] sm:$0xff] }
  0x67   :  { %1758 = vmatprep.mubr.bf16.mxu1 %v1985_v49  ;;  %v2003_v46 = vcombine.high %v53_v40, %v61_v41  ;;  %v69_v48 = vld [vmem:[%s3245_s0 + $0x1b0] sm:$0x11]  ;;  %v70_v49 = vld [vmem:[%s3245_s0 + $0x1b8] sm:$0x11] }
  0x68   :  { %2424 = vmatpush3.bf16.msra.mxu0 %v2611_v42  ;;  %v54_v42 = vld [vmem:[%s3245_s0 + $0x138] sm:$0xff] }
  0x69   :  { %2464 = vmatpush3.bf16.msra.mxu1 %v2612_v43  ;;  %2425 = vmatprep.subr.bf16.mxu0 %v2613_v52  ;;  %v62_v43 = vld [vmem:[%s3245_s0 + $0x178] sm:$0xff]  ;;  %v2019_v52 = vcombine.high %v69_v48, %v69_v48 }
  0x6a   :  { %2465 = vmatprep.subr.bf16.mxu1 %v2614_v53  ;;  %v2005_v47 = vcombine.high %v54_v42, %v62_v43  ;;  %v2021_v53 = vcombine.high %v70_v49, %v70_v49 }
  0x6b   :  { %1695 = vmatmul.mubr.bf16.gmra.mrb[36].mxu0 %v1982_v50  ;;  %v2002_v50 = vcombine.low %v53_v40, %v61_v41 }
  0x6c   :  { %1759 = vmatmul.mubr.bf16.gmra.mrb[36].mxu1 %v1984_v51  ;;  %2426 = vmatpush3.bf16.msra.mxu0 %v2615_v54  ;;  %v2004_v51 = vcombine.low %v54_v42, %v62_v43  ;;  %v2018_v54 = vcombine.low %v69_v48, %v69_v48 }
  0x6d   :  { %2466 = vmatpush3.bf16.msra.mxu1 %v2616_v55  ;;  %2427 = vmatprep.subr.bf16.mxu0 %v2617_v56  ;;  %v2020_v55 = vcombine.low %v70_v49, %v70_v49 }
  0x6e   :  { %2467 = vmatprep.subr.bf16.mxu1 %v2618_v57  ;;  %1702 = vmatprep.mubr.bf16.mxu0 %v1999_v63 }
  0x6f   :  { %1766 = vmatprep.mubr.bf16.mxu1 %v2001_v2 }
  0x70   :  { %2428 = vmatpush3.bf16.msra.mxu0 %v2619_v58  ;;  %v1957_v58 = vld [vmem:[%s3246_s2] ss:$0 sm:$0xff] }
  0x71   :  { %2468 = vmatpush3.bf16.msra.mxu1 %v2620_v59  ;;  %2429 = vmatprep.subr.bf16.mxu0 %v2621_v4 }
  0x72   :  { %2469 = vmatprep.subr.bf16.mxu1 %v2622_v5 }
  0x73   :  { %1703 = vmatmul.mubr.bf16.gmra.mrb[40].mxu0 %v1998_v1 }
  0x74   :  { %1767 = vmatmul.mubr.bf16.gmra.mrb[40].mxu1 %v2000_v3  ;;  %2430 = vmatpush3.bf16.msra.mxu0 %v2623_v6 }
  0x75   :  { %2470 = vmatpush3.bf16.msra.mxu1 %v2624_v7  ;;  %2431 = vmatprep.subr.bf16.mxu0 %v2625_v8 }
  0x76   :  { %2471 = vmatprep.subr.bf16.mxu1 %v2626_v9  ;;  %1710 = vmatprep.mubr.bf16.mxu0 %v2015_v14 }
  0x77   :  { %1774 = vmatprep.mubr.bf16.mxu1 %v2017_v15 }
  0x78   :  { %2432 = vmatpush3.bf16.msra.mxu0 %v2627_v10 }
  0x79   :  { %2472 = vmatpush3.bf16.msra.mxu1 %v2628_v11  ;;  %2433 = vmatprep.subr.bf16.mxu0 %v2633_v18 }
  0x7a   :  { %2473 = vmatprep.subr.bf16.mxu1 %v2634_v19 }
  0x7b   :  { %1711 = vmatmul.mubr.bf16.gmra.mrb[44].mxu0 %v2014_v16 }
  0x7c   :  { %1775 = vmatmul.mubr.bf16.gmra.mrb[44].mxu1 %v2016_v17  ;;  %2434 = vmatpush3.bf16.msra.mxu0 %v2635_v20 }
  0x7d   :  { %2474 = vmatpush3.bf16.msra.mxu1 %v2636_v21  ;;  %2435 = vmatprep.subr.bf16.mxu0 %v2637_v22 }
  0x7e   :  { %2475 = vmatprep.subr.bf16.mxu1 %v2638_v23  ;;  %1814 = vmatprep.mubr.bf16.mxu0 %v1971_v30 }
  0x7f   :  { %1878 = vmatprep.mubr.bf16.mxu1 %v1973_v35 }
  0x80   :  { %2436 = vmatpush3.bf16.msra.mxu0 %v2639_v24 }
  0x81   :  { %2476 = vmatpush3.bf16.msra.mxu1 %v2640_v25 }
  0x83   :  { %1815 = vmatmul.mubr.bf16.vlgmr.msra.gmra.mrb[48].mxu0 %v1970_v29 }
  0x84   :  { %1879 = vmatmul.mubr.bf16.vlgmr.msra.gmra.mrb[48].mxu1 %v1972_v34  ;;  %1822 = vmatprep.mubr.bf16.mxu0 %v1987_v36 }
  0x85   :  { %1886 = vmatprep.mubr.bf16.mxu1 %v1989_v39 }
  0x8b   :  { %1823 = vmatmul.mubr.bf16.gmra.mrb[52].mxu0 %v1986_v44 }
  0x8c   :  { %1887 = vmatmul.mubr.bf16.gmra.mrb[52].mxu1 %v1988_v45  ;;  %1830 = vmatprep.mubr.bf16.mxu0 %v2003_v46 }
  0x8d   :  { %1894 = vmatprep.mubr.bf16.mxu1 %v2005_v47 }
  0x93   :  { %1831 = vmatmul.mubr.bf16.gmra.mrb[56].mxu0 %v2002_v50 }
  0x94   :  { %1895 = vmatmul.mubr.bf16.gmra.mrb[56].mxu1 %v2004_v51  ;;  %1838 = vmatprep.mubr.bf16.mxu0 %v2019_v52 }
  0x95   :  { %1902 = vmatprep.mubr.bf16.mxu1 %v2021_v53 }
  0x9b   :  { %1839 = vmatmul.mubr.bf16.gmra.mrb[60].mxu0 %v2018_v54 }
  0x9c   :  { %1903 = vmatmul.mubr.bf16.gmra.mrb[60].mxu1 %v2020_v55 }
  0xf6   :  { %v2197_v56 = vpop.f32.mrb[0].mxu0 }
  0xf7   :  { %v2237_v57 = vpop.f32.mrb[0].mxu1  ;;  %v2198_v59 = vpop.f32.mrb[1].mxu0 }
  0xf8   :  { %v2199_v60 = vadd.f32 %v2198_v59, %v2197_v56  ;;  %v2238_v61 = vpop.f32.mrb[1].mxu1  ;;  %v2200_v62 = vpop.f32.mrb[2].mxu0 }
  0xf9   :  { %v2239_v63 = vadd.f32 %v2238_v61, %v2237_v57  ;;  %v2240_v0 = vpop.f32.mrb[2].mxu1  ;;  %v2201_v1 = vpop.f32.mrb[3].mxu0 }
  0xfa   :  { %v1433_v2 = vadd.f32 %v2199_v60, %v1957_v58  ;;  %v2202_v3 = vadd.f32 %v2201_v1, %v2200_v62  ;;  %v2241_v4 = vpop.f32.mrb[3].mxu1 }
  0xfb   :  { %v2242_v5 = vadd.f32 %v2241_v4, %v2240_v0 }
  0xfc   :  { %v1497_v6 = vadd.f32 %v2239_v63, %v1433_v2  ;;  %v1436_v7 = vadd.f32 %v2202_v3, %v1957_v58 }
  0xfe   :  { %v1500_v8 = vadd.f32 %v2242_v5, %v1436_v7  ;;  %v2203_v9 = vpop.f32.mrb[4].mxu0 }
  0xff   :  { %v2243_v10 = vpop.f32.mrb[4].mxu1  ;;  %v2204_v11 = vpop.f32.mrb[5].mxu0 }
 0x100   :  { %v2205_v12 = vadd.f32 %v2204_v11, %v2203_v9  ;;  %v2244_v13 = vpop.f32.mrb[5].mxu1  ;;  %v2206_v14 = vpop.f32.mrb[6].mxu0 }
 0x101   :  { %v2245_v15 = vadd.f32 %v2244_v13, %v2243_v10  ;;  %v2246_v16 = vpop.f32.mrb[6].mxu1  ;;  %v2207_v17 = vpop.f32.mrb[7].mxu0 }
 0x102   :  { %v1441_v18 = vadd.f32 %v2205_v12, %v1957_v58  ;;  %v2208_v19 = vadd.f32 %v2207_v17, %v2206_v14  ;;  %v2247_v20 = vpop.f32.mrb[7].mxu1 }
 0x103   :  { %v2248_v21 = vadd.f32 %v2247_v20, %v2246_v16 }
 0x104   :  { %v1505_v22 = vadd.f32 %v2245_v15, %v1441_v18  ;;  %v1444_v23 = vadd.f32 %v2208_v19, %v1957_v58 }
 0x106   :  { %v1508_v24 = vadd.f32 %v2248_v21, %v1444_v23  ;;  %v2209_v25 = vpop.f32.mrb[8].mxu0 }
 0x107   :  { %v2249_v26 = vpop.f32.mrb[8].mxu1  ;;  %v2210_v27 = vpop.f32.mrb[9].mxu0 }
 0x108   :  { %v2250_v28 = vpop.f32.mrb[9].mxu1  ;;  %v2211_v29 = vadd.f32 %v2210_v27, %v2209_v25  ;;  %v2212_v31 = vpop.f32.mrb[10].mxu0 }
 0x109   :  { %v2251_v30 = vadd.f32 %v2250_v28, %v2249_v26  ;;  %v2252_v32 = vpop.f32.mrb[10].mxu1  ;;  %v2213_v33 = vpop.f32.mrb[11].mxu0 }
 0x10a   :  { %v2253_v34 = vpop.f32.mrb[11].mxu1  ;;  %v1449_v35 = vadd.f32 %v2211_v29, %v1957_v58  ;;  %v2214_v36 = vadd.f32 %v2213_v33, %v2212_v31 }
 0x10b   :  { %v2254_v37 = vadd.f32 %v2253_v34, %v2252_v32 }
 0x10c   :  { %v1513_v38 = vadd.f32 %v2251_v30, %v1449_v35  ;;  %v1452_v39 = vadd.f32 %v2214_v36, %v1957_v58 }
 0x10e   :  { %v1516_v40 = vadd.f32 %v2254_v37, %v1452_v39  ;;  %v2215_v41 = vpop.f32.mrb[12].mxu0 }
 0x10f   :  { %v2255_v42 = vpop.f32.mrb[12].mxu1  ;;  %v2216_v43 = vpop.f32.mrb[13].mxu0 }
 0x110   :  { %v2256_v44 = vpop.f32.mrb[13].mxu1  ;;  %v2217_v45 = vadd.f32 %v2216_v43, %v2215_v41  ;;  %v2218_v47 = vpop.f32.mrb[14].mxu0 }
 0x111   :  { %v2257_v46 = vadd.f32 %v2256_v44, %v2255_v42  ;;  %v2258_v48 = vpop.f32.mrb[14].mxu1  ;;  %v2219_v49 = vpop.f32.mrb[15].mxu0 }
 0x112   :  { %v2259_v50 = vpop.f32.mrb[15].mxu1  ;;  %v1457_v51 = vadd.f32 %v2217_v45, %v1957_v58 }
 0x114   :  { %v1521_v52 = vadd.f32 %v2257_v46, %v1457_v51 }
 0x116   :  { %v2277_v53 = vpop.f32.mrb[16].mxu0 }
 0x117   :  { %v2317_v54 = vpop.f32.mrb[16].mxu1  ;;  %v2278_v55 = vpop.f32.mrb[17].mxu0 }
 0x118   :  { %v2279_v56 = vadd.f32 %v2278_v55, %v2277_v53  ;;  %v2318_v57 = vpop.f32.mrb[17].mxu1  ;;  %v2280_v59 = vpop.f32.mrb[18].mxu0 }
 0x119   :  { %v2319_v60 = vadd.f32 %v2318_v57, %v2317_v54  ;;  %v2320_v61 = vpop.f32.mrb[18].mxu1  ;;  %v2281_v62 = vpop.f32.mrb[19].mxu0 }
 0x11a   :  { %v1561_v63 = vadd.f32 %v2279_v56, %v1497_v6  ;;  %v2282_v0 = vadd.f32 %v2281_v62, %v2280_v59  ;;  %v2321_v1 = vpop.f32.mrb[19].mxu1 }
 0x11b   :  { %v2322_v2 = vadd.f32 %v2321_v1, %v2320_v61 }
 0x11c   :  { %v1625_v3 = vadd.f32 %v2319_v60, %v1561_v63  ;;  %v1564_v4 = vadd.f32 %v2282_v0, %v1500_v8 }
 0x11e   :  { %v1628_v5 = vadd.f32 %v2322_v2, %v1564_v4  ;;  %v2283_v7 = vpop.f32.mrb[20].mxu0 }
 0x11f   :  { %v2323_v9 = vpop.f32.mrb[20].mxu1  ;;  %v2284_v58 = vpop.f32.mrb[21].mxu0 }
 0x120   :  { %v2285_v10 = vadd.f32 %v2284_v58, %v2283_v7  ;;  %v2324_v11 = vpop.f32.mrb[21].mxu1  ;;  %v2286_v12 = vpop.f32.mrb[22].mxu0 }
 0x121   :  { %v2325_v13 = vadd.f32 %v2324_v11, %v2323_v9  ;;  %v2326_v14 = vpop.f32.mrb[22].mxu1  ;;  %v2287_v15 = vpop.f32.mrb[23].mxu0 }
 0x122   :  { %v1569_v16 = vadd.f32 %v2285_v10, %v1505_v22  ;;  %v2288_v17 = vadd.f32 %v2287_v15, %v2286_v12  ;;  %v2327_v18 = vpop.f32.mrb[23].mxu1 }
 0x123   :  { %v2328_v19 = vadd.f32 %v2327_v18, %v2326_v14 }
 0x124   :  { %v1633_v6 = vadd.f32 %v2325_v13, %v1569_v16  ;;  %v1572_v20 = vadd.f32 %v2288_v17, %v1508_v24 }
 0x126   :  { %v1636_v21 = vadd.f32 %v2328_v19, %v1572_v20  ;;  %v2289_v23 = vpop.f32.mrb[24].mxu0 }
 0x127   :  { %v2329_v25 = vpop.f32.mrb[24].mxu1  ;;  %v2290_v8 = vpop.f32.mrb[25].mxu0 }
 0x128   :  { %v2291_v26 = vadd.f32 %v2290_v8, %v2289_v23  ;;  %v2330_v27 = vpop.f32.mrb[25].mxu1  ;;  %v2292_v28 = vpop.f32.mrb[26].mxu0 }
 0x129   :  { %v2331_v29 = vadd.f32 %v2330_v27, %v2329_v25  ;;  %v2332_v30 = vpop.f32.mrb[26].mxu1  ;;  %v2293_v31 = vpop.f32.mrb[27].mxu0 }
 0x12a   :  { %v1577_v32 = vadd.f32 %v2291_v26, %v1513_v38  ;;  %v2294_v33 = vadd.f32 %v2293_v31, %v2292_v28  ;;  %v2333_v34 = vpop.f32.mrb[27].mxu1 }
 0x12b   :  { %v2334_v35 = vadd.f32 %v2333_v34, %v2332_v30 }
 0x12c   :  { %v1641_v22 = vadd.f32 %v2331_v29, %v1577_v32  ;;  %v1580_v36 = vadd.f32 %v2294_v33, %v1516_v40 }
 0x12e   :  { %v1644_v37 = vadd.f32 %v2334_v35, %v1580_v36  ;;  %v2295_v39 = vpop.f32.mrb[28].mxu0 }
 0x12f   :  { %v2335_v41 = vpop.f32.mrb[28].mxu1  ;;  %v2296_v24 = vpop.f32.mrb[29].mxu0 }
 0x130   :  { %v2297_v42 = vadd.f32 %v2296_v24, %v2295_v39  ;;  %v2336_v43 = vpop.f32.mrb[29].mxu1  ;;  %v2298_v44 = vpop.f32.mrb[30].mxu0 }
 0x131   :  { %v2337_v45 = vadd.f32 %v2336_v43, %v2335_v41  ;;  %v2338_v46 = vpop.f32.mrb[30].mxu1  ;;  %v2299_v47 = vpop.f32.mrb[31].mxu0 }
 0x132   :  { %v1585_v48 = vadd.f32 %v2297_v42, %v1521_v52  ;;  %v2339_v49 = vpop.f32.mrb[31].mxu1 }
 0x134   :  { %v1649_v50 = vadd.f32 %v2337_v45, %v1585_v48 }
 0x136   :  { %v2357_v51 = vpop.f32.mrb[32].mxu0 }
 0x137   :  { %v2397_v38 = vpop.f32.mrb[32].mxu1  ;;  %v2358_v53 = vpop.f32.mrb[33].mxu0 }
 0x138   :  { %v2359_v54 = vadd.f32 %v2358_v53, %v2357_v51  ;;  %v2398_v55 = vpop.f32.mrb[33].mxu1  ;;  %v2360_v56 = vpop.f32.mrb[34].mxu0 }
 0x139   :  { %v2399_v40 = vadd.f32 %v2398_v55, %v2397_v38  ;;  %v2400_v57 = vpop.f32.mrb[34].mxu1  ;;  %v2361_v59 = vpop.f32.mrb[35].mxu0 }
 0x13a   :  { %v1689_v60 = vadd.f32 %v2359_v54, %v1625_v3  ;;  %v2362_v61 = vadd.f32 %v2361_v59, %v2360_v56  ;;  %v2401_v62 = vpop.f32.mrb[35].mxu1 }
 0x13b   :  { %v2402_v63 = vadd.f32 %v2401_v62, %v2400_v57 }
 0x13c   :  { %v1753_v0 = vadd.f32 %v2399_v40, %v1689_v60  ;;  %v1692_v1 = vadd.f32 %v2362_v61, %v1628_v5 }
 0x13e   :  { %v1756_v2 = vadd.f32 %v2402_v63, %v1692_v1  ;;  %v2363_v4 = vpop.f32.mrb[36].mxu0 }
 0x13f   :  { %v2403_v52 = vpop.f32.mrb[36].mxu1  ;;  %v2364_v7 = vpop.f32.mrb[37].mxu0 }
 0x140   :  { %v2404_v9 = vpop.f32.mrb[37].mxu1  ;;  %v2365_v58 = vadd.f32 %v2364_v7, %v2363_v4  ;;  %v2366_v11 = vpop.f32.mrb[38].mxu0 }
 0x141   :  { %v2405_v10 = vadd.f32 %v2404_v9, %v2403_v52  ;;  %v2406_v12 = vpop.f32.mrb[38].mxu1  ;;  %v2367_v13 = vpop.f32.mrb[39].mxu0 }
 0x142   :  { %v2407_v14 = vpop.f32.mrb[39].mxu1  ;;  %v1697_v15 = vadd.f32 %v2365_v58, %v1633_v6  ;;  %v2368_v16 = vadd.f32 %v2367_v13, %v2366_v11 }
 0x143   :  { %v2408_v17 = vadd.f32 %v2407_v14, %v2406_v12 }
 0x144   :  { %v1761_v3 = vadd.f32 %v2405_v10, %v1697_v15  ;;  %v1700_v18 = vadd.f32 %v2368_v16, %v1636_v21 }
 0x146   :  { %v3220_v19 = vadd.f32 %v2408_v17, %v1700_v18  ;;  %v2369_v20 = vpop.f32.mrb[40].mxu0 }
 0x147   :  { %v2409_v5 = vpop.f32.mrb[40].mxu1  ;;  %v2370_v23 = vpop.f32.mrb[41].mxu0 }
 0x148   :  { %v2371_v25 = vadd.f32 %v2370_v23, %v2369_v20  ;;  %v2410_v8 = vpop.f32.mrb[41].mxu1  ;;  %v2372_v26 = vpop.f32.mrb[42].mxu0 }
 0x149   :  { %v2411_v27 = vadd.f32 %v2410_v8, %v2409_v5  ;;  %v2412_v28 = vpop.f32.mrb[42].mxu1  ;;  %v2373_v29 = vpop.f32.mrb[43].mxu0 }
 0x14a   :  { %v1705_v30 = vadd.f32 %v2371_v25, %v1641_v22  ;;  %v2374_v31 = vadd.f32 %v2373_v29, %v2372_v26  ;;  %v2413_v32 = vpop.f32.mrb[43].mxu1 }
 0x14b   :  { %v2414_v33 = vadd.f32 %v2413_v32, %v2412_v28 }
 0x14c   :  { %v3222_v6 = vadd.f32 %v2411_v27, %v1705_v30  ;;  %v1708_v34 = vadd.f32 %v2374_v31, %v1644_v37 }
 0x14e   :  { %v3224_v35 = vadd.f32 %v2414_v33, %v1708_v34  ;;  %v2375_v21 = vpop.f32.mrb[44].mxu0 }
 0x14f   :  { %v2415_v36 = vpop.f32.mrb[44].mxu1  ;;  %v2376_v39 = vpop.f32.mrb[45].mxu0 }
 0x150   :  { %v2416_v41 = vpop.f32.mrb[45].mxu1  ;;  %v2377_v24 = vadd.f32 %v2376_v39, %v2375_v21  ;;  %v2378_v43 = vpop.f32.mrb[46].mxu0 }
 0x151   :  { %v2417_v42 = vadd.f32 %v2416_v41, %v2415_v36  ;;  %v2418_v44 = vpop.f32.mrb[46].mxu1  ;;  %v2379_v45 = vpop.f32.mrb[47].mxu0 }
 0x152   :  { %v2419_v46 = vpop.f32.mrb[47].mxu1  ;;  %v1713_v47 = vadd.f32 %v2377_v24, %v1649_v50 }
 0x154   :  { %v3226_v22 = vadd.f32 %v2417_v42, %v1713_v47 }
 0x156   :  { %v2437_v48 = vpop.f32.mrb[48].mxu0 }
 0x157   :  { %v2477_v49 = vpop.f32.mrb[48].mxu1  ;;  %v2438_v51 = vpop.f32.mrb[49].mxu0 }
 0x158   :  { %v2439_v38 = vadd.f32 %v2438_v51, %v2437_v48  ;;  %v2478_v37 = vpop.f32.mrb[49].mxu1  ;;  %v2440_v53 = vpop.f32.mrb[50].mxu0 }
 0x159   :  { %v2479_v54 = vadd.f32 %v2478_v37, %v2477_v49  ;;  %v2480_v55 = vpop.f32.mrb[50].mxu1  ;;  %v2441_v56 = vpop.f32.mrb[51].mxu0 }
 0x15a   :  { %v1817_v40 = vadd.f32 %v2439_v38, %v1753_v0  ;;  %v2442_v57 = vadd.f32 %v2441_v56, %v2440_v53  ;;  %v2481_v59 = vpop.f32.mrb[51].mxu1 }
 0x15b   :  { %v2482_v60 = vadd.f32 %v2481_v59, %v2480_v55 }
 0x15c   :  { %v1881_v61 = vadd.f32 %v2479_v54, %v1817_v40  ;;  %v1820_v62 = vadd.f32 %v2442_v57, %v1756_v2 }
 0x15e   :  { %v1884_v63 = vadd.f32 %v2482_v60, %v1820_v62  ;;  %v2443_v1 = vpop.f32.mrb[52].mxu0  ;;  %v1910_v52 = vmax.f32 %v1881_v61, 0.0 }
 0x15f   :  { %v2483_v50 = vpop.f32.mrb[52].mxu1  ;;  %v2444_v4 = vpop.f32.mrb[53].mxu0 }
 0x160   :  { %v1911_v7 = vmax.f32 %v1884_v63, 0.0  ;;  %v2445_v9 = vadd.f32 %v2444_v4, %v2443_v1  ;;  %v2484_v58 = vpop.f32.mrb[53].mxu1  ;;  %v2446_v10 = vpop.f32.mrb[54].mxu0 }
 0x161   :  { %v2485_v11 = vadd.f32 %v2484_v58, %v2483_v50  ;;  %v2486_v12 = vpop.f32.mrb[54].mxu1  ;;  %v2447_v13 = vpop.f32.mrb[55].mxu0 }
 0x162   :  { %v2167_v14 = vpack.c.bf16 %v1911_v7, %v1910_v52  ;;  %v1825_v15 = vadd.f32 %v2445_v9, %v1761_v3  ;;  %v2448_v0 = vadd.f32 %v2447_v13, %v2446_v10  ;;  %v2487_v16 = vpop.f32.mrb[55].mxu1 }
 0x163   :  { %v2488_v17 = vadd.f32 %v2487_v16, %v2486_v12 }
 0x164   :  { %2168 = vst [vmem:[%s3247_s3] sm:$0xff] %v2167_v14   ;;  %v1889_v2 = vadd.f32 %v2485_v11, %v1825_v15  ;;  %v1828_v18 = vadd.f32 %v2448_v0, %v3220_v19 }
 0x166   :  { %v1892_v20 = vadd.f32 %v2488_v17, %v1828_v18  ;;  %v2449_v5 = vpop.f32.mrb[56].mxu0  ;;  %v1912_v8 = vmax.f32 %v1889_v2, 0.0 }
 0x167   :  { %v2489_v23 = vpop.f32.mrb[56].mxu1  ;;  %v2450_v25 = vpop.f32.mrb[57].mxu0 }
 0x168   :  { %v1913_v26 = vmax.f32 %v1892_v20, 0.0  ;;  %v2451_v27 = vadd.f32 %v2450_v25, %v2449_v5  ;;  %v2490_v28 = vpop.f32.mrb[57].mxu1  ;;  %v2452_v29 = vpop.f32.mrb[58].mxu0 }
 0x169   :  { %v2491_v3 = vadd.f32 %v2490_v28, %v2489_v23  ;;  %v2492_v30 = vpop.f32.mrb[58].mxu1  ;;  %v2453_v31 = vpop.f32.mrb[59].mxu0 }
 0x16a   :  { %v2172_v32 = vpack.c.bf16 %v1913_v26, %v1912_v8  ;;  %v1833_v33 = vadd.f32 %v2451_v27, %v3222_v6  ;;  %v2454_v34 = vadd.f32 %v2453_v31, %v2452_v29  ;;  %v2493_v21 = vpop.f32.mrb[59].mxu1 }
 0x16b   :  { %v2494_v36 = vadd.f32 %v2493_v21, %v2492_v30 }
 0x16c   :  { %2179 = vst [vmem:[%s3247_s3 + $0x8] sm:$0xff] %v2172_v32   ;;  %v1897_v19 = vadd.f32 %v2491_v3, %v1833_v33  ;;  %v1836_v39 = vadd.f32 %v2454_v34, %v3224_v35 }
 0x16e   :  { %v1900_v41 = vadd.f32 %v2494_v36, %v1836_v39  ;;  %v2455_v24 = vpop.f32.mrb[60].mxu0  ;;  %v1914_v44 = vmax.f32 %v1897_v19, 0.0 }
 0x16f   :  { %v2495_v42 = vpop.f32.mrb[60].mxu1  ;;  %v2456_v43 = vpop.f32.mrb[61].mxu0 }
 0x170   :  { %v1915_v45 = vmax.f32 %v1900_v41, 0.0  ;;  %v2457_v46 = vadd.f32 %v2456_v43, %v2455_v24  ;;  %v2496_v47 = vpop.f32.mrb[61].mxu1  ;;  %v2458_v48 = vpop.f32.mrb[62].mxu0 }
 0x171   :  { %v2497_v6 = vadd.f32 %v2496_v47, %v2495_v42  ;;  %v2498_v49 = vpop.f32.mrb[62].mxu1  ;;  %v2459_v51 = vpop.f32.mrb[63].mxu0 }
 0x172   :  { %v2177_v38 = vpack.c.bf16 %v1915_v45, %v1914_v44  ;;  %v1841_v37 = vadd.f32 %v2457_v46, %v3226_v22  ;;  %v2499_v53 = vpop.f32.mrb[63].mxu1 }
 0x174   :  { %2180 = vst [vmem:[%s3247_s3 + $0x10] sm:$0xff] %v2177_v38   ;;  %v1905_v35 = vadd.f32 %v2497_v6, %v1841_v37 }
 0x176   :  { %v1916_v54 = vmax.f32 %v1905_v35, 0.0 }
 0x178   :  { %v2163_v55 = vpack.c.bf16 %v1916_v54, %v1916_v54 }
 0x17a   :  { %1952 = vst [vmem:[%s3247_s3 + $0x18] sm:$0x1] %v2163_v55 }

// kernel: forward.6
= control target key start
LH: loop header
LB: loop body
LE: loop exit
PB: predicated region body
PF: predicated region fallthrough
CT: control target
= control target key end

     0   :  { %s1579_s1 = inlined_call_operand.vmem [shape: bf16[1152,128], index: 1, kind: input, shape index: {}]   ;;  %s1580_s0 = inlined_call_operand.vmem [shape: bf16[18,1152], index: 0, kind: input, shape index: {}]   ;;  %s1581_s2 = inlined_call_operand.vmem [shape: f32[1,128], index: 2, kind: input, shape index: {}]   ;;  %s1582_s3 = inlined_call_operand.vmem [shape: bf16[18,128], index: 3, kind: output, shape index: {}]  }
   0x1   :  { %v1198_v0 = vld [vmem:[%s1579_s1 + $0x40] sm:$0xff]   ;;  %v1202_v4 = vld [vmem:[%s1579_s1 + $0x48] sm:$0xff]   ;;  %v1206_v8 = vld [vmem:[%s1579_s1 + $0x50] sm:$0xff]  }
   0x2   :  { %v1199_v1 = vld [vmem:[%s1579_s1] sm:$0xff]   ;;  %1056 = vmatprep.subr.bf16.mxu0 %v1198_v0  ;;  %v1203_v5 = vld [vmem:[%s1579_s1 + $0x8] sm:$0xff]   ;;  %v1207_v9 = vld [vmem:[%s1579_s1 + $0x10] sm:$0xff]  }
   0x3   :  { %v1200_v2 = vld [vmem:[%s1579_s1 + $0xc0] sm:$0xff]   ;;  %1057 = vmatpush3.bf16.msra.mxu0 %v1199_v1  ;;  %v1204_v6 = vld [vmem:[%s1579_s1 + $0xc8] sm:$0xff]   ;;  %v1208_v10 = vld [vmem:[%s1579_s1 + $0xd0] sm:$0xff]  }
   0x4   :  { %v1201_v3 = vld [vmem:[%s1579_s1 + $0x80] sm:$0xff]   ;;  %1084 = vmatprep.subr.bf16.mxu1 %v1200_v2  ;;  %1058 = vmatprep.subr.bf16.mxu0 %v1202_v4  ;;  %v1205_v7 = vld [vmem:[%s1579_s1 + $0x88] sm:$0xff]   ;;  %v1209_v11 = vld [vmem:[%s1579_s1 + $0x90] sm:$0xff]  }
   0x5   :  { %1085 = vmatpush3.bf16.msra.mxu1 %v1201_v3  ;;  %v1210_v12 = vld [vmem:[%s1579_s1 + $0x58] sm:$0xff]   ;;  %v1214_v16 = vld [vmem:[%s1579_s1 + $0x60] sm:$0xff]   ;;  %v1218_v20 = vld [vmem:[%s1579_s1 + $0x68] sm:$0xff]  }
   0x6   :  { %1086 = vmatprep.subr.bf16.mxu1 %v1204_v6  ;;  %v1211_v13 = vld [vmem:[%s1579_s1 + $0x18] sm:$0xff]   ;;  %v1215_v17 = vld [vmem:[%s1579_s1 + $0x20] sm:$0xff]   ;;  %v1219_v21 = vld [vmem:[%s1579_s1 + $0x28] sm:$0xff]  }
   0x7   :  { %1059 = vmatpush3.bf16.msra.mxu0 %v1203_v5  ;;  %v1212_v14 = vld [vmem:[%s1579_s1 + $0xd8] sm:$0xff]   ;;  %v1216_v18 = vld [vmem:[%s1579_s1 + $0xe0] sm:$0xff]   ;;  %v1220_v22 = vld [vmem:[%s1579_s1 + $0xe8] sm:$0xff]  }
   0x8   :  { %1060 = vmatprep.subr.bf16.mxu0 %v1206_v8  ;;  %v1213_v15 = vld [vmem:[%s1579_s1 + $0x98] sm:$0xff]   ;;  %v1217_v19 = vld [vmem:[%s1579_s1 + $0xa0] sm:$0xff]   ;;  %v1221_v23 = vld [vmem:[%s1579_s1 + $0xa8] sm:$0xff]  }
   0x9   :  { %1087 = vmatpush3.bf16.msra.mxu1 %v1205_v7  ;;  %v1222_v24 = vld [vmem:[%s1579_s1 + $0x70] sm:$0xff]   ;;  %v1226_v28 = vld [vmem:[%s1579_s1 + $0x78] sm:$0xff]   ;;  %v1229_v31 = vld [vmem:[%s1580_s0] ss:$36 sps:$4 sm:$0xff]  }
   0xa   :  { %1088 = vmatprep.subr.bf16.mxu1 %v1208_v10  ;;  %v1223_v25 = vld [vmem:[%s1579_s1 + $0x30] sm:$0xff]   ;;  %v1227_v29 = vld [vmem:[%s1579_s1 + $0x38] sm:$0xff]   ;;  %v1231_v32 = vld [vmem:[%s1580_s0 + $0x4] ss:$36 sps:$4 sm:$0xff]  }
   0xb   :  { %1061 = vmatpush3.bf16.msra.mxu0 %v1207_v9  ;;  %v1224_v26 = vld [vmem:[%s1579_s1 + $0xf0] sm:$0xff]   ;;  %v1228_v30 = vld [vmem:[%s1579_s1 + $0xf8] sm:$0xff]   ;;  %723 = vmatprep.mubr.bf16.mxu0 %v1231_v32  ;;  %v1233_v34 = vld [vmem:[%s1579_s1 + $0x140] sm:$0xff]  }
   0xc   :  { %1062 = vmatprep.subr.bf16.mxu0 %v1210_v12  ;;  %v1225_v27 = vld [vmem:[%s1579_s1 + $0xb0] sm:$0xff]   ;;  %v1232_v33 = vld [vmem:[%s1579_s1 + $0xb8] sm:$0xff]   ;;  %v1234_v35 = vld [vmem:[%s1580_s0 + $0x8] ss:$36 sps:$4 sm:$0xff]  }
   0xd   :  { %1089 = vmatpush3.bf16.msra.mxu1 %v1209_v11  ;;  %v1236_v36 = vld [vmem:[%s1580_s0 + $0xc] ss:$36 sps:$4 sm:$0xff]   ;;  %v1237_v37 = vld [vmem:[%s1579_s1 + $0x100] sm:$0xff]   ;;  %v1248_v48 = vld [vmem:[%s1579_s1 + $0x158] sm:$0xff]  }
   0xe   :  { %1090 = vmatprep.subr.bf16.mxu1 %v1212_v14  ;;  %771 = vmatprep.mubr.bf16.mxu1 %v1236_v36  ;;  %v1238_v38 = vld [vmem:[%s1579_s1 + $0x1c0] sm:$0xff]   ;;  %v1240_v40 = vld [vmem:[%s1579_s1 + $0x148] sm:$0xff]   ;;  %v1244_v44 = vld [vmem:[%s1579_s1 + $0x150] sm:$0xff]  }
   0xf   :  { %1063 = vmatpush3.bf16.msra.mxu0 %v1211_v13  ;;  %v1239_v39 = vld [vmem:[%s1579_s1 + $0x180] sm:$0xff]   ;;  %v1241_v41 = vld [vmem:[%s1579_s1 + $0x108] sm:$0xff]   ;;  %v1245_v45 = vld [vmem:[%s1579_s1 + $0x110] sm:$0xff]  }
  0x10   :  { %1064 = vmatprep.subr.bf16.mxu0 %v1214_v16  ;;  %v1242_v42 = vld [vmem:[%s1579_s1 + $0x1c8] sm:$0xff]   ;;  %v1246_v46 = vld [vmem:[%s1579_s1 + $0x1d0] sm:$0xff]   ;;  %v1249_v49 = vld [vmem:[%s1579_s1 + $0x118] sm:$0xff]  }
  0x11   :  { %1091 = vmatpush3.bf16.msra.mxu1 %v1213_v15  ;;  %v1243_v43 = vld [vmem:[%s1579_s1 + $0x188] sm:$0xff]   ;;  %v1247_v47 = vld [vmem:[%s1579_s1 + $0x190] sm:$0xff]   ;;  %v1250_v50 = vld [vmem:[%s1579_s1 + $0x1d8] sm:$0xff]  }
  0x12   :  { %1092 = vmatprep.subr.bf16.mxu1 %v1216_v18  ;;  %v1251_v51 = vld [vmem:[%s1579_s1 + $0x198] sm:$0xff]   ;;  %v1252_v52 = vld [vmem:[%s1579_s1 + $0x160] sm:$0xff]   ;;  %v1256_v56 = vld [vmem:[%s1579_s1 + $0x168] sm:$0xff]  }
  0x13   :  { %1065 = vmatpush3.bf16.msra.mxu0 %v1215_v17  ;;  %v1253_v53 = vld [vmem:[%s1579_s1 + $0x120] sm:$0xff]   ;;  %v25_v57 = vld [vmem:[%s1580_s0 + $0x48] sm:$0x11]  ;;  %v1262_v63 = vld [vmem:[%s1579_s1 + $0x170] sm:$0xff]  }
  0x14   :  { %1066 = vmatprep.subr.bf16.mxu0 %v1218_v20  ;;  %v1254_v54 = vld [vmem:[%s1579_s1 + $0x1e0] sm:$0xff]   ;;  %v965_v58 = vcombine.high %v25_v57, %v25_v57  ;;  %v1258_v59 = vld [vmem:[%s1579_s1 + $0x128] sm:$0xff]   ;;  %v964_v60 = vcombine.low %v25_v57, %v25_v57  ;;  %v26_v0 = vld [vmem:[%s1580_s0 + $0x50] sm:$0x11] }
  0x15   :  { %1093 = vmatpush3.bf16.msra.mxu1 %v1217_v19  ;;  %v1255_v55 = vld [vmem:[%s1579_s1 + $0x1a0] sm:$0xff]   ;;  %v1260_v61 = vld [vmem:[%s1579_s1 + $0x1e8] sm:$0xff]   ;;  %v967_v1 = vcombine.high %v26_v0, %v26_v0  ;;  %v1264_v2 = vld [vmem:[%s1579_s1 + $0x130] sm:$0xff]   ;;  %v966_v3 = vcombine.low %v26_v0, %v26_v0 }
  0x16   :  { %1094 = vmatprep.subr.bf16.mxu1 %v1220_v22  ;;  %v1261_v62 = vld [vmem:[%s1579_s1 + $0x1a8] sm:$0xff]   ;;  %v1266_v4 = vld [vmem:[%s1579_s1 + $0x1f0] sm:$0xff]   ;;  %v1268_v6 = vld [vmem:[%s1579_s1 + $0x178] sm:$0xff]  }
  0x17   :  { %1067 = vmatpush3.bf16.msra.mxu0 %v1219_v21  ;;  %v1267_v5 = vld [vmem:[%s1579_s1 + $0x1b0] sm:$0xff]   ;;  %v1269_v7 = vld [vmem:[%s1579_s1 + $0x138] sm:$0xff]   ;;  %v1275_v12 = vld [vmem:[%s1579_s1 + $0x200] sm:$0xff]  }
  0x18   :  { %1068 = vmatprep.subr.bf16.mxu0 %v1222_v24  ;;  %v1270_v8 = vld [vmem:[%s1579_s1 + $0x1f8] sm:$0xff]   ;;  %v1271_v9 = vld [vmem:[%s1580_s0 + $0x10] ss:$36 sps:$4 sm:$0xff]   ;;  %v1279_v15 = vld [vmem:[%s1579_s1 + $0x208] sm:$0xff]  }
  0x19   :  { %1095 = vmatpush3.bf16.msra.mxu1 %v1221_v23  ;;  %v1273_v10 = vld [vmem:[%s1580_s0 + $0x14] ss:$36 sps:$4 sm:$0xff]   ;;  %v1278_v14 = vld [vmem:[%s1580_s0 + $0x1c] ss:$36 sps:$4 sm:$0xff]  }
  0x1a   :  { %1096 = vmatprep.subr.bf16.mxu1 %v1224_v26  ;;  %v1274_v11 = vld [vmem:[%s1579_s1 + $0x1b8] sm:$0xff]   ;;  %v1282_v18 = vld [vmem:[%s1579_s1 + $0x210] sm:$0xff]   ;;  %v28_v19 = vld [vmem:[%s1580_s0 + $0x60] sm:$0x11] }
  0x1b   :  { %1069 = vmatpush3.bf16.msra.mxu0 %v1223_v25  ;;  %v1276_v13 = vld [vmem:[%s1580_s0 + $0x18] ss:$36 sps:$4 sm:$0xff]   ;;  %v971_v21 = vcombine.high %v28_v19, %v28_v19  ;;  %v970_v22 = vcombine.low %v28_v19, %v28_v19  ;;  %v1290_v24 = vld [vmem:[%s1580_s0 + $0x20] ss:$36 sps:$4 sm:$0xff]   ;;  %v1287_v26 = vld [vmem:[%s1579_s1 + $0x228] sm:$0xff]  }
  0x1c   :  { %1070 = vmatprep.subr.bf16.mxu0 %v1226_v28  ;;  %v27_v16 = vld [vmem:[%s1580_s0 + $0x58] sm:$0x11]  ;;  %v1286_v25 = vld [vmem:[%s1579_s1 + $0x220] sm:$0xff]  }
  0x1d   :  { %1097 = vmatpush3.bf16.msra.mxu1 %v1225_v27  ;;  %v969_v17 = vcombine.high %v27_v16, %v27_v16  ;;  %v968_v20 = vcombine.low %v27_v16, %v27_v16  ;;  %v1285_v23 = vld [vmem:[%s1579_s1 + $0x218] sm:$0xff]   ;;  %v1288_v27 = vld [vmem:[%s1579_s1 + $0x230] sm:$0xff]  }
  0x1e   :  { %1098 = vmatprep.subr.bf16.mxu1 %v1228_v30  ;;  %v1289_v28 = vld [vmem:[%s1579_s1 + $0x238] sm:$0xff]  }
  0x1f   :  { %1071 = vmatpush3.bf16.msra.mxu0 %v1227_v29  ;;  %v1291_v29 = vld [vmem:[%s1580_s0 + $0x68] ss:$0 sps:$4 sm:$0x11]  }
  0x20   :  { %1112 = vmatprep.subr.bf16.mxu0 %v1233_v34 }
  0x21   :  { %1099 = vmatpush3.bf16.msra.mxu1 %v1232_v33 }
  0x22   :  { %724 = vmatmul.mubr.bf16.vlgmr.msra.gmra.mrb[0].mxu0 %v1229_v31  ;;  %1140 = vmatprep.subr.bf16.mxu1 %v1238_v38  ;;  %v954_v31 = vld [vmem:[%s1581_s2] ss:$0 sm:$0xff] }
  0x23   :  { %1113 = vmatpush3.bf16.msra.mxu0 %v1237_v37  ;;  %731 = vmatprep.mubr.bf16.mxu0 %v965_v58 }
  0x24   :  { %772 = vmatmul.mubr.bf16.vlgmr.msra.gmra.mrb[0].mxu1 %v1234_v35  ;;  %1114 = vmatprep.subr.bf16.mxu0 %v1240_v40 }
  0x25   :  { %1141 = vmatpush3.bf16.msra.mxu1 %v1239_v39  ;;  %779 = vmatprep.mubr.bf16.mxu1 %v967_v1 }
  0x26   :  { %1142 = vmatprep.subr.bf16.mxu1 %v1242_v42 }
  0x27   :  { %1115 = vmatpush3.bf16.msra.mxu0 %v1241_v41 }
  0x28   :  { %1116 = vmatprep.subr.bf16.mxu0 %v1244_v44 }
  0x29   :  { %1143 = vmatpush3.bf16.msra.mxu1 %v1243_v43 }
  0x2a   :  { %1144 = vmatprep.subr.bf16.mxu1 %v1246_v46  ;;  %732 = vmatmul.mubr.bf16.gmra.mrb[4].mxu0 %v964_v60 }
  0x2b   :  { %1117 = vmatpush3.bf16.msra.mxu0 %v1245_v45  ;;  %819 = vmatprep.mubr.bf16.mxu0 %v1273_v10 }
  0x2c   :  { %1118 = vmatprep.subr.bf16.mxu0 %v1248_v48  ;;  %780 = vmatmul.mubr.bf16.gmra.mrb[4].mxu1 %v966_v3 }
  0x2d   :  { %1145 = vmatpush3.bf16.msra.mxu1 %v1247_v47  ;;  %867 = vmatprep.mubr.bf16.mxu1 %v1278_v14 }
  0x2e   :  { %1146 = vmatprep.subr.bf16.mxu1 %v1250_v50 }
  0x2f   :  { %1119 = vmatpush3.bf16.msra.mxu0 %v1249_v49 }
  0x30   :  { %1120 = vmatprep.subr.bf16.mxu0 %v1252_v52 }
  0x31   :  { %1147 = vmatpush3.bf16.msra.mxu1 %v1251_v51 }
  0x32   :  { %1148 = vmatprep.subr.bf16.mxu1 %v1254_v54 }
  0x33   :  { %1121 = vmatpush3.bf16.msra.mxu0 %v1253_v53 }
  0x34   :  { %1122 = vmatprep.subr.bf16.mxu0 %v1256_v56 }
  0x35   :  { %1149 = vmatpush3.bf16.msra.mxu1 %v1255_v55 }
  0x36   :  { %1150 = vmatprep.subr.bf16.mxu1 %v1260_v61 }
  0x37   :  { %1123 = vmatpush3.bf16.msra.mxu0 %v1258_v59 }
  0x38   :  { %1124 = vmatprep.subr.bf16.mxu0 %v1262_v63 }
  0x39   :  { %1151 = vmatpush3.bf16.msra.mxu1 %v1261_v62 }
  0x3a   :  { %1152 = vmatprep.subr.bf16.mxu1 %v1266_v4 }
  0x3b   :  { %1125 = vmatpush3.bf16.msra.mxu0 %v1264_v2 }
  0x3c   :  { %1126 = vmatprep.subr.bf16.mxu0 %v1268_v6 }
  0x3d   :  { %1153 = vmatpush3.bf16.msra.mxu1 %v1267_v5 }
  0x3e   :  { %1154 = vmatprep.subr.bf16.mxu1 %v1270_v8 }
  0x3f   :  { %1127 = vmatpush3.bf16.msra.mxu0 %v1269_v7 }
  0x40   :  { %1178 = vmatprep.subr.bf16.mxu0 %v1275_v12 }
  0x41   :  { %1155 = vmatpush3.bf16.msra.mxu1 %v1274_v11 }
  0x42   :  { %820 = vmatmul.mubr.bf16.vlgmr.msra.gmra.mrb[8].mxu0 %v1271_v9 }
  0x43   :  { %1179 = vmatpush3.bf16.msra.mxu0 %v1275_v12  ;;  %827 = vmatprep.mubr.bf16.mxu0 %v969_v17 }
  0x44   :  { %868 = vmatmul.mubr.bf16.vlgmr.msra.gmra.mrb[8].mxu1 %v1276_v13  ;;  %1180 = vmatprep.subr.bf16.mxu0 %v1279_v15 }
  0x45   :  { %875 = vmatprep.mubr.bf16.mxu1 %v971_v21 }
  0x47   :  { %1181 = vmatpush3.bf16.msra.mxu0 %v1279_v15 }
  0x48   :  { %1182 = vmatprep.subr.bf16.mxu0 %v1282_v18 }
  0x4a   :  { %828 = vmatmul.mubr.bf16.gmra.mrb[12].mxu0 %v968_v20 }
  0x4b   :  { %1183 = vmatpush3.bf16.msra.mxu0 %v1282_v18  ;;  %1194 = vmatprep.mubr.bf16.mxu0 %v1290_v24 }
  0x4c   :  { %876 = vmatmul.mubr.bf16.gmra.mrb[12].mxu1 %v970_v22  ;;  %1184 = vmatprep.subr.bf16.mxu0 %v1285_v23 }
  0x4f   :  { %1185 = vmatpush3.bf16.msra.mxu0 %v1285_v23 }
  0x50   :  { %1186 = vmatprep.subr.bf16.mxu0 %v1286_v25 }
  0x53   :  { %1187 = vmatpush3.bf16.msra.mxu0 %v1286_v25 }
  0x54   :  { %1188 = vmatprep.subr.bf16.mxu0 %v1287_v26 }
  0x57   :  { %1189 = vmatpush3.bf16.msra.mxu0 %v1287_v26 }
  0x58   :  { %1190 = vmatprep.subr.bf16.mxu0 %v1288_v27 }
  0x5b   :  { %1191 = vmatpush3.bf16.msra.mxu0 %v1288_v27 }
  0x5c   :  { %1192 = vmatprep.subr.bf16.mxu0 %v1289_v28 }
  0x5f   :  { %1193 = vmatpush3.bf16.msra.mxu0 %v1289_v28 }
  0x62   :  { %1195 = vmatmul.mubr.bf16.vlgmr.msra.gmra.mrb[16].mxu0 %v1291_v29 }
  0xf5   :  { %v1072_v30 = vpop.f32.mrb[0].mxu0 }
  0xf6   :  { %v1073_v32 = vpop.f32.mrb[1].mxu0 }
  0xf7   :  { %v1074_v33 = vadd.f32 %v1073_v32, %v1072_v30  ;;  %v1075_v34 = vpop.f32.mrb[2].mxu0  ;;  %v1100_v35 = vpop.f32.mrb[0].mxu1 }
  0xf8   :  { %v1076_v36 = vpop.f32.mrb[3].mxu0  ;;  %v1101_v39 = vpop.f32.mrb[1].mxu1 }
  0xf9   :  { %v726_v37 = vadd.f32 %v1074_v33, %v954_v31  ;;  %v1077_v38 = vadd.f32 %v1076_v36, %v1075_v34  ;;  %v1102_v40 = vadd.f32 %v1101_v39, %v1100_v35  ;;  %v1103_v41 = vpop.f32.mrb[2].mxu1 }
  0xfa   :  { %v1104_v43 = vpop.f32.mrb[3].mxu1 }
  0xfb   :  { %v729_v42 = vadd.f32 %v1077_v38, %v954_v31  ;;  %v774_v44 = vadd.f32 %v1102_v40, %v726_v37  ;;  %v1105_v45 = vadd.f32 %v1104_v43, %v1103_v41 }
  0xfd   :  { %v777_v46 = vadd.f32 %v1105_v45, %v729_v42  ;;  %v1078_v47 = vpop.f32.mrb[4].mxu0 }
  0xfe   :  { %v1079_v48 = vpop.f32.mrb[5].mxu0 }
  0xff   :  { %v1080_v49 = vadd.f32 %v1079_v48, %v1078_v47  ;;  %v1081_v50 = vpop.f32.mrb[6].mxu0  ;;  %v1106_v53 = vpop.f32.mrb[4].mxu1 }
 0x100   :  { %v1082_v51 = vpop.f32.mrb[7].mxu0  ;;  %v1107_v54 = vpop.f32.mrb[5].mxu1 }
 0x101   :  { %v734_v52 = vadd.f32 %v1080_v49, %v954_v31  ;;  %v1108_v55 = vadd.f32 %v1107_v54, %v1106_v53  ;;  %v1109_v56 = vpop.f32.mrb[6].mxu1 }
 0x102   :  { %v1110_v57 = vpop.f32.mrb[7].mxu1 }
 0x103   :  { %v782_v58 = vadd.f32 %v1108_v55, %v734_v52 }
 0x115   :  { %v1128_v59 = vpop.f32.mrb[8].mxu0 }
 0x116   :  { %v1129_v60 = vpop.f32.mrb[9].mxu0 }
 0x117   :  { %v1130_v61 = vadd.f32 %v1129_v60, %v1128_v59  ;;  %v1131_v62 = vpop.f32.mrb[10].mxu0  ;;  %v1156_v63 = vpop.f32.mrb[8].mxu1 }
 0x118   :  { %v1132_v0 = vpop.f32.mrb[11].mxu0  ;;  %v1157_v3 = vpop.f32.mrb[9].mxu1 }
 0x119   :  { %v822_v1 = vadd.f32 %v1130_v61, %v774_v44  ;;  %v1133_v2 = vadd.f32 %v1132_v0, %v1131_v62  ;;  %v1158_v4 = vadd.f32 %v1157_v3, %v1156_v63  ;;  %v1159_v5 = vpop.f32.mrb[10].mxu1 }
 0x11a   :  { %v1160_v7 = vpop.f32.mrb[11].mxu1 }
 0x11b   :  { %v825_v6 = vadd.f32 %v1133_v2, %v777_v46  ;;  %v1161_v8 = vadd.f32 %v1160_v7, %v1159_v5  ;;  %v870_v9 = vadd.f32 %v1158_v4, %v822_v1 }
 0x11d   :  { %v1134_v10 = vpop.f32.mrb[12].mxu0  ;;  %v873_v12 = vadd.f32 %v1161_v8, %v825_v6 }
 0x11e   :  { %v1135_v11 = vpop.f32.mrb[13].mxu0 }
 0x11f   :  { %v1136_v13 = vadd.f32 %v1135_v11, %v1134_v10  ;;  %v1137_v14 = vpop.f32.mrb[14].mxu0  ;;  %v1162_v15 = vpop.f32.mrb[12].mxu1 }
 0x120   :  { %v1138_v16 = vpop.f32.mrb[15].mxu0  ;;  %v1163_v18 = vpop.f32.mrb[13].mxu1 }
 0x121   :  { %v830_v17 = vadd.f32 %v1136_v13, %v782_v58  ;;  %v1164_v19 = vadd.f32 %v1163_v18, %v1162_v15  ;;  %v1165_v20 = vpop.f32.mrb[14].mxu1 }
 0x122   :  { %v1166_v21 = vpop.f32.mrb[15].mxu1 }
 0x123   :  { %v878_v22 = vadd.f32 %v1164_v19, %v830_v17 }
 0x135   :  { %v1196_v23 = vpop.f32.mrb[16].mxu0 }
 0x136   :  { %v926_v24 = vadd.f32 %v1196_v23, %v878_v22  ;;  %v917_v25 = vpop.f32.mrb[17].mxu0 }
 0x137   :  { %v918_v26 = vadd.f32 %v917_v25, %v870_v9  ;;  %v1197_v27 = vpop.f32.mrb[18].mxu0 }
 0x138   :  { %v933_v28 = vmax.f32 %v926_v24, 0.0  ;;  %v920_v29 = vpop.f32.mrb[19].mxu0 }
 0x139   :  { %v921_v30 = vadd.f32 %v920_v29, %v873_v12  ;;  %v931_v32 = vmax.f32 %v918_v26, 0.0 }
 0x13a   :  { %v1050_v31 = vpack.c.bf16 %v933_v28, %v933_v28 }
 0x13b   :  { %v932_v33 = vmax.f32 %v921_v30, 0.0 }
 0x13c   :  { %949 = vst [vmem:[%s1582_s3 + $0x8] sm:$0x1] %v1050_v31 }
 0x13d   :  { %v1054_v34 = vpack.c.bf16 %v932_v33, %v931_v32 }
 0x13f   :  { %1055 = vst [vmem:[%s1582_s3] sm:$0xff] %v1054_v34  }

// kernel: forward.7
= control target key start
LH: loop header
LB: loop body
LE: loop exit
PB: predicated region body
PF: predicated region fallthrough
CT: control target
= control target key end

     0   :  { %s9292_s0 = inlined_call_operand.vmem [shape: bf16[2,1152], index: 0, kind: input, shape index: {}]   ;;  %s9293_s1 = inlined_call_operand.vmem [shape: bf16[1152,1024], index: 1, kind: input, shape index: {}]   ;;  %s9294_s2 = inlined_call_operand.vmem [shape: f32[1,1024], index: 2, kind: input, shape index: {}]   ;;  %s9295_s3 = inlined_call_operand.vmem [shape: bf16[1024,1], index: 3, kind: input, shape index: {}]   ;;  %s9296_s4 = inlined_call_operand.<no memory space> [shape: f32[1,1], index: 4, kind: input, shape index: {}]   ;;  %s9297_s5 = inlined_call_operand.vmem [shape: bf16[1024,6], index: 5, kind: input, shape index: {}]   ;;  %s9298_s6 = inlined_call_operand.vmem [shape: f32[1,6], index: 6, kind: input, shape index: {}]   ;;  %s9299_s7 = inlined_call_operand.hbm [shape: f32[2,6], index: 7, kind: output, shape index: {}]  }
   0x1   :  { %v12_v0 = vstv %s9296_s4 }
   0x2   :  { %13 = vst [vmem:[#allocation2] sm:$0x1] %v12_v0 }
   0x3   :  { %v32_v1 = vld [vmem:[%s9293_s1] sm:$0xff]  ;;  %v33_v3 = vld [vmem:[%s9293_s1 + $0x8] sm:$0xff]  ;;  %v610_v33 = vlaneseq  ;;  %v6949_v34 = vmov 1966171168  }
   0x4   :  { %v36_v2 = vld [vmem:[%s9293_s1 + $0x20] sm:$0xff]  ;;  %v37_v5 = vld [vmem:[%s9293_s1 + $0x28] sm:$0xff]  ;;  %v654_v35 = vunpack.c.l.s4 %v6949_v34 }
   0x5   :  { %v5837_v4 = vcombine.high %v32_v1, %v36_v2  ;;  %v5836_v6 = vcombine.low %v32_v1, %v36_v2  ;;  %v40_v7 = vld [vmem:[%s9293_s1 + $0x40] sm:$0xff]  ;;  %v5839_v9 = vcombine.high %v33_v3, %v37_v5  ;;  %v5838_v10 = vcombine.low %v33_v3, %v37_v5  ;;  %v41_v12 = vld [vmem:[%s9293_s1 + $0x48] sm:$0xff] }
   0x6   :  { %v44_v8 = vld [vmem:[%s9293_s1 + $0x60] sm:$0xff]  ;;  %v45_v13 = vld [vmem:[%s9293_s1 + $0x68] sm:$0xff]  ;;  %v7061_v44 = vshrl.u32 %v610_v33, 7  ;;  %v655_v45 = vunpack.c.0.s8 %v654_v35 }
   0x7   :  { %v5845_v11 = vcombine.high %v40_v7, %v44_v8  ;;  %v48_v14 = vld [vmem:[%s9293_s1 + $0x80] sm:$0xff]  ;;  %3604 = vmatprep.subr.bf16.mxu0 %v5837_v4  ;;  %v5847_v15 = vcombine.high %v41_v12, %v45_v13  ;;  %v49_v17 = vld [vmem:[%s9293_s1 + $0x88] sm:$0xff]  ;;  %3809 = vmatprep.subr.bf16.mxu1 %v5839_v9  ;;  %v5844_v19 = vcombine.low %v40_v7, %v44_v8 }
   0x8   :  { %v52_v16 = vld [vmem:[%s9293_s1 + $0xa0] sm:$0xff]  ;;  %v53_v18 = vld [vmem:[%s9293_s1 + $0xa8] sm:$0xff]  ;;  %3605 = vmatpush1.bf16.msra.mxu0 %v5836_v6  ;;  %3810 = vmatpush1.bf16.msra.mxu1 %v5838_v10  ;;  %v5846_v20 = vcombine.low %v41_v12, %v45_v13  ;;  %v7076_v54 = vsub.s32 %v655_v45, %v7061_v44 }
   0x9   :  { %3606 = vmatprep.subr.bf16.mxu0 %v5845_v11  ;;  %v5853_v21 = vcombine.high %v48_v14, %v52_v16  ;;  %3811 = vmatprep.subr.bf16.mxu1 %v5847_v15  ;;  %v5855_v22 = vcombine.high %v49_v17, %v53_v18  ;;  %v56_v23 = vld [vmem:[%s9293_s1 + $0xc0] sm:$0xff]  ;;  %v57_v25 = vld [vmem:[%s9293_s1 + $0xc8] sm:$0xff]  ;;  %v5852_v27 = vcombine.low %v48_v14, %v52_v16 }
   0xa   :  { %v60_v24 = vld [vmem:[%s9293_s1 + $0xe0] sm:$0xff]  ;;  %v61_v26 = vld [vmem:[%s9293_s1 + $0xe8] sm:$0xff]  ;;  %v5854_v28 = vcombine.low %v49_v17, %v53_v18 }
   0xb   :  { %v5861_v29 = vcombine.high %v56_v23, %v60_v24  ;;  %v5863_v30 = vcombine.high %v57_v25, %v61_v26  ;;  %v64_v31 = vld [vmem:[%s9293_s1 + $0x100] sm:$0xff]  ;;  %v65_v36 = vld [vmem:[%s9293_s1 + $0x108] sm:$0xff]  ;;  %v5860_v38 = vcombine.low %v56_v23, %v60_v24  ;;  %v5862_v39 = vcombine.low %v57_v25, %v61_v26 }
   0xc   :  { %3607 = vmatpush1.bf16.msra.mxu0 %v5844_v19  ;;  %3812 = vmatpush1.bf16.msra.mxu1 %v5846_v20  ;;  %v68_v32 = vld [vmem:[%s9293_s1 + $0x120] sm:$0xff]  ;;  %v69_v37 = vld [vmem:[%s9293_s1 + $0x128] sm:$0xff] }
   0xd   :  { %3608 = vmatprep.subr.bf16.mxu0 %v5853_v21  ;;  %3813 = vmatprep.subr.bf16.mxu1 %v5855_v22  ;;  %v5869_v40 = vcombine.high %v64_v31, %v68_v32  ;;  %v5871_v41 = vcombine.high %v65_v36, %v69_v37  ;;  %v72_v42 = vld [vmem:[%s9293_s1 + $0x140] sm:$0xff]  ;;  %v73_v46 = vld [vmem:[%s9293_s1 + $0x148] sm:$0xff]  ;;  %v5868_v48 = vcombine.low %v64_v31, %v68_v32 }
   0xe   :  { %v76_v43 = vld [vmem:[%s9293_s1 + $0x160] sm:$0xff]  ;;  %v77_v47 = vld [vmem:[%s9293_s1 + $0x168] sm:$0xff]  ;;  %v5870_v49 = vcombine.low %v65_v36, %v69_v37 }
   0xf   :  { %v5877_v50 = vcombine.high %v72_v42, %v76_v43  ;;  %v5879_v51 = vcombine.high %v73_v46, %v77_v47  ;;  %v80_v52 = vld [vmem:[%s9293_s1 + $0x180] sm:$0xff]  ;;  %v81_v55 = vld [vmem:[%s9293_s1 + $0x188] sm:$0xff]  ;;  %v5876_v57 = vcombine.low %v72_v42, %v76_v43  ;;  %v5878_v58 = vcombine.low %v73_v46, %v77_v47 }
  0x10   :  { %3609 = vmatpush1.bf16.msra.mxu0 %v5852_v27  ;;  %3814 = vmatpush1.bf16.msra.mxu1 %v5854_v28  ;;  %v84_v53 = vld [vmem:[%s9293_s1 + $0x1a0] sm:$0xff]  ;;  %v85_v56 = vld [vmem:[%s9293_s1 + $0x1a8] sm:$0xff] }
  0x11   :  { %3610 = vmatprep.subr.bf16.mxu0 %v5861_v29  ;;  %3815 = vmatprep.subr.bf16.mxu1 %v5863_v30  ;;  %v5885_v59 = vcombine.high %v80_v52, %v84_v53  ;;  %v7087_v60 = vld [vmem:[%s9292_s0] sm:$0xff]  ;;  %v5887_v61 = vcombine.high %v81_v55, %v85_v56  ;;  %v89_v1 = vld [vmem:[%s9293_s1 + $0x1c8] sm:$0xff]  ;;  %v5884_v3 = vcombine.low %v80_v52, %v84_v53 }
  0x12   :  { %v88_v62 = vld [vmem:[%s9293_s1 + $0x1c0] sm:$0xff]  ;;  %v7097_v0 = vrot.slane %v7087_v60, %v7076_v54  ;;  %v93_v2 = vld [vmem:[%s9293_s1 + $0x1e8] sm:$0xff]  ;;  %v5886_v5 = vcombine.low %v81_v55, %v85_v56 }
  0x13   :  { %v92_v63 = vld [vmem:[%s9293_s1 + $0x1e0] sm:$0xff]  ;;  %v5895_v7 = vcombine.high %v89_v1, %v93_v2  ;;  %v97_v11 = vld [vmem:[%s9293_s1 + $0x208] sm:$0xff]  ;;  %v5894_v14 = vcombine.low %v89_v1, %v93_v2 }
  0x14   :  { %3611 = vmatpush1.bf16.msra.mxu0 %v5860_v38  ;;  %3816 = vmatpush1.bf16.msra.mxu1 %v5862_v39  ;;  %v667_v4 = vcombine.high %v7097_v0, %v7097_v0  ;;  %v5893_v6 = vcombine.high %v88_v62, %v92_v63  ;;  %v96_v8 = vld [vmem:[%s9293_s1 + $0x200] sm:$0xff]  ;;  %v101_v12 = vld [vmem:[%s9293_s1 + $0x228] sm:$0xff]  ;;  %v5892_v13 = vcombine.low %v88_v62, %v92_v63 }
  0x15   :  { %3612 = vmatprep.subr.bf16.mxu0 %v5869_v40  ;;  %3817 = vmatprep.subr.bf16.mxu1 %v5871_v41  ;;  %v100_v9 = vld [vmem:[%s9293_s1 + $0x220] sm:$0xff]  ;;  %v5903_v16 = vcombine.high %v97_v11, %v101_v12  ;;  %v105_v19 = vld [vmem:[%s9293_s1 + $0x248] sm:$0xff]  ;;  %v5902_v22 = vcombine.low %v97_v11, %v101_v12 }
  0x16   :  { %v7114_v10 = vrot.slane %v667_v4, %v7076_v54  ;;  %v5901_v15 = vcombine.high %v96_v8, %v100_v9  ;;  %v104_v17 = vld [vmem:[%s9293_s1 + $0x240] sm:$0xff]  ;;  %v109_v20 = vld [vmem:[%s9293_s1 + $0x268] sm:$0xff]  ;;  %v5900_v21 = vcombine.low %v96_v8, %v100_v9 }
  0x17   :  { %v108_v18 = vld [vmem:[%s9293_s1 + $0x260] sm:$0xff]  ;;  %v5911_v24 = vcombine.high %v105_v19, %v109_v20  ;;  %v113_v27 = vld [vmem:[%s9293_s1 + $0x288] sm:$0xff]  ;;  %v5910_v30 = vcombine.low %v105_v19, %v109_v20 }
  0x18   :  { %3613 = vmatpush1.bf16.msra.mxu0 %v5868_v48  ;;  %3818 = vmatpush1.bf16.msra.mxu1 %v5870_v49  ;;  %v5909_v23 = vcombine.high %v104_v17, %v108_v18  ;;  %v112_v25 = vld [vmem:[%s9293_s1 + $0x280] sm:$0xff]  ;;  %v117_v28 = vld [vmem:[%s9293_s1 + $0x2a8] sm:$0xff]  ;;  %v5908_v29 = vcombine.low %v104_v17, %v108_v18 }
  0x19   :  { %3614 = vmatprep.subr.bf16.mxu0 %v5877_v50  ;;  %3819 = vmatprep.subr.bf16.mxu1 %v5879_v51  ;;  %v116_v26 = vld [vmem:[%s9293_s1 + $0x2a0] sm:$0xff]  ;;  %v5919_v32 = vcombine.high %v113_v27, %v117_v28  ;;  %v121_v35 = vld [vmem:[%s9293_s1 + $0x2c8] sm:$0xff]  ;;  %v5918_v38 = vcombine.low %v113_v27, %v117_v28 }
  0x1a   :  { %3636 = vmatprep.mubr.bf16.mxu0 %v7114_v10  ;;  %3841 = vmatprep.mubr.bf16.mxu1 %v7114_v10  ;;  %v5917_v31 = vcombine.high %v112_v25, %v116_v26  ;;  %v120_v33 = vld [vmem:[%s9293_s1 + $0x2c0] sm:$0xff]  ;;  %v125_v36 = vld [vmem:[%s9293_s1 + $0x2e8] sm:$0xff]  ;;  %v5916_v37 = vcombine.low %v112_v25, %v116_v26 }
  0x1b   :  { %v124_v34 = vld [vmem:[%s9293_s1 + $0x2e0] sm:$0xff]  ;;  %v5927_v40 = vcombine.high %v121_v35, %v125_v36  ;;  %v129_v43 = vld [vmem:[%s9293_s1 + $0x308] sm:$0xff]  ;;  %v5926_v47 = vcombine.low %v121_v35, %v125_v36 }
  0x1c   :  { %3615 = vmatpush1.bf16.msra.mxu0 %v5876_v57  ;;  %3820 = vmatpush1.bf16.msra.mxu1 %v5878_v58  ;;  %v5925_v39 = vcombine.high %v120_v33, %v124_v34  ;;  %v128_v41 = vld [vmem:[%s9293_s1 + $0x300] sm:$0xff]  ;;  %v133_v45 = vld [vmem:[%s9293_s1 + $0x328] sm:$0xff]  ;;  %v5924_v46 = vcombine.low %v120_v33, %v124_v34  ;;  %v7250_v34 = vcombine.high %v7114_v10, %v7114_v10 }
  0x1d   :  { %3616 = vmatprep.subr.bf16.mxu0 %v5885_v59  ;;  %3821 = vmatprep.subr.bf16.mxu1 %v5887_v61  ;;  %v132_v42 = vld [vmem:[%s9293_s1 + $0x320] sm:$0xff]  ;;  %v5935_v49 = vcombine.high %v129_v43, %v133_v45  ;;  %v137_v52 = vld [vmem:[%s9293_s1 + $0x348] sm:$0xff]  ;;  %v5934_v56 = vcombine.low %v129_v43, %v133_v45 }
  0x1e   :  { %v5933_v48 = vcombine.high %v128_v41, %v132_v42  ;;  %v136_v50 = vld [vmem:[%s9293_s1 + $0x340] sm:$0xff]  ;;  %v141_v53 = vld [vmem:[%s9293_s1 + $0x368] sm:$0xff]  ;;  %v5932_v55 = vcombine.low %v128_v41, %v132_v42 }
  0x1f   :  { %v140_v51 = vld [vmem:[%s9293_s1 + $0x360] sm:$0xff]  ;;  %v5943_v58 = vcombine.high %v137_v52, %v141_v53  ;;  %v145_v62 = vld [vmem:[%s9293_s1 + $0x388] sm:$0xff]  ;;  %v5942_v2 = vcombine.low %v137_v52, %v141_v53 }
  0x20   :  { %3617 = vmatpush1.bf16.msra.mxu0 %v5884_v3  ;;  %3822 = vmatpush1.bf16.msra.mxu1 %v5886_v5  ;;  %v5941_v57 = vcombine.high %v136_v50, %v140_v51  ;;  %v144_v59 = vld [vmem:[%s9293_s1 + $0x380] sm:$0xff]  ;;  %v149_v63 = vld [vmem:[%s9293_s1 + $0x3a8] sm:$0xff]  ;;  %v5940_v1 = vcombine.low %v136_v50, %v140_v51 }
  0x21   :  { %3618 = vmatprep.subr.bf16.mxu0 %v5893_v6  ;;  %3823 = vmatprep.subr.bf16.mxu1 %v5895_v7  ;;  %v148_v61 = vld [vmem:[%s9293_s1 + $0x3a0] sm:$0xff]  ;;  %v5951_v4 = vcombine.high %v145_v62, %v149_v63  ;;  %v153_v7 = vld [vmem:[%s9293_s1 + $0x3c8] sm:$0xff]  ;;  %v5950_v11 = vcombine.low %v145_v62, %v149_v63 }
  0x22   :  { %v5949_v3 = vcombine.high %v144_v59, %v148_v61  ;;  %v152_v5 = vld [vmem:[%s9293_s1 + $0x3c0] sm:$0xff]  ;;  %v157_v8 = vld [vmem:[%s9293_s1 + $0x3e8] sm:$0xff]  ;;  %v5948_v9 = vcombine.low %v144_v59, %v148_v61 }
  0x23   :  { %v156_v6 = vld [vmem:[%s9293_s1 + $0x3e0] sm:$0xff]  ;;  %v165_v17 = vld [vmem:[%s9293_s1 + $0x428] sm:$0xff]  ;;  %v5958_v19 = vcombine.low %v153_v7, %v157_v8 }
  0x24   :  { %3619 = vmatpush1.bf16.msra.mxu0 %v5892_v13  ;;  %3824 = vmatpush1.bf16.msra.mxu1 %v5894_v14  ;;  %v5957_v12 = vcombine.high %v152_v5, %v156_v6  ;;  %v5959_v13 = vcombine.high %v153_v7, %v157_v8  ;;  %v160_v14 = vld [vmem:[%s9293_s1 + $0x400] sm:$0xff]  ;;  %v5956_v18 = vcombine.low %v152_v5, %v156_v6  ;;  %v169_v25 = vld [vmem:[%s9293_s1 + $0x448] sm:$0xff] }
  0x25   :  { %3620 = vmatprep.subr.bf16.mxu0 %v5901_v15  ;;  %3825 = vmatprep.subr.bf16.mxu1 %v5903_v16  ;;  %v164_v15 = vld [vmem:[%s9293_s1 + $0x420] sm:$0xff]  ;;  %v161_v16 = vld [vmem:[%s9293_s1 + $0x408] sm:$0xff] }
  0x26   :  { %v5965_v20 = vcombine.high %v160_v14, %v164_v15  ;;  %v173_v26 = vld [vmem:[%s9293_s1 + $0x468] sm:$0xff]  ;;  %v5964_v27 = vcombine.low %v160_v14, %v164_v15  ;;  %v5966_v28 = vcombine.low %v161_v16, %v165_v17 }
  0x27   :  { %v181_v33 = vld [vmem:[%s9293_s1 + $0x4a8] sm:$0xff]  ;;  %v5974_v36 = vcombine.low %v169_v25, %v173_v26 }
  0x28   :  { %3621 = vmatpush1.bf16.msra.mxu0 %v5900_v21  ;;  %3826 = vmatpush1.bf16.msra.mxu1 %v5902_v22  ;;  %v5967_v21 = vcombine.high %v161_v16, %v165_v17  ;;  %v168_v22 = vld [vmem:[%s9293_s1 + $0x440] sm:$0xff]  ;;  %v189_v42 = vld [vmem:[%s9293_s1 + $0x4e8] sm:$0xff] }
  0x29   :  { %3622 = vmatprep.subr.bf16.mxu0 %v5909_v23  ;;  %3827 = vmatprep.subr.bf16.mxu1 %v5911_v24  ;;  %v172_v23 = vld [vmem:[%s9293_s1 + $0x460] sm:$0xff]  ;;  %v7228_v24 = vrot.slane %v7097_v0, %v7076_v54  ;;  %v197_v51 = vld [vmem:[%s9293_s1 + $0x528] sm:$0xff] }
  0x2a   :  { %v180_v0 = vld [vmem:[%s9293_s1 + $0x4a0] sm:$0xff]  ;;  %v5972_v35 = vcombine.low %v168_v22, %v172_v23  ;;  %v205_v61 = vld [vmem:[%s9293_s1 + $0x568] sm:$0xff] }
  0x2b   :  { %v213_v6 = vld [vmem:[%s9293_s1 + $0x5a8] sm:$0xff] }
  0x2c   :  { %3623 = vmatpush1.bf16.msra.mxu0 %v5908_v29  ;;  %3828 = vmatpush1.bf16.msra.mxu1 %v5910_v30  ;;  %v5973_v29 = vcombine.high %v168_v22, %v172_v23  ;;  %v176_v30 = vld [vmem:[%s9293_s1 + $0x480] sm:$0xff]  ;;  %v221_v15 = vld [vmem:[%s9293_s1 + $0x5e8] sm:$0xff] }
  0x2d   :  { %3624 = vmatprep.subr.bf16.mxu0 %v5917_v31  ;;  %3829 = vmatprep.subr.bf16.mxu1 %v5919_v32  ;;  %v177_v31 = vld [vmem:[%s9293_s1 + $0x488] sm:$0xff]  ;;  %v5975_v32 = vcombine.high %v169_v25, %v173_v26  ;;  %v5980_v43 = vcombine.low %v176_v30, %v180_v0 }
  0x2e   :  { %v5983_v41 = vcombine.high %v177_v31, %v181_v33  ;;  %v5982_v45 = vcombine.low %v177_v31, %v181_v33  ;;  %v229_v23 = vld [vmem:[%s9293_s1 + $0x628] sm:$0xff] }
  0x2f   :  { %v237_v31 = vld [vmem:[%s9293_s1 + $0x668] sm:$0xff] }
  0x30   :  { %3625 = vmatpush1.bf16.msra.mxu0 %v5916_v37  ;;  %3830 = vmatpush1.bf16.msra.mxu1 %v5918_v38  ;;  %v5981_v37 = vcombine.high %v176_v30, %v180_v0  ;;  %v184_v38 = vld [vmem:[%s9293_s1 + $0x4c0] sm:$0xff]  ;;  %v233_v30 = vld [vmem:[%s9293_s1 + $0x648] sm:$0xff] }
  0x31   :  { %3626 = vmatprep.subr.bf16.mxu0 %v5925_v39  ;;  %3831 = vmatprep.subr.bf16.mxu1 %v5927_v40  ;;  %v188_v39 = vld [vmem:[%s9293_s1 + $0x4e0] sm:$0xff]  ;;  %v185_v40 = vld [vmem:[%s9293_s1 + $0x4c8] sm:$0xff] }
  0x32   :  { %v5991_v50 = vcombine.high %v185_v40, %v189_v42  ;;  %v5988_v52 = vcombine.low %v184_v38, %v188_v39  ;;  %v5990_v53 = vcombine.low %v185_v40, %v189_v42  ;;  %v245_v40 = vld [vmem:[%s9293_s1 + $0x6a8] sm:$0xff]  ;;  %v6038_v42 = vcombine.low %v233_v30, %v237_v31 }
  0x34   :  { %3627 = vmatpush1.bf16.msra.mxu0 %v5924_v46  ;;  %3832 = vmatpush1.bf16.msra.mxu1 %v5926_v47  ;;  %v5989_v46 = vcombine.high %v184_v38, %v188_v39  ;;  %v192_v47 = vld [vmem:[%s9293_s1 + $0x500] sm:$0xff]  ;;  %v241_v38 = vld [vmem:[%s9293_s1 + $0x688] sm:$0xff]  ;;  %v6039_v39 = vcombine.high %v233_v30, %v237_v31 }
  0x35   :  { %3628 = vmatprep.subr.bf16.mxu0 %v5933_v48  ;;  %3833 = vmatprep.subr.bf16.mxu1 %v5935_v49  ;;  %v196_v48 = vld [vmem:[%s9293_s1 + $0x520] sm:$0xff]  ;;  %v193_v49 = vld [vmem:[%s9293_s1 + $0x508] sm:$0xff] }
  0x36   :  { %v5999_v59 = vcombine.high %v193_v49, %v197_v51  ;;  %v5996_v62 = vcombine.low %v192_v47, %v196_v48  ;;  %v5998_v63 = vcombine.low %v193_v49, %v197_v51  ;;  %v253_v49 = vld [vmem:[%s9293_s1 + $0x6e8] sm:$0xff]  ;;  %v6046_v51 = vcombine.low %v241_v38, %v245_v40 }
  0x37   :  { %v293_v30 = vld [vmem:[%s9293_s1 + $0x828] sm:$0xff] }
  0x38   :  { %3629 = vmatpush1.bf16.msra.mxu0 %v5932_v55  ;;  %3834 = vmatpush1.bf16.msra.mxu1 %v5934_v56  ;;  %v5997_v55 = vcombine.high %v192_v47, %v196_v48  ;;  %v200_v56 = vld [vmem:[%s9293_s1 + $0x540] sm:$0xff]  ;;  %v249_v47 = vld [vmem:[%s9293_s1 + $0x6c8] sm:$0xff]  ;;  %v6047_v48 = vcombine.high %v241_v38, %v245_v40 }
  0x39   :  { %3630 = vmatprep.subr.bf16.mxu0 %v5941_v57  ;;  %3835 = vmatprep.subr.bf16.mxu1 %v5943_v58  ;;  %v204_v57 = vld [vmem:[%s9293_s1 + $0x560] sm:$0xff]  ;;  %v201_v58 = vld [vmem:[%s9293_s1 + $0x548] sm:$0xff] }
  0x3a   :  { %v6007_v5 = vcombine.high %v201_v58, %v205_v61  ;;  %v6004_v7 = vcombine.low %v200_v56, %v204_v57  ;;  %v6006_v8 = vcombine.low %v201_v58, %v205_v61  ;;  %v261_v58 = vld [vmem:[%s9293_s1 + $0x728] sm:$0xff]  ;;  %v6054_v61 = vcombine.low %v249_v47, %v253_v49 }
  0x3c   :  { %3631 = vmatpush1.bf16.msra.mxu0 %v5940_v1  ;;  %3836 = vmatpush1.bf16.msra.mxu1 %v5942_v2  ;;  %v6005_v1 = vcombine.high %v200_v56, %v204_v57  ;;  %v208_v2 = vld [vmem:[%s9293_s1 + $0x580] sm:$0xff]  ;;  %v257_v56 = vld [vmem:[%s9293_s1 + $0x708] sm:$0xff]  ;;  %v6055_v57 = vcombine.high %v249_v47, %v253_v49 }
  0x3d   :  { %3632 = vmatprep.subr.bf16.mxu0 %v5949_v3  ;;  %3837 = vmatprep.subr.bf16.mxu1 %v5951_v4  ;;  %v212_v3 = vld [vmem:[%s9293_s1 + $0x5a0] sm:$0xff]  ;;  %v209_v4 = vld [vmem:[%s9293_s1 + $0x588] sm:$0xff] }
  0x3e   :  { %v6015_v14 = vcombine.high %v209_v4, %v213_v6  ;;  %v6012_v16 = vcombine.low %v208_v2, %v212_v3  ;;  %v6014_v17 = vcombine.low %v209_v4, %v213_v6  ;;  %v269_v4 = vld [vmem:[%s9293_s1 + $0x768] sm:$0xff]  ;;  %v6062_v6 = vcombine.low %v257_v56, %v261_v58  ;;  %v308_v47 = vld [vmem:[%s9293_s1 + $0x8a0] sm:$0xff] }
  0x40   :  { %3633 = vmatpush1.bf16.msra.mxu0 %v5948_v9  ;;  %3838 = vmatpush1.bf16.msra.mxu1 %v5950_v11  ;;  %v6013_v9 = vcombine.high %v208_v2, %v212_v3  ;;  %v216_v11 = vld [vmem:[%s9293_s1 + $0x5c0] sm:$0xff]  ;;  %v265_v2 = vld [vmem:[%s9293_s1 + $0x748] sm:$0xff]  ;;  %v6063_v3 = vcombine.high %v257_v56, %v261_v58 }
  0x41   :  { %3634 = vmatprep.subr.bf16.mxu0 %v5957_v12  ;;  %3839 = vmatprep.subr.bf16.mxu1 %v5959_v13  ;;  %v220_v12 = vld [vmem:[%s9293_s1 + $0x5e0] sm:$0xff]  ;;  %v217_v13 = vld [vmem:[%s9293_s1 + $0x5c8] sm:$0xff] }
  0x42   :  { %v6023_v22 = vcombine.high %v217_v13, %v221_v15  ;;  %v6020_v25 = vcombine.low %v216_v11, %v220_v12  ;;  %v6022_v26 = vcombine.low %v217_v13, %v221_v15  ;;  %v277_v13 = vld [vmem:[%s9293_s1 + $0x7a8] sm:$0xff]  ;;  %v6070_v15 = vcombine.low %v265_v2, %v269_v4  ;;  %v312_v56 = vld [vmem:[%s9293_s1 + $0x8c0] sm:$0xff] }
  0x43   :  { %v313_v58 = vld [vmem:[%s9293_s1 + $0x8c8] sm:$0xff] }
  0x44   :  { %3635 = vmatpush1.bf16.msra.mxu0 %v5956_v18  ;;  %3840 = vmatpush1.bf16.msra.mxu1 %v5958_v19  ;;  %v6021_v18 = vcombine.high %v216_v11, %v220_v12  ;;  %v224_v19 = vld [vmem:[%s9293_s1 + $0x600] sm:$0xff]  ;;  %v273_v11 = vld [vmem:[%s9293_s1 + $0x788] sm:$0xff]  ;;  %v6071_v12 = vcombine.high %v265_v2, %v269_v4 }
  0x45   :  { %3645 = vmatprep.subr.bf16.mxu0 %v5965_v20  ;;  %3850 = vmatprep.subr.bf16.mxu1 %v5967_v21  ;;  %v228_v20 = vld [vmem:[%s9293_s1 + $0x620] sm:$0xff]  ;;  %v225_v21 = vld [vmem:[%s9293_s1 + $0x608] sm:$0xff] }
  0x46   :  { %v6031_v0 = vcombine.high %v225_v21, %v229_v23  ;;  %v6030_v33 = vcombine.low %v225_v21, %v229_v23  ;;  %v285_v21 = vld [vmem:[%s9293_s1 + $0x7e8] sm:$0xff]  ;;  %v320_v2 = vld [vmem:[%s9293_s1 + $0x900] sm:$0xff] }
  0x47   :  { %3637 = vmatmul.mubr.bf16.vlgmr.msra.gmra.mrb[0].mxu0 %v7228_v24  ;;  %3842 = vmatmul.mubr.bf16.vlgmr.msra.gmra.mrb[0].mxu1 %v7228_v24  ;;  %v321_v4 = vld [vmem:[%s9293_s1 + $0x908] sm:$0xff] }
  0x48   :  { %3646 = vmatpush1.bf16.msra.mxu0 %v5964_v27  ;;  %3851 = vmatpush1.bf16.msra.mxu1 %v5966_v28  ;;  %v6029_v27 = vcombine.high %v224_v19, %v228_v20  ;;  %v232_v28 = vld [vmem:[%s9293_s1 + $0x640] sm:$0xff] }
  0x49   :  { %3647 = vmatprep.subr.bf16.mxu0 %v5973_v29  ;;  %3852 = vmatprep.subr.bf16.mxu1 %v5975_v32  ;;  %v236_v29 = vld [vmem:[%s9293_s1 + $0x660] sm:$0xff]  ;;  %v6028_v32 = vcombine.low %v224_v19, %v228_v20  ;;  %v281_v19 = vld [vmem:[%s9293_s1 + $0x7c8] sm:$0xff]  ;;  %v6079_v20 = vcombine.high %v273_v11, %v277_v13 }
  0x4a   :  { %3677 = vmatprep.mubr.bf16.mxu0 %v7250_v34  ;;  %3882 = vmatprep.mubr.bf16.mxu1 %v7250_v34 }
  0x4c   :  { %3648 = vmatpush1.bf16.msra.mxu0 %v5972_v35  ;;  %3853 = vmatpush1.bf16.msra.mxu1 %v5974_v36  ;;  %v6037_v35 = vcombine.high %v232_v28, %v236_v29  ;;  %v240_v36 = vld [vmem:[%s9293_s1 + $0x680] sm:$0xff] }
  0x4d   :  { %3649 = vmatprep.subr.bf16.mxu0 %v5981_v37  ;;  %3854 = vmatprep.subr.bf16.mxu1 %v5983_v41  ;;  %v244_v37 = vld [vmem:[%s9293_s1 + $0x6a0] sm:$0xff]  ;;  %v6036_v41 = vcombine.low %v232_v28, %v236_v29  ;;  %v289_v29 = vld [vmem:[%s9293_s1 + $0x808] sm:$0xff] }
  0x4e   :  { %v292_v28 = vld [vmem:[%s9293_s1 + $0x820] sm:$0xff]  ;;  %v6095_v38 = vcombine.high %v289_v29, %v293_v30 }
  0x50   :  { %3650 = vmatpush1.bf16.msra.mxu0 %v5980_v43  ;;  %3855 = vmatpush1.bf16.msra.mxu1 %v5982_v45  ;;  %v6045_v43 = vcombine.high %v240_v36, %v244_v37  ;;  %v248_v45 = vld [vmem:[%s9293_s1 + $0x6c0] sm:$0xff] }
  0x51   :  { %3651 = vmatprep.subr.bf16.mxu0 %v5989_v46  ;;  %3856 = vmatprep.subr.bf16.mxu1 %v5991_v50  ;;  %v252_v46 = vld [vmem:[%s9293_s1 + $0x6e0] sm:$0xff]  ;;  %v6044_v50 = vcombine.low %v240_v36, %v244_v37  ;;  %v297_v37 = vld [vmem:[%s9293_s1 + $0x848] sm:$0xff] }
  0x52   :  { %v300_v36 = vld [vmem:[%s9293_s1 + $0x860] sm:$0xff] }
  0x54   :  { %3652 = vmatpush1.bf16.msra.mxu0 %v5988_v52  ;;  %3857 = vmatpush1.bf16.msra.mxu1 %v5990_v53  ;;  %v6053_v52 = vcombine.high %v248_v45, %v252_v46  ;;  %v256_v53 = vld [vmem:[%s9293_s1 + $0x700] sm:$0xff] }
  0x55   :  { %3653 = vmatprep.subr.bf16.mxu0 %v5997_v55  ;;  %3858 = vmatprep.subr.bf16.mxu1 %v5999_v59  ;;  %v260_v55 = vld [vmem:[%s9293_s1 + $0x720] sm:$0xff]  ;;  %v6052_v59 = vcombine.low %v248_v45, %v252_v46 }
  0x56   :  { %v304_v46 = vld [vmem:[%s9293_s1 + $0x880] sm:$0xff] }
  0x58   :  { %3654 = vmatpush1.bf16.msra.mxu0 %v5996_v62  ;;  %3859 = vmatpush1.bf16.msra.mxu1 %v5998_v63  ;;  %v6061_v62 = vcombine.high %v256_v53, %v260_v55  ;;  %v264_v63 = vld [vmem:[%s9293_s1 + $0x740] sm:$0xff] }
  0x59   :  { %3655 = vmatprep.subr.bf16.mxu0 %v6005_v1  ;;  %3860 = vmatprep.subr.bf16.mxu1 %v6007_v5  ;;  %v268_v1 = vld [vmem:[%s9293_s1 + $0x760] sm:$0xff]  ;;  %v6060_v5 = vcombine.low %v256_v53, %v260_v55  ;;  %v6109_v55 = vcombine.high %v304_v46, %v308_v47 }
  0x5c   :  { %3656 = vmatpush1.bf16.msra.mxu0 %v6004_v7  ;;  %3861 = vmatpush1.bf16.msra.mxu1 %v6006_v8  ;;  %v6069_v7 = vcombine.high %v264_v63, %v268_v1  ;;  %v272_v8 = vld [vmem:[%s9293_s1 + $0x780] sm:$0xff] }
  0x5d   :  { %3657 = vmatprep.subr.bf16.mxu0 %v6013_v9  ;;  %3862 = vmatprep.subr.bf16.mxu1 %v6015_v14  ;;  %v276_v9 = vld [vmem:[%s9293_s1 + $0x7a0] sm:$0xff]  ;;  %v6068_v14 = vcombine.low %v264_v63, %v268_v1 }
  0x5e   :  { %v6076_v23 = vcombine.low %v272_v8, %v276_v9 }
  0x60   :  { %3658 = vmatpush1.bf16.msra.mxu0 %v6012_v16  ;;  %3863 = vmatpush1.bf16.msra.mxu1 %v6014_v17  ;;  %v6077_v16 = vcombine.high %v272_v8, %v276_v9  ;;  %v280_v17 = vld [vmem:[%s9293_s1 + $0x7c0] sm:$0xff] }
  0x61   :  { %3659 = vmatprep.subr.bf16.mxu0 %v6021_v18  ;;  %3864 = vmatprep.subr.bf16.mxu1 %v6023_v22  ;;  %v284_v18 = vld [vmem:[%s9293_s1 + $0x7e0] sm:$0xff]  ;;  %v652_v22 = vcombine.high %v7087_v60, %v7087_v60  ;;  %v6087_v60 = vcombine.high %v281_v19, %v285_v21 }
  0x62   :  { %v6084_v31 = vcombine.low %v280_v17, %v284_v18 }
  0x64   :  { %3660 = vmatpush1.bf16.msra.mxu0 %v6020_v25  ;;  %3865 = vmatpush1.bf16.msra.mxu1 %v6022_v26  ;;  %v6078_v25 = vcombine.low %v273_v11, %v277_v13  ;;  %v6085_v26 = vcombine.high %v280_v17, %v284_v18  ;;  %v328_v11 = vld [vmem:[%s9293_s1 + $0x940] sm:$0xff]  ;;  %v329_v13 = vld [vmem:[%s9293_s1 + $0x948] sm:$0xff] }
  0x65   :  { %3661 = vmatprep.subr.bf16.mxu0 %v6029_v27  ;;  %3866 = vmatprep.subr.bf16.mxu1 %v6031_v0  ;;  %v288_v27 = vld [vmem:[%s9293_s1 + $0x800] sm:$0xff]  ;;  %v7427_v0 = vrot.slane %v652_v22, %v7076_v54 }
  0x67   :  { %v668_v40 = vcombine.high %v7427_v0, %v7427_v0 }
  0x68   :  { %3662 = vmatpush1.bf16.msra.mxu0 %v6028_v32  ;;  %3867 = vmatpush1.bf16.msra.mxu1 %v6030_v33  ;;  %v6086_v32 = vcombine.low %v281_v19, %v285_v21  ;;  %v6093_v33 = vcombine.high %v288_v27, %v292_v28  ;;  %v336_v19 = vld [vmem:[%s9293_s1 + $0x980] sm:$0xff]  ;;  %v337_v21 = vld [vmem:[%s9293_s1 + $0x988] sm:$0xff] }
  0x69   :  { %3663 = vmatprep.subr.bf16.mxu0 %v6037_v35  ;;  %3868 = vmatprep.subr.bf16.mxu1 %v6039_v39  ;;  %v296_v35 = vld [vmem:[%s9293_s1 + $0x840] sm:$0xff]  ;;  %v301_v39 = vld [vmem:[%s9293_s1 + $0x868] sm:$0xff] }
  0x6a   :  { %v6101_v45 = vcombine.high %v296_v35, %v300_v36  ;;  %v6103_v49 = vcombine.high %v297_v37, %v301_v39  ;;  %v6102_v53 = vcombine.low %v297_v37, %v301_v39  ;;  %v356_v37 = vld [vmem:[%s9293_s1 + $0xa20] sm:$0xff] }
  0x6c   :  { %3664 = vmatpush1.bf16.msra.mxu0 %v6036_v41  ;;  %3869 = vmatpush1.bf16.msra.mxu1 %v6038_v42  ;;  %v7445_v41 = vcombine.high %v7228_v24, %v7228_v24  ;;  %v6092_v42 = vcombine.low %v288_v27, %v292_v28  ;;  %v344_v28 = vld [vmem:[%s9293_s1 + $0x9c0] sm:$0xff] }
  0x6d   :  { %3665 = vmatprep.subr.bf16.mxu0 %v6045_v43  ;;  %3870 = vmatprep.subr.bf16.mxu1 %v6047_v48  ;;  %v6094_v43 = vcombine.low %v289_v29, %v293_v30  ;;  %v305_v48 = vld [vmem:[%s9293_s1 + $0x888] sm:$0xff]  ;;  %v348_v29 = vld [vmem:[%s9293_s1 + $0x9e0] sm:$0xff] }
  0x70   :  { %3666 = vmatpush1.bf16.msra.mxu0 %v6044_v50  ;;  %3871 = vmatpush1.bf16.msra.mxu1 %v6046_v51  ;;  %v309_v50 = vld [vmem:[%s9293_s1 + $0x8a8] sm:$0xff]  ;;  %v7460_v51 = vrot.slane %v668_v40, %v7076_v54 }
  0x71   :  { %3667 = vmatprep.subr.bf16.mxu0 %v6053_v52  ;;  %3872 = vmatprep.subr.bf16.mxu1 %v6055_v57  ;;  %v6100_v52 = vcombine.low %v296_v35, %v300_v36  ;;  %v316_v57 = vld [vmem:[%s9293_s1 + $0x8e0] sm:$0xff]  ;;  %v6110_v63 = vcombine.low %v305_v48, %v309_v50  ;;  %v6149_v35 = vcombine.high %v344_v28, %v348_v29  ;;  %v357_v40 = vld [vmem:[%s9293_s1 + $0xa28] sm:$0xff] }
  0x72   :  { %v6117_v1 = vcombine.high %v312_v56, %v316_v57  ;;  %v352_v36 = vld [vmem:[%s9293_s1 + $0xa00] sm:$0xff] }
  0x74   :  { %3668 = vmatpush1.bf16.msra.mxu0 %v6052_v59  ;;  %3873 = vmatpush1.bf16.msra.mxu1 %v6054_v61  ;;  %v6111_v59 = vcombine.high %v305_v48, %v309_v50  ;;  %v317_v61 = vld [vmem:[%s9293_s1 + $0x8e8] sm:$0xff] }
  0x75   :  { %3669 = vmatprep.subr.bf16.mxu0 %v6061_v62  ;;  %3874 = vmatprep.subr.bf16.mxu1 %v6063_v3  ;;  %v6108_v62 = vcombine.low %v304_v46, %v308_v47  ;;  %v324_v3 = vld [vmem:[%s9293_s1 + $0x920] sm:$0xff]  ;;  %v6118_v8 = vcombine.low %v313_v58, %v317_v61  ;;  %v361_v48 = vld [vmem:[%s9293_s1 + $0xa48] sm:$0xff] }
  0x76   :  { %v6125_v9 = vcombine.high %v320_v2, %v324_v3  ;;  %v360_v46 = vld [vmem:[%s9293_s1 + $0xa40] sm:$0xff]  ;;  %v365_v50 = vld [vmem:[%s9293_s1 + $0xa68] sm:$0xff] }
  0x77   :  { %v364_v47 = vld [vmem:[%s9293_s1 + $0xa60] sm:$0xff] }
  0x78   :  { %3670 = vmatpush1.bf16.msra.mxu0 %v6060_v5  ;;  %3875 = vmatpush1.bf16.msra.mxu1 %v6062_v6  ;;  %v6119_v5 = vcombine.high %v313_v58, %v317_v61  ;;  %v325_v6 = vld [vmem:[%s9293_s1 + $0x928] sm:$0xff]  ;;  %v372_v58 = vld [vmem:[%s9293_s1 + $0xaa0] sm:$0xff] }
  0x79   :  { %3671 = vmatprep.subr.bf16.mxu0 %v6069_v7  ;;  %3876 = vmatprep.subr.bf16.mxu1 %v6071_v12  ;;  %v6116_v7 = vcombine.low %v312_v56, %v316_v57  ;;  %v332_v12 = vld [vmem:[%s9293_s1 + $0x960] sm:$0xff]  ;;  %v6126_v17 = vcombine.low %v321_v4, %v325_v6  ;;  %v6167_v57 = vcombine.high %v361_v48, %v365_v50  ;;  %v373_v61 = vld [vmem:[%s9293_s1 + $0xaa8] sm:$0xff] }
  0x7a   :  { %v6133_v18 = vcombine.high %v328_v11, %v332_v12  ;;  %v368_v56 = vld [vmem:[%s9293_s1 + $0xa80] sm:$0xff] }
  0x7c   :  { %3672 = vmatpush1.bf16.msra.mxu0 %v6068_v14  ;;  %3877 = vmatpush1.bf16.msra.mxu1 %v6070_v15  ;;  %v6127_v14 = vcombine.high %v321_v4, %v325_v6  ;;  %v333_v15 = vld [vmem:[%s9293_s1 + $0x968] sm:$0xff]  ;;  %v380_v4 = vld [vmem:[%s9293_s1 + $0xae0] sm:$0xff] }
  0x7d   :  { %3673 = vmatprep.subr.bf16.mxu0 %v6077_v16  ;;  %3878 = vmatprep.subr.bf16.mxu1 %v6079_v20  ;;  %v6124_v16 = vcombine.low %v320_v2, %v324_v3  ;;  %v340_v20 = vld [vmem:[%s9293_s1 + $0x9a0] sm:$0xff]  ;;  %v6135_v22 = vcombine.high %v329_v13, %v333_v15  ;;  %v6173_v2 = vcombine.high %v368_v56, %v372_v58 }
  0x7e   :  { %v6141_v27 = vcombine.high %v336_v19, %v340_v20  ;;  %v376_v3 = vld [vmem:[%s9293_s1 + $0xac0] sm:$0xff] }
  0x80   :  { %3674 = vmatpush1.bf16.msra.mxu0 %v6076_v23  ;;  %3879 = vmatpush1.bf16.msra.mxu1 %v6078_v25  ;;  %v341_v23 = vld [vmem:[%s9293_s1 + $0x9a8] sm:$0xff]  ;;  %v6132_v25 = vcombine.low %v328_v11, %v332_v12  ;;  %v6181_v11 = vcombine.high %v376_v3, %v380_v4  ;;  %v384_v12 = vld [vmem:[%s9293_s1 + $0xb00] sm:$0xff] }
  0x81   :  { %3675 = vmatprep.subr.bf16.mxu0 %v6085_v26  ;;  %3880 = vmatprep.subr.bf16.mxu1 %v6087_v60  ;;  %v6134_v26 = vcombine.low %v329_v13, %v333_v15  ;;  %v345_v60 = vld [vmem:[%s9293_s1 + $0x9c8] sm:$0xff]  ;;  %v6143_v30 = vcombine.high %v337_v21, %v341_v23  ;;  %v388_v13 = vld [vmem:[%s9293_s1 + $0xb20] sm:$0xff] }
  0x84   :  { %3676 = vmatpush1.bf16.msra.mxu0 %v6084_v31  ;;  %3881 = vmatpush1.bf16.msra.mxu1 %v6086_v32  ;;  %v349_v31 = vld [vmem:[%s9293_s1 + $0x9e8] sm:$0xff]  ;;  %v6140_v32 = vcombine.low %v336_v19, %v340_v20  ;;  %v6189_v19 = vcombine.high %v384_v12, %v388_v13  ;;  %v392_v20 = vld [vmem:[%s9293_s1 + $0xb40] sm:$0xff] }
  0x85   :  { %3686 = vmatprep.subr.bf16.mxu0 %v6093_v33  ;;  %3891 = vmatprep.subr.bf16.mxu1 %v6095_v38  ;;  %v6142_v33 = vcombine.low %v337_v21, %v341_v23  ;;  %v353_v38 = vld [vmem:[%s9293_s1 + $0xa08] sm:$0xff]  ;;  %v6151_v39 = vcombine.high %v345_v60, %v349_v31  ;;  %v396_v21 = vld [vmem:[%s9293_s1 + $0xb60] sm:$0xff] }
  0x87   :  { %3678 = vmatmul.mubr.bf16.vlgmr.msra.gmra.mrb[0].mxu0 %v7445_v41  ;;  %3883 = vmatmul.mubr.bf16.vlgmr.msra.gmra.mrb[0].mxu1 %v7445_v41 }
  0x88   :  { %3687 = vmatpush1.bf16.msra.mxu0 %v6092_v42  ;;  %3892 = vmatpush1.bf16.msra.mxu1 %v6094_v43  ;;  %v6148_v42 = vcombine.low %v344_v28, %v348_v29  ;;  %v6150_v43 = vcombine.low %v345_v60, %v349_v31  ;;  %v6197_v28 = vcombine.high %v392_v20, %v396_v21  ;;  %v400_v29 = vld [vmem:[%s9293_s1 + $0xb80] sm:$0xff] }
  0x89   :  { %3688 = vmatprep.subr.bf16.mxu0 %v6101_v45  ;;  %3893 = vmatprep.subr.bf16.mxu1 %v6103_v49  ;;  %v6157_v45 = vcombine.high %v352_v36, %v356_v37  ;;  %v6159_v49 = vcombine.high %v353_v38, %v357_v40  ;;  %v404_v60 = vld [vmem:[%s9293_s1 + $0xba0] sm:$0xff] }
  0x8a   :  { %3718 = vmatprep.mubr.bf16.mxu0 %v7460_v51  ;;  %3923 = vmatprep.mubr.bf16.mxu1 %v7460_v51 }
  0x8c   :  { %3689 = vmatpush1.bf16.msra.mxu0 %v6100_v52  ;;  %3894 = vmatpush1.bf16.msra.mxu1 %v6102_v53  ;;  %v6156_v52 = vcombine.low %v352_v36, %v356_v37  ;;  %v6158_v53 = vcombine.low %v353_v38, %v357_v40  ;;  %v6205_v36 = vcombine.high %v400_v29, %v404_v60  ;;  %v408_v37 = vld [vmem:[%s9293_s1 + $0xbc0] sm:$0xff] }
  0x8d   :  { %3690 = vmatprep.subr.bf16.mxu0 %v6109_v55  ;;  %3895 = vmatprep.subr.bf16.mxu1 %v6111_v59  ;;  %v6165_v55 = vcombine.high %v360_v46, %v364_v47  ;;  %v369_v59 = vld [vmem:[%s9293_s1 + $0xa88] sm:$0xff]  ;;  %v412_v38 = vld [vmem:[%s9293_s1 + $0xbe0] sm:$0xff] }
  0x8e   :  { %v6175_v6 = vcombine.high %v369_v59, %v373_v61 }
  0x90   :  { %3691 = vmatpush1.bf16.msra.mxu0 %v6108_v62  ;;  %3896 = vmatpush1.bf16.msra.mxu1 %v6110_v63  ;;  %v6950_v62 = vmov 0   ;;  %v6164_v63 = vcombine.low %v360_v46, %v364_v47  ;;  %v6213_v46 = vcombine.high %v408_v37, %v412_v38  ;;  %v416_v47 = vld [vmem:[%s9293_s1 + $0xc00] sm:$0xff] }
  0x91   :  { %3692 = vmatprep.subr.bf16.mxu0 %v6117_v1  ;;  %3897 = vmatprep.subr.bf16.mxu1 %v6119_v5  ;;  %v6166_v1 = vcombine.low %v361_v48, %v365_v50  ;;  %v377_v5 = vld [vmem:[%s9293_s1 + $0xac8] sm:$0xff]  ;;  %v420_v48 = vld [vmem:[%s9293_s1 + $0xc20] sm:$0xff] }
  0x92   :  { %6795 = vset.pattern.permute.xlu0 %v6950_v62 }
  0x94   :  { %3693 = vmatpush1.bf16.msra.mxu0 %v6116_v7  ;;  %3898 = vmatpush1.bf16.msra.mxu1 %v6118_v8  ;;  %v381_v7 = vld [vmem:[%s9293_s1 + $0xae8] sm:$0xff]  ;;  %v6172_v8 = vcombine.low %v368_v56, %v372_v58  ;;  %v6221_v56 = vcombine.high %v416_v47, %v420_v48  ;;  %v428_v58 = vld [vmem:[%s9293_s1 + $0xc60] sm:$0xff] }
  0x95   :  { %3694 = vmatprep.subr.bf16.mxu0 %v6125_v9  ;;  %3899 = vmatprep.subr.bf16.mxu1 %v6127_v14  ;;  %v6174_v9 = vcombine.low %v369_v59, %v373_v61  ;;  %v385_v14 = vld [vmem:[%s9293_s1 + $0xb08] sm:$0xff]  ;;  %v6183_v15 = vcombine.high %v377_v5, %v381_v7 }
  0x96   :  { %v425_v59 = vld [vmem:[%s9293_s1 + $0xc48] sm:$0xff] }
  0x98   :  { %3695 = vmatpush1.bf16.msra.mxu0 %v6124_v16  ;;  %3900 = vmatpush1.bf16.msra.mxu1 %v6126_v17  ;;  %v389_v16 = vld [vmem:[%s9293_s1 + $0xb28] sm:$0xff]  ;;  %v6180_v17 = vcombine.low %v376_v3, %v380_v4 }
  0x99   :  { %3696 = vmatprep.subr.bf16.mxu0 %v6133_v18  ;;  %3901 = vmatprep.subr.bf16.mxu1 %v6135_v22  ;;  %v6182_v18 = vcombine.low %v377_v5, %v381_v7  ;;  %v393_v22 = vld [vmem:[%s9293_s1 + $0xb48] sm:$0xff]  ;;  %v6191_v23 = vcombine.high %v385_v14, %v389_v16  ;;  %v436_v7 = vld [vmem:[%s9293_s1 + $0xca0] sm:$0xff] }
  0x9c   :  { %3697 = vmatpush1.bf16.msra.mxu0 %v6132_v25  ;;  %3902 = vmatpush1.bf16.msra.mxu1 %v6134_v26  ;;  %v397_v25 = vld [vmem:[%s9293_s1 + $0xb68] sm:$0xff]  ;;  %v6188_v26 = vcombine.low %v384_v12, %v388_v13 }
  0x9d   :  { %3698 = vmatprep.subr.bf16.mxu0 %v6141_v27  ;;  %3903 = vmatprep.subr.bf16.mxu1 %v6143_v30  ;;  %v6190_v27 = vcombine.low %v385_v14, %v389_v16  ;;  %v401_v30 = vld [vmem:[%s9293_s1 + $0xb88] sm:$0xff]  ;;  %v6199_v31 = vcombine.high %v393_v22, %v397_v25 }
  0xa0   :  { %3699 = vmatpush1.bf16.msra.mxu0 %v6140_v32  ;;  %3904 = vmatpush1.bf16.msra.mxu1 %v6142_v33  ;;  %v405_v32 = vld [vmem:[%s9293_s1 + $0xba8] sm:$0xff]  ;;  %v6196_v33 = vcombine.low %v392_v20, %v396_v21 }
  0xa1   :  { %3700 = vmatprep.subr.bf16.mxu0 %v6149_v35  ;;  %3905 = vmatprep.subr.bf16.mxu1 %v6151_v39  ;;  %v6198_v35 = vcombine.low %v393_v22, %v397_v25  ;;  %v409_v39 = vld [vmem:[%s9293_s1 + $0xbc8] sm:$0xff]  ;;  %v6207_v40 = vcombine.high %v401_v30, %v405_v32 }
  0xa4   :  { %3701 = vmatpush1.bf16.msra.mxu0 %v6148_v42  ;;  %3906 = vmatpush1.bf16.msra.mxu1 %v6150_v43  ;;  %v413_v42 = vld [vmem:[%s9293_s1 + $0xbe8] sm:$0xff]  ;;  %v6204_v43 = vcombine.low %v400_v29, %v404_v60 }
  0xa5   :  { %3702 = vmatprep.subr.bf16.mxu0 %v6157_v45  ;;  %3907 = vmatprep.subr.bf16.mxu1 %v6159_v49  ;;  %v6206_v45 = vcombine.low %v401_v30, %v405_v32  ;;  %v417_v49 = vld [vmem:[%s9293_s1 + $0xc08] sm:$0xff]  ;;  %v6215_v50 = vcombine.high %v409_v39, %v413_v42 }
  0xa8   :  { %3703 = vmatpush1.bf16.msra.mxu0 %v6156_v52  ;;  %3908 = vmatpush1.bf16.msra.mxu1 %v6158_v53  ;;  %v421_v52 = vld [vmem:[%s9293_s1 + $0xc28] sm:$0xff]  ;;  %v6212_v53 = vcombine.low %v408_v37, %v412_v38 }
  0xa9   :  { %3704 = vmatprep.subr.bf16.mxu0 %v6165_v55  ;;  %3909 = vmatprep.subr.bf16.mxu1 %v6167_v57  ;;  %v6214_v55 = vcombine.low %v409_v39, %v413_v42  ;;  %v424_v57 = vld [vmem:[%s9293_s1 + $0xc40] sm:$0xff]  ;;  %v6223_v61 = vcombine.high %v417_v49, %v421_v52  ;;  %v6222_v3 = vcombine.low %v417_v49, %v421_v52 }
  0xaa   :  { %v6229_v4 = vcombine.high %v424_v57, %v428_v58 }
  0xac   :  { %3705 = vmatpush1.bf16.msra.mxu0 %v6164_v63  ;;  %3910 = vmatpush1.bf16.msra.mxu1 %v6166_v1  ;;  %v429_v63 = vld [vmem:[%s9293_s1 + $0xc68] sm:$0xff]  ;;  %v7649_v1 = vrot.slane %v7427_v0, %v7076_v54  ;;  %v7659_v0 = vcombine.high %v7460_v51, %v7460_v51 }
  0xad   :  { %3706 = vmatprep.subr.bf16.mxu0 %v6173_v2  ;;  %3911 = vmatprep.subr.bf16.mxu1 %v6175_v6  ;;  %v6220_v2 = vcombine.low %v416_v47, %v420_v48  ;;  %v6231_v5 = vcombine.high %v425_v59, %v429_v63  ;;  %v432_v6 = vld [vmem:[%s9293_s1 + $0xc80] sm:$0xff] }
  0xb0   :  { %3707 = vmatpush1.bf16.msra.mxu0 %v6172_v8  ;;  %3912 = vmatpush1.bf16.msra.mxu1 %v6174_v9 }
  0xb1   :  { %3708 = vmatprep.subr.bf16.mxu0 %v6181_v11  ;;  %3913 = vmatprep.subr.bf16.mxu1 %v6183_v15 }
  0xb4   :  { %3709 = vmatpush1.bf16.msra.mxu0 %v6180_v17  ;;  %3914 = vmatpush1.bf16.msra.mxu1 %v6182_v18 }
  0xb5   :  { %3710 = vmatprep.subr.bf16.mxu0 %v6189_v19  ;;  %3915 = vmatprep.subr.bf16.mxu1 %v6191_v23 }
  0xb8   :  { %3711 = vmatpush1.bf16.msra.mxu0 %v6188_v26  ;;  %3916 = vmatpush1.bf16.msra.mxu1 %v6190_v27 }
  0xb9   :  { %3712 = vmatprep.subr.bf16.mxu0 %v6197_v28  ;;  %3917 = vmatprep.subr.bf16.mxu1 %v6199_v31 }
  0xbc   :  { %3713 = vmatpush1.bf16.msra.mxu0 %v6196_v33  ;;  %3918 = vmatpush1.bf16.msra.mxu1 %v6198_v35 }
  0xbd   :  { %3714 = vmatprep.subr.bf16.mxu0 %v6205_v36  ;;  %3919 = vmatprep.subr.bf16.mxu1 %v6207_v40 }
  0xc0   :  { %3715 = vmatpush1.bf16.msra.mxu0 %v6204_v43  ;;  %3920 = vmatpush1.bf16.msra.mxu1 %v6206_v45 }
  0xc1   :  { %3716 = vmatprep.subr.bf16.mxu0 %v6213_v46  ;;  %3921 = vmatprep.subr.bf16.mxu1 %v6215_v50 }
  0xc4   :  { %3717 = vmatpush1.bf16.msra.mxu0 %v6212_v53  ;;  %3922 = vmatpush1.bf16.msra.mxu1 %v6214_v55 }
  0xc5   :  { %3727 = vmatprep.subr.bf16.mxu0 %v6221_v56  ;;  %3932 = vmatprep.subr.bf16.mxu1 %v6223_v61 }
  0xc6   :  { %14 = vsyncpa [#allocation4], 0  ;;  %v433_v8 = vld [vmem:[%s9293_s1 + $0xc88] sm:$0xff]  ;;  %v6228_v11 = vcombine.low %v424_v57, %v428_v58  ;;  %v6230_v12 = vcombine.low %v425_v59, %v429_v63  ;;  %v6237_v13 = vcombine.high %v432_v6, %v436_v7  ;;  %v440_v15 = vld [vmem:[%s9293_s1 + $0xcc0] sm:$0xff]  ;;  %v6236_v19 = vcombine.low %v432_v6, %v436_v7  ;;  %s6951_s17 = smov [#allocation3]  }
  0xc7   :  { %3719 = vmatmul.mubr.bf16.vlgmr.msra.gmra.mrb[0].mxu0 %v7649_v1  ;;  %v437_v9 = vld [vmem:[%s9293_s1 + $0xca8] sm:$0xff]  ;;  %3924 = vmatmul.mubr.bf16.vlgmr.msra.gmra.mrb[0].mxu1 %v7649_v1  ;;  %v444_v16 = vld [vmem:[%s9293_s1 + $0xce0] sm:$0xff]  ;;  %vm5798_vm0 = vcmask 41984   ;;  %s5827_s18 = sshll.u32 %s6951_s17, 4  ;;  %s5828_s18 = int_to_ptr.vmem [resolvable:$true] %s5827_s18 }
  0xc8   :  { %3728 = vmatpush1.bf16.msra.mxu0 %v6220_v2  ;;  %3933 = vmatpush1.bf16.msra.mxu1 %v6222_v3  ;;  %v6239_v14 = vcombine.high %v433_v8, %v437_v9  ;;  %v441_v17 = vld [vmem:[%s9293_s1 + $0xcc8] sm:$0xff]  ;;  %v6238_v20 = vcombine.low %v433_v8, %v437_v9  ;;  %v6245_v21 = vcombine.high %v440_v15, %v444_v16  ;;  %v448_v23 = vld [vmem:[%s9293_s1 + $0xd00] sm:$0xff]  ;;  %s6925_s19 = scalar_lea.vmem %s5828_s18, 32  ;;  %p6930_p1 = scmp.lt.s32.totalorder %s5828_s18, %s5828_s18 }
  0xc9   :  { %3729 = vmatprep.subr.bf16.mxu0 %v6229_v4  ;;  %3934 = vmatprep.subr.bf16.mxu1 %v6231_v5  ;;  %v445_v18 = vld [vmem:[%s9293_s1 + $0xce8] sm:$0xff]  ;;  %v452_v25 = vld [vmem:[%s9293_s1 + $0xd20] sm:$0xff]  ;;  %v6244_v28 = vcombine.low %v440_v15, %v444_v16  ;;  %p6926_p0 = scmp.ne.s32.totalorder %s5828_s18, %s6925_s19  ;;  %p6931_p2 = scmp.lt.s32.totalorder %s6925_s19, %s6925_s19 }
  0xca   :  { %3759 = vmatprep.mubr.bf16.mxu0 %v7659_v0  ;;  %3964 = vmatprep.mubr.bf16.mxu1 %v7659_v0  ;;  %v6247_v22 = vcombine.high %v441_v17, %v445_v18  ;;  %v449_v26 = vld [vmem:[%s9293_s1 + $0xd08] sm:$0xff]  ;;  %v6246_v29 = vcombine.low %v441_v17, %v445_v18  ;;  %v6253_v60 = vcombine.high %v448_v23, %v452_v25  ;;  %v456_v31 = vld [vmem:[%s9293_s1 + $0xd40] sm:$0xff] }
  0xcb   :  { %v453_v27 = vld [vmem:[%s9293_s1 + $0xd28] sm:$0xff]  ;;  %v460_v32 = vld [vmem:[%s9293_s1 + $0xd60] sm:$0xff]  ;;  %v6252_v36 = vcombine.low %v448_v23, %v452_v25  ;;  %p6932_p3 = por %p6931_p2, %p6930_p1 }
  0xcc   :  { %3730 = vmatpush1.bf16.msra.mxu0 %v6228_v11  ;;  %3935 = vmatpush1.bf16.msra.mxu1 %v6230_v12  ;;  %v6255_v30 = vcombine.high %v449_v26, %v453_v27  ;;  %v457_v33 = vld [vmem:[%s9293_s1 + $0xd48] sm:$0xff]  ;;  %v6254_v37 = vcombine.low %v449_v26, %v453_v27  ;;  %v6261_v38 = vcombine.high %v456_v31, %v460_v32  ;;  %v464_v40 = vld [vmem:[%s9293_s1 + $0xd80] sm:$0xff] }
  0xcd   :  { %3731 = vmatprep.subr.bf16.mxu0 %v6237_v13  ;;  %3936 = vmatprep.subr.bf16.mxu1 %v6239_v14  ;;  %v461_v35 = vld [vmem:[%s9293_s1 + $0xd68] sm:$0xff]  ;;  %v468_v42 = vld [vmem:[%s9293_s1 + $0xda0] sm:$0xff]  ;;  %v6260_v46 = vcombine.low %v456_v31, %v460_v32  ;;  %p6933_p4 = pnand %p6932_p3, %p6926_p0 }
  0xce   :  { %v6263_v39 = vcombine.high %v457_v33, %v461_v35  ;;  %v465_v43 = vld [vmem:[%s9293_s1 + $0xd88] sm:$0xff]  ;;  %v6262_v47 = vcombine.low %v457_v33, %v461_v35  ;;  %v6269_v48 = vcombine.high %v464_v40, %v468_v42  ;;  %v472_v50 = vld [vmem:[%s9293_s1 + $0xdc0] sm:$0xff]  ;;  %v6268_v56 = vcombine.low %v464_v40, %v468_v42 }
  0xcf   :  { %v469_v45 = vld [vmem:[%s9293_s1 + $0xda8] sm:$0xff]  ;;  %v476_v52 = vld [vmem:[%s9293_s1 + $0xde0] sm:$0xff] }
  0xd0   :  { %3732 = vmatpush1.bf16.msra.mxu0 %v6236_v19  ;;  %3937 = vmatpush1.bf16.msra.mxu1 %v6238_v20  ;;  %v6271_v49 = vcombine.high %v465_v43, %v469_v45  ;;  %v473_v53 = vld [vmem:[%s9293_s1 + $0xdc8] sm:$0xff]  ;;  %v6270_v57 = vcombine.low %v465_v43, %v469_v45  ;;  %v6277_v58 = vcombine.high %v472_v50, %v476_v52  ;;  %v480_v61 = vld [vmem:[%s9293_s1 + $0xe00] sm:$0xff] }
  0xd1   :  { %3733 = vmatprep.subr.bf16.mxu0 %v6245_v21  ;;  %3938 = vmatprep.subr.bf16.mxu1 %v6247_v22  ;;  %v477_v55 = vld [vmem:[%s9293_s1 + $0xde8] sm:$0xff]  ;;  %v484_v63 = vld [vmem:[%s9293_s1 + $0xe20] sm:$0xff]  ;;  %v6276_v4 = vcombine.low %v472_v50, %v476_v52 }
  0xd2   :  { %v6279_v59 = vcombine.high %v473_v53, %v477_v55  ;;  %v481_v2 = vld [vmem:[%s9293_s1 + $0xe08] sm:$0xff]  ;;  %v6278_v5 = vcombine.low %v473_v53, %v477_v55  ;;  %v6285_v6 = vcombine.high %v480_v61, %v484_v63  ;;  %v488_v8 = vld [vmem:[%s9293_s1 + $0xe40] sm:$0xff]  ;;  %v6284_v13 = vcombine.low %v480_v61, %v484_v63 }
  0xd3   :  { %v485_v3 = vld [vmem:[%s9293_s1 + $0xe28] sm:$0xff]  ;;  %v492_v9 = vld [vmem:[%s9293_s1 + $0xe60] sm:$0xff] }
  0xd4   :  { %3734 = vmatpush1.bf16.msra.mxu0 %v6244_v28  ;;  %3939 = vmatpush1.bf16.msra.mxu1 %v6246_v29  ;;  %v6287_v7 = vcombine.high %v481_v2, %v485_v3  ;;  %v489_v11 = vld [vmem:[%s9293_s1 + $0xe48] sm:$0xff]  ;;  %v6286_v14 = vcombine.low %v481_v2, %v485_v3  ;;  %v6293_v15 = vcombine.high %v488_v8, %v492_v9  ;;  %v496_v17 = vld [vmem:[%s9293_s1 + $0xe80] sm:$0xff] }
  0xd5   :  { %3735 = vmatprep.subr.bf16.mxu0 %v6253_v60  ;;  %3940 = vmatprep.subr.bf16.mxu1 %v6255_v30  ;;  %v493_v12 = vld [vmem:[%s9293_s1 + $0xe68] sm:$0xff]  ;;  %v500_v18 = vld [vmem:[%s9293_s1 + $0xea0] sm:$0xff]  ;;  %v6292_v21 = vcombine.low %v488_v8, %v492_v9 }
  0xd6   :  { %v6295_v16 = vcombine.high %v489_v11, %v493_v12  ;;  %v497_v19 = vld [vmem:[%s9293_s1 + $0xe88] sm:$0xff]  ;;  %v6294_v22 = vcombine.low %v489_v11, %v493_v12  ;;  %v6301_v23 = vcombine.high %v496_v17, %v500_v18  ;;  %v504_v26 = vld [vmem:[%s9293_s1 + $0xec0] sm:$0xff]  ;;  %v6300_v60 = vcombine.low %v496_v17, %v500_v18 }
  0xd7   :  { %v501_v20 = vld [vmem:[%s9293_s1 + $0xea8] sm:$0xff]  ;;  %v508_v27 = vld [vmem:[%s9293_s1 + $0xee0] sm:$0xff] }
  0xd8   :  { %3736 = vmatpush1.bf16.msra.mxu0 %v6252_v36  ;;  %3941 = vmatpush1.bf16.msra.mxu1 %v6254_v37  ;;  %v6303_v25 = vcombine.high %v497_v19, %v501_v20  ;;  %v505_v28 = vld [vmem:[%s9293_s1 + $0xec8] sm:$0xff]  ;;  %v6302_v30 = vcombine.low %v497_v19, %v501_v20  ;;  %v6309_v31 = vcombine.high %v504_v26, %v508_v27  ;;  %v512_v33 = vld [vmem:[%s9293_s1 + $0xf00] sm:$0xff] }
  0xd9   :  { %3737 = vmatprep.subr.bf16.mxu0 %v6261_v38  ;;  %3942 = vmatprep.subr.bf16.mxu1 %v6263_v39  ;;  %v509_v29 = vld [vmem:[%s9293_s1 + $0xee8] sm:$0xff]  ;;  %v516_v35 = vld [vmem:[%s9293_s1 + $0xf20] sm:$0xff]  ;;  %v6308_v38 = vcombine.low %v504_v26, %v508_v27 }
  0xda   :  { %v6311_v32 = vcombine.high %v505_v28, %v509_v29  ;;  %v513_v36 = vld [vmem:[%s9293_s1 + $0xf08] sm:$0xff]  ;;  %v6310_v39 = vcombine.low %v505_v28, %v509_v29  ;;  %v6317_v40 = vcombine.high %v512_v33, %v516_v35  ;;  %v520_v43 = vld [vmem:[%s9293_s1 + $0xf40] sm:$0xff] }
  0xdb   :  { %v517_v37 = vld [vmem:[%s9293_s1 + $0xf28] sm:$0xff]  ;;  %v524_v45 = vld [vmem:[%s9293_s1 + $0xf60] sm:$0xff] }
  0xdc   :  { %3738 = vmatpush1.bf16.msra.mxu0 %v6260_v46  ;;  %3943 = vmatpush1.bf16.msra.mxu1 %v6262_v47  ;;  %v6319_v42 = vcombine.high %v513_v36, %v517_v37  ;;  %v521_v46 = vld [vmem:[%s9293_s1 + $0xf48] sm:$0xff]  ;;  %v6325_v50 = vcombine.high %v520_v43, %v524_v45  ;;  %v528_v53 = vld [vmem:[%s9293_s1 + $0xf80] sm:$0xff] }
  0xdd   :  { %3739 = vmatprep.subr.bf16.mxu0 %v6269_v48  ;;  %3944 = vmatprep.subr.bf16.mxu1 %v6271_v49  ;;  %v525_v47 = vld [vmem:[%s9293_s1 + $0xf68] sm:$0xff]  ;;  %v6316_v48 = vcombine.low %v512_v33, %v516_v35  ;;  %v6318_v49 = vcombine.low %v513_v36, %v517_v37  ;;  %v532_v55 = vld [vmem:[%s9293_s1 + $0xfa0] sm:$0xff] }
  0xde   :  { %v6327_v52 = vcombine.high %v521_v46, %v525_v47  ;;  %v6333_v61 = vcombine.high %v528_v53, %v532_v55  ;;  %v536_v2 = vld [vmem:[%s9293_s1 + $0xfc0] sm:$0xff] }
  0xdf   :  { %v540_v3 = vld [vmem:[%s9293_s1 + $0xfe0] sm:$0xff] }
  0xe0   :  { %3740 = vmatpush1.bf16.msra.mxu0 %v6268_v56  ;;  %3945 = vmatpush1.bf16.msra.mxu1 %v6270_v57  ;;  %v529_v56 = vld [vmem:[%s9293_s1 + $0xf88] sm:$0xff]  ;;  %v6341_v8 = vcombine.high %v536_v2, %v540_v3  ;;  %v544_v11 = vld [vmem:[%s9293_s1 + $0x1000] sm:$0xff] }
  0xe1   :  { %3741 = vmatprep.subr.bf16.mxu0 %v6277_v58  ;;  %3946 = vmatprep.subr.bf16.mxu1 %v6279_v59  ;;  %v533_v57 = vld [vmem:[%s9293_s1 + $0xfa8] sm:$0xff]  ;;  %v6324_v58 = vcombine.low %v520_v43, %v524_v45  ;;  %v6326_v59 = vcombine.low %v521_v46, %v525_v47  ;;  %v548_v12 = vld [vmem:[%s9293_s1 + $0x1020] sm:$0xff] }
  0xe2   :  { %v6335_v63 = vcombine.high %v529_v56, %v533_v57  ;;  %v6349_v17 = vcombine.high %v544_v11, %v548_v12  ;;  %v552_v19 = vld [vmem:[%s9293_s1 + $0x1040] sm:$0xff] }
  0xe3   :  { %v556_v20 = vld [vmem:[%s9293_s1 + $0x1060] sm:$0xff] }
  0xe4   :  { %3742 = vmatpush1.bf16.msra.mxu0 %v6276_v4  ;;  %3947 = vmatpush1.bf16.msra.mxu1 %v6278_v5  ;;  %v537_v4 = vld [vmem:[%s9293_s1 + $0xfc8] sm:$0xff]  ;;  %v6357_v27 = vcombine.high %v552_v19, %v556_v20  ;;  %v560_v29 = vld [vmem:[%s9293_s1 + $0x1080] sm:$0xff] }
  0xe5   :  { %3743 = vmatprep.subr.bf16.mxu0 %v6285_v6  ;;  %3948 = vmatprep.subr.bf16.mxu1 %v6287_v7  ;;  %v541_v5 = vld [vmem:[%s9293_s1 + $0xfe8] sm:$0xff]  ;;  %v6332_v6 = vcombine.low %v528_v53, %v532_v55  ;;  %v6334_v7 = vcombine.low %v529_v56, %v533_v57  ;;  %v568_v37 = vld [vmem:[%s9293_s1 + $0x10c0] sm:$0xff] }
  0xe6   :  { %v6343_v9 = vcombine.high %v537_v4, %v541_v5  ;;  %v576_v47 = vld [vmem:[%s9293_s1 + $0x1100] sm:$0xff] }
  0xe7   :  { %v584_v57 = vld [vmem:[%s9293_s1 + $0x1140] sm:$0xff] }
  0xe8   :  { %3744 = vmatpush1.bf16.msra.mxu0 %v6284_v13  ;;  %3949 = vmatpush1.bf16.msra.mxu1 %v6286_v14  ;;  %v545_v13 = vld [vmem:[%s9293_s1 + $0x1008] sm:$0xff] }
  0xe9   :  { %3745 = vmatprep.subr.bf16.mxu0 %v6293_v15  ;;  %3950 = vmatprep.subr.bf16.mxu1 %v6295_v16  ;;  %v549_v14 = vld [vmem:[%s9293_s1 + $0x1028] sm:$0xff]  ;;  %v6340_v15 = vcombine.low %v536_v2, %v540_v3  ;;  %v6342_v16 = vcombine.low %v537_v4, %v541_v5  ;;  %v592_v5 = vld [vmem:[%s9293_s1 + $0x1180] sm:$0xff] }
  0xea   :  { %v6351_v18 = vcombine.high %v545_v13, %v549_v14  ;;  %v6350_v26 = vcombine.low %v545_v13, %v549_v14  ;;  %v600_v14 = vld [vmem:[%s9293_s1 + $0x11c0] sm:$0xff] }
  0xec   :  { %3746 = vmatpush1.bf16.msra.mxu0 %v6292_v21  ;;  %3951 = vmatpush1.bf16.msra.mxu1 %v6294_v22  ;;  %v7847_v21 = vcombine.high %v7649_v1, %v7649_v1  ;;  %v553_v22 = vld [vmem:[%s9293_s1 + $0x1048] sm:$0xff] }
  0xed   :  { %3747 = vmatprep.subr.bf16.mxu0 %v6301_v23  ;;  %3952 = vmatprep.subr.bf16.mxu1 %v6303_v25  ;;  %v557_v23 = vld [vmem:[%s9293_s1 + $0x1068] sm:$0xff]  ;;  %v6348_v25 = vcombine.low %v544_v11, %v548_v12 }
  0xee   :  { %v6359_v28 = vcombine.high %v553_v22, %v557_v23  ;;  %v6358_v33 = vcombine.low %v553_v22, %v557_v23  ;;  %v34_v23 = vld [vmem:[%s9293_s1 + $0x10] sm:$0xff] }
  0xf0   :  { %3748 = vmatpush1.bf16.msra.mxu0 %v6300_v60  ;;  %3953 = vmatpush1.bf16.msra.mxu1 %v6302_v30  ;;  %v564_v60 = vld [vmem:[%s9293_s1 + $0x10a0] sm:$0xff]  ;;  %v561_v30 = vld [vmem:[%s9293_s1 + $0x1088] sm:$0xff] }
  0xf1   :  { %3749 = vmatprep.subr.bf16.mxu0 %v6309_v31  ;;  %3954 = vmatprep.subr.bf16.mxu1 %v6311_v32  ;;  %v565_v31 = vld [vmem:[%s9293_s1 + $0x10a8] sm:$0xff]  ;;  %v6356_v32 = vcombine.low %v552_v19, %v556_v20  ;;  %v6365_v35 = vcombine.high %v560_v29, %v564_v60 }
  0xf2   :  { %v6367_v36 = vcombine.high %v561_v30, %v565_v31  ;;  %v6366_v43 = vcombine.low %v561_v30, %v565_v31 }
  0xf4   :  { %3750 = vmatpush1.bf16.msra.mxu0 %v6308_v38  ;;  %3955 = vmatpush1.bf16.msra.mxu1 %v6310_v39  ;;  %v572_v38 = vld [vmem:[%s9293_s1 + $0x10e0] sm:$0xff]  ;;  %v569_v39 = vld [vmem:[%s9293_s1 + $0x10c8] sm:$0xff] }
  0xf5   :  { %3751 = vmatprep.subr.bf16.mxu0 %v6317_v40  ;;  %3956 = vmatprep.subr.bf16.mxu1 %v6319_v42  ;;  %v573_v40 = vld [vmem:[%s9293_s1 + $0x10e8] sm:$0xff]  ;;  %v6364_v42 = vcombine.low %v560_v29, %v564_v60  ;;  %v6373_v45 = vcombine.high %v568_v37, %v572_v38 }
  0xf6   :  { %v6375_v46 = vcombine.high %v569_v39, %v573_v40  ;;  %v6374_v53 = vcombine.low %v569_v39, %v573_v40  ;;  %v5835_v29 = vld.sshfl [vmem:[%s9292_s0 + $0x8] sm:$0x1 pattern:$0x75316420] }
  0xf8   :  { %3752 = vmatpush1.bf16.msra.mxu0 %v6316_v48  ;;  %3957 = vmatpush1.bf16.msra.mxu1 %v6318_v49  ;;  %v580_v48 = vld [vmem:[%s9293_s1 + $0x1120] sm:$0xff]  ;;  %v577_v49 = vld [vmem:[%s9293_s1 + $0x1108] sm:$0xff] }
  0xf9   :  { %3753 = vmatprep.subr.bf16.mxu0 %v6325_v50  ;;  %3958 = vmatprep.subr.bf16.mxu1 %v6327_v52  ;;  %v581_v50 = vld [vmem:[%s9293_s1 + $0x1128] sm:$0xff]  ;;  %v6372_v52 = vcombine.low %v568_v37, %v572_v38  ;;  %v6381_v55 = vcombine.high %v576_v47, %v580_v48  ;;  %v47_v37 = vld [vmem:[%s9293_s1 + $0x78] sm:$0xff] }
  0xfa   :  { %v6383_v56 = vcombine.high %v577_v49, %v581_v50  ;;  %v6382_v2 = vcombine.low %v577_v49, %v581_v50 }
  0xfc   :  { %3754 = vmatpush1.bf16.msra.mxu0 %v6324_v58  ;;  %3959 = vmatpush1.bf16.msra.mxu1 %v6326_v59  ;;  %v588_v58 = vld [vmem:[%s9293_s1 + $0x1160] sm:$0xff]  ;;  %v585_v59 = vld [vmem:[%s9293_s1 + $0x1148] sm:$0xff] }
  0xfd   :  { %3755 = vmatprep.subr.bf16.mxu0 %v6333_v61  ;;  %3960 = vmatprep.subr.bf16.mxu1 %v6335_v63  ;;  %v589_v61 = vld [vmem:[%s9293_s1 + $0x1168] sm:$0xff]  ;;  %v6380_v63 = vcombine.low %v576_v47, %v580_v48  ;;  %v6389_v3 = vcombine.high %v584_v57, %v588_v58 }
  0xfe   :  { %v6391_v4 = vcombine.high %v585_v59, %v589_v61  ;;  %v6390_v11 = vcombine.low %v585_v59, %v589_v61 }
 0x100   :  { %3756 = vmatpush1.bf16.msra.mxu0 %v6332_v6  ;;  %3961 = vmatpush1.bf16.msra.mxu1 %v6334_v7  ;;  %v596_v6 = vld [vmem:[%s9293_s1 + $0x11a0] sm:$0xff]  ;;  %v593_v7 = vld [vmem:[%s9293_s1 + $0x1188] sm:$0xff] }
 0x101   :  { %3757 = vmatprep.subr.bf16.mxu0 %v6341_v8  ;;  %3962 = vmatprep.subr.bf16.mxu1 %v6343_v9  ;;  %v597_v8 = vld [vmem:[%s9293_s1 + $0x11a8] sm:$0xff]  ;;  %v6388_v9 = vcombine.low %v584_v57, %v588_v58  ;;  %v6397_v12 = vcombine.high %v592_v5, %v596_v6 }
 0x102   :  { %v6399_v13 = vcombine.high %v593_v7, %v597_v8  ;;  %v6398_v19 = vcombine.low %v593_v7, %v597_v8  ;;  %v74_v8 = vld [vmem:[%s9293_s1 + $0x150] sm:$0xff] }
 0x104   :  { %3758 = vmatpush1.bf16.msra.mxu0 %v6340_v15  ;;  %3963 = vmatpush1.bf16.msra.mxu1 %v6342_v16  ;;  %v604_v15 = vld [vmem:[%s9293_s1 + $0x11e0] sm:$0xff]  ;;  %v601_v16 = vld [vmem:[%s9293_s1 + $0x11c8] sm:$0xff] }
 0x105   :  { %3768 = vmatprep.subr.bf16.mxu0 %v6349_v17  ;;  %3973 = vmatprep.subr.bf16.mxu1 %v6351_v18  ;;  %v605_v17 = vld [vmem:[%s9293_s1 + $0x11e8] sm:$0xff]  ;;  %v6396_v18 = vcombine.low %v592_v5, %v596_v6  ;;  %v6405_v20 = vcombine.high %v600_v14, %v604_v15 }
 0x106   :  { %v6407_v22 = vcombine.high %v601_v16, %v605_v17  ;;  %v6406_v60 = vcombine.low %v601_v16, %v605_v17  ;;  %v82_v17 = vld [vmem:[%s9293_s1 + $0x190] sm:$0xff] }
 0x107   :  { %3760 = vmatmul.mubr.bf16.vlgmr.msra.gmra.mrb[0].mxu0 %v7847_v21  ;;  %3965 = vmatmul.mubr.bf16.vlgmr.msra.gmra.mrb[0].mxu1 %v7847_v21 }
 0x108   :  { %3769 = vmatpush1.bf16.msra.mxu0 %v6348_v25  ;;  %3974 = vmatpush1.bf16.msra.mxu1 %v6350_v26  ;;  %v38_v25 = vld [vmem:[%s9293_s1 + $0x30] sm:$0xff]  ;;  %v35_v26 = vld [vmem:[%s9293_s1 + $0x18] sm:$0xff] }
 0x109   :  { %3770 = vmatprep.subr.bf16.mxu0 %v6357_v27  ;;  %3975 = vmatprep.subr.bf16.mxu1 %v6359_v28  ;;  %v39_v27 = vld [vmem:[%s9293_s1 + $0x38] sm:$0xff]  ;;  %v6404_v28 = vcombine.low %v600_v14, %v604_v15  ;;  %v5841_v30 = vcombine.high %v34_v23, %v38_v25  ;;  %v5840_v38 = vcombine.low %v34_v23, %v38_v25 }
 0x10a   :  { %3800 = vmatprep.mubr.bf16.mxu0 %v6950_v62  ;;  %4005 = vmatprep.mubr.bf16.mxu1 %v6950_v62  ;;  %v5843_v31 = vcombine.high %v35_v26, %v39_v27  ;;  %v5842_v39 = vcombine.low %v35_v26, %v39_v27  ;;  %v90_v27 = vld [vmem:[%s9293_s1 + $0x1d0] sm:$0xff] }
 0x10c   :  { %3771 = vmatpush1.bf16.msra.mxu0 %v6356_v32  ;;  %3976 = vmatpush1.bf16.msra.mxu1 %v6358_v33  ;;  %v42_v32 = vld [vmem:[%s9293_s1 + $0x50] sm:$0xff] }
 0x10d   :  { %3772 = vmatprep.subr.bf16.mxu0 %v6365_v35  ;;  %3977 = vmatprep.subr.bf16.mxu1 %v6367_v36  ;;  %v46_v33 = vld [vmem:[%s9293_s1 + $0x70] sm:$0xff]  ;;  %v7953_v35 = vrot.slane %v5835_v29, %v7076_v54  ;;  %v43_v36 = vld [vmem:[%s9293_s1 + $0x58] sm:$0xff] }
 0x10e   :  { %v5849_v40 = vcombine.high %v42_v32, %v46_v33  ;;  %v50_v54 = vld [vmem:[%s9293_s1 + $0x90] sm:$0xff]  ;;  %v5848_v47 = vcombine.low %v42_v32, %v46_v33  ;;  %v5850_v48 = vcombine.low %v43_v36, %v47_v37  ;;  %v91_v29 = vld [vmem:[%s9293_s1 + $0x1d8] sm:$0xff] }
 0x110   :  { %3773 = vmatpush1.bf16.msra.mxu0 %v6364_v42  ;;  %3978 = vmatpush1.bf16.msra.mxu1 %v6366_v43  ;;  %v5851_v42 = vcombine.high %v43_v36, %v47_v37  ;;  %v54_v43 = vld [vmem:[%s9293_s1 + $0xb0] sm:$0xff] }
 0x111   :  { %3774 = vmatprep.subr.bf16.mxu0 %v6373_v45  ;;  %3979 = vmatprep.subr.bf16.mxu1 %v6375_v46  ;;  %v51_v45 = vld [vmem:[%s9293_s1 + $0x98] sm:$0xff]  ;;  %v5857_v49 = vcombine.high %v50_v54, %v54_v43  ;;  %v5856_v57 = vcombine.low %v50_v54, %v54_v43  ;;  %v98_v36 = vld [vmem:[%s9293_s1 + $0x210] sm:$0xff] }
 0x112   :  { %v55_v46 = vld [vmem:[%s9293_s1 + $0xb8] sm:$0xff]  ;;  %v102_v37 = vld [vmem:[%s9293_s1 + $0x230] sm:$0xff] }
 0x113   :  { %v5859_v50 = vcombine.high %v51_v45, %v55_v46  ;;  %v5858_v58 = vcombine.low %v51_v45, %v55_v46  ;;  %v5905_v54 = vcombine.high %v98_v36, %v102_v37  ;;  %v106_v45 = vld [vmem:[%s9293_s1 + $0x250] sm:$0xff] }
 0x114   :  { %3775 = vmatpush1.bf16.msra.mxu0 %v6372_v52  ;;  %3980 = vmatpush1.bf16.msra.mxu1 %v6374_v53  ;;  %v58_v52 = vld [vmem:[%s9293_s1 + $0xd0] sm:$0xff] }
 0x115   :  { %3776 = vmatprep.subr.bf16.mxu0 %v6381_v55  ;;  %3981 = vmatprep.subr.bf16.mxu1 %v6383_v56  ;;  %v62_v53 = vld [vmem:[%s9293_s1 + $0xf0] sm:$0xff]  ;;  %v59_v55 = vld [vmem:[%s9293_s1 + $0xd8] sm:$0xff] }
 0x116   :  { %v63_v56 = vld [vmem:[%s9293_s1 + $0xf8] sm:$0xff]  ;;  %v5865_v59 = vcombine.high %v58_v52, %v62_v53  ;;  %v110_v46 = vld [vmem:[%s9293_s1 + $0x270] sm:$0xff] }
 0x117   :  { %v5867_v61 = vcombine.high %v59_v55, %v63_v56  ;;  %v5866_v5 = vcombine.low %v59_v55, %v63_v56  ;;  %v114_v55 = vld [vmem:[%s9293_s1 + $0x290] sm:$0xff] }
 0x118   :  { %3777 = vmatpush1.bf16.msra.mxu0 %v6380_v63  ;;  %3982 = vmatpush1.bf16.msra.mxu1 %v6382_v2  ;;  %v66_v63 = vld [vmem:[%s9293_s1 + $0x110] sm:$0xff] }
 0x119   :  { %3778 = vmatprep.subr.bf16.mxu0 %v6389_v3  ;;  %3983 = vmatprep.subr.bf16.mxu1 %v6391_v4  ;;  %v70_v2 = vld [vmem:[%s9293_s1 + $0x130] sm:$0xff]  ;;  %v71_v3 = vld [vmem:[%s9293_s1 + $0x138] sm:$0xff]  ;;  %v5864_v4 = vcombine.low %v58_v52, %v62_v53  ;;  %v5913_v52 = vcombine.high %v106_v45, %v110_v46 }
 0x11a   :  { %v5873_v6 = vcombine.high %v66_v63, %v70_v2  ;;  %v118_v56 = vld [vmem:[%s9293_s1 + $0x2b0] sm:$0xff] }
 0x11c   :  { %3779 = vmatpush1.bf16.msra.mxu0 %v6388_v9  ;;  %3984 = vmatpush1.bf16.msra.mxu1 %v6390_v11  ;;  %v78_v9 = vld [vmem:[%s9293_s1 + $0x170] sm:$0xff]  ;;  %v75_v11 = vld [vmem:[%s9293_s1 + $0x158] sm:$0xff] }
 0x11d   :  { %3780 = vmatprep.subr.bf16.mxu0 %v6397_v12  ;;  %3985 = vmatprep.subr.bf16.mxu1 %v6399_v13  ;;  %v79_v12 = vld [vmem:[%s9293_s1 + $0x178] sm:$0xff]  ;;  %v5872_v13 = vcombine.low %v66_v63, %v70_v2  ;;  %v5881_v15 = vcombine.high %v74_v8, %v78_v9  ;;  %v5921_v63 = vcombine.high %v114_v55, %v118_v56 }
 0x11e   :  { %v5883_v16 = vcombine.high %v75_v11, %v79_v12  ;;  %v5882_v23 = vcombine.low %v75_v11, %v79_v12  ;;  %v130_v11 = vld [vmem:[%s9293_s1 + $0x310] sm:$0xff] }
 0x11f   :  { %v134_v12 = vld [vmem:[%s9293_s1 + $0x330] sm:$0xff] }
 0x120   :  { %3781 = vmatpush1.bf16.msra.mxu0 %v6396_v18  ;;  %3986 = vmatpush1.bf16.msra.mxu1 %v6398_v19  ;;  %v86_v18 = vld [vmem:[%s9293_s1 + $0x1b0] sm:$0xff]  ;;  %v83_v19 = vld [vmem:[%s9293_s1 + $0x198] sm:$0xff] }
 0x121   :  { %3782 = vmatprep.subr.bf16.mxu0 %v6405_v20  ;;  %3987 = vmatprep.subr.bf16.mxu1 %v6407_v22  ;;  %v87_v20 = vld [vmem:[%s9293_s1 + $0x1b8] sm:$0xff]  ;;  %v5880_v22 = vcombine.low %v74_v8, %v78_v9  ;;  %v5889_v25 = vcombine.high %v82_v17, %v86_v18 }
 0x122   :  { %v5891_v26 = vcombine.high %v83_v19, %v87_v20 }
 0x124   :  { %3783 = vmatpush1.bf16.msra.mxu0 %v6404_v28  ;;  %3988 = vmatpush1.bf16.msra.mxu1 %v6406_v60  ;;  %v94_v28 = vld [vmem:[%s9293_s1 + $0x1f0] sm:$0xff]  ;;  %v95_v60 = vld [vmem:[%s9293_s1 + $0x1f8] sm:$0xff] }
 0x125   :  { %4014 = vmatprep.subr.bf16.mxu0 %v5841_v30  ;;  %4219 = vmatprep.subr.bf16.mxu1 %v5843_v31  ;;  %v5888_v30 = vcombine.low %v82_v17, %v86_v18  ;;  %v5890_v31 = vcombine.low %v83_v19, %v87_v20  ;;  %v5897_v32 = vcombine.high %v90_v27, %v94_v28  ;;  %v138_v19 = vld [vmem:[%s9293_s1 + $0x350] sm:$0xff] }
 0x126   :  { %v5899_v33 = vcombine.high %v91_v29, %v95_v60  ;;  %v5937_v17 = vcombine.high %v130_v11, %v134_v12  ;;  %v142_v20 = vld [vmem:[%s9293_s1 + $0x370] sm:$0xff] }
 0x127   :  { %3801 = vmatmul.mubr.bf16.vlgmr.msra.gmra.mrb[0].mxu0 %v7953_v35  ;;  %4006 = vmatmul.mubr.bf16.vlgmr.msra.gmra.mrb[0].mxu1 %v7953_v35 }
 0x128   :  { %4015 = vmatpush1.bf16.msra.mxu0 %v5840_v38  ;;  %4220 = vmatpush1.bf16.msra.mxu1 %v5842_v39  ;;  %v99_v38 = vld [vmem:[%s9293_s1 + $0x218] sm:$0xff] }
 0x129   :  { %4016 = vmatprep.subr.bf16.mxu0 %v5849_v40  ;;  %4221 = vmatprep.subr.bf16.mxu1 %v5851_v42  ;;  %v103_v39 = vld [vmem:[%s9293_s1 + $0x238] sm:$0xff]  ;;  %v5896_v40 = vcombine.low %v90_v27, %v94_v28  ;;  %v5898_v42 = vcombine.low %v91_v29, %v95_v60  ;;  %v5945_v27 = vcombine.high %v138_v19, %v142_v20  ;;  %v146_v29 = vld [vmem:[%s9293_s1 + $0x390] sm:$0xff] }
 0x12a   :  { %4046 = vmatprep.mubr.bf16.mxu0 %v7114_v10  ;;  %4251 = vmatprep.mubr.bf16.mxu1 %v7114_v10  ;;  %v67_v10 = vld [vmem:[%s9293_s1 + $0x118] sm:$0xff]  ;;  %v5907_v43 = vcombine.high %v99_v38, %v103_v39  ;;  %v150_v60 = vld [vmem:[%s9293_s1 + $0x3b0] sm:$0xff] }
 0x12b   :  { %v5875_v7 = vcombine.high %v67_v10, %v71_v3  ;;  %v5874_v14 = vcombine.low %v67_v10, %v71_v3  ;;  %v122_v10 = vld [vmem:[%s9293_s1 + $0x2d0] sm:$0xff] }
 0x12c   :  { %4017 = vmatpush1.bf16.msra.mxu0 %v5848_v47  ;;  %4222 = vmatpush1.bf16.msra.mxu1 %v5850_v48  ;;  %v107_v47 = vld [vmem:[%s9293_s1 + $0x258] sm:$0xff]  ;;  %v126_v3 = vld [vmem:[%s9293_s1 + $0x2f0] sm:$0xff] }
 0x12d   :  { %4018 = vmatprep.subr.bf16.mxu0 %v5857_v49  ;;  %4223 = vmatprep.subr.bf16.mxu1 %v5859_v50  ;;  %v111_v48 = vld [vmem:[%s9293_s1 + $0x278] sm:$0xff]  ;;  %v5904_v49 = vcombine.low %v98_v36, %v102_v37  ;;  %v5906_v50 = vcombine.low %v99_v38, %v103_v39  ;;  %v5929_v8 = vcombine.high %v122_v10, %v126_v3  ;;  %v154_v38 = vld [vmem:[%s9293_s1 + $0x3d0] sm:$0xff] }
 0x12e   :  { %v5915_v53 = vcombine.high %v107_v47, %v111_v48  ;;  %v5953_v36 = vcombine.high %v146_v29, %v150_v60  ;;  %v158_v39 = vld [vmem:[%s9293_s1 + $0x3f0] sm:$0xff] }
 0x130   :  { %4019 = vmatpush1.bf16.msra.mxu0 %v5856_v57  ;;  %4224 = vmatpush1.bf16.msra.mxu1 %v5858_v58  ;;  %v115_v57 = vld [vmem:[%s9293_s1 + $0x298] sm:$0xff] }
 0x131   :  { %4020 = vmatprep.subr.bf16.mxu0 %v5865_v59  ;;  %4225 = vmatprep.subr.bf16.mxu1 %v5867_v61  ;;  %v119_v58 = vld [vmem:[%s9293_s1 + $0x2b8] sm:$0xff]  ;;  %v5912_v59 = vcombine.low %v106_v45, %v110_v46  ;;  %v5914_v61 = vcombine.low %v107_v47, %v111_v48  ;;  %v5961_v45 = vcombine.high %v154_v38, %v158_v39  ;;  %v162_v47 = vld [vmem:[%s9293_s1 + $0x410] sm:$0xff] }
 0x132   :  { %v5923_v2 = vcombine.high %v115_v57, %v119_v58  ;;  %v166_v48 = vld [vmem:[%s9293_s1 + $0x430] sm:$0xff] }
 0x134   :  { %4021 = vmatpush1.bf16.msra.mxu0 %v5864_v4  ;;  %4226 = vmatpush1.bf16.msra.mxu1 %v5866_v5  ;;  %v123_v4 = vld [vmem:[%s9293_s1 + $0x2d8] sm:$0xff] }
 0x135   :  { %4022 = vmatprep.subr.bf16.mxu0 %v5873_v6  ;;  %4227 = vmatprep.subr.bf16.mxu1 %v5875_v7  ;;  %v127_v5 = vld [vmem:[%s9293_s1 + $0x2f8] sm:$0xff]  ;;  %v5920_v6 = vcombine.low %v114_v55, %v118_v56  ;;  %v5922_v7 = vcombine.low %v115_v57, %v119_v58  ;;  %v5969_v55 = vcombine.high %v162_v47, %v166_v48  ;;  %v170_v57 = vld [vmem:[%s9293_s1 + $0x450] sm:$0xff] }
 0x136   :  { %v5931_v9 = vcombine.high %v123_v4, %v127_v5  ;;  %v174_v58 = vld [vmem:[%s9293_s1 + $0x470] sm:$0xff] }
 0x138   :  { %4023 = vmatpush1.bf16.msra.mxu0 %v5872_v13  ;;  %4228 = vmatpush1.bf16.msra.mxu1 %v5874_v14  ;;  %v131_v13 = vld [vmem:[%s9293_s1 + $0x318] sm:$0xff] }
 0x139   :  { %4024 = vmatprep.subr.bf16.mxu0 %v5881_v15  ;;  %4229 = vmatprep.subr.bf16.mxu1 %v5883_v16  ;;  %v135_v14 = vld [vmem:[%s9293_s1 + $0x338] sm:$0xff]  ;;  %v5928_v15 = vcombine.low %v122_v10, %v126_v3  ;;  %v5930_v16 = vcombine.low %v123_v4, %v127_v5  ;;  %v5977_v10 = vcombine.high %v170_v57, %v174_v58  ;;  %v178_v4 = vld [vmem:[%s9293_s1 + $0x490] sm:$0xff] }
 0x13a   :  { %v5939_v18 = vcombine.high %v131_v13, %v135_v14  ;;  %v182_v5 = vld [vmem:[%s9293_s1 + $0x4b0] sm:$0xff] }
 0x13c   :  { %4025 = vmatpush1.bf16.msra.mxu0 %v5880_v22  ;;  %4230 = vmatpush1.bf16.msra.mxu1 %v5882_v23  ;;  %v139_v22 = vld [vmem:[%s9293_s1 + $0x358] sm:$0xff] }
 0x13d   :  { %4026 = vmatprep.subr.bf16.mxu0 %v5889_v25  ;;  %4231 = vmatprep.subr.bf16.mxu1 %v5891_v26  ;;  %v143_v23 = vld [vmem:[%s9293_s1 + $0x378] sm:$0xff]  ;;  %v5936_v25 = vcombine.low %v130_v11, %v134_v12  ;;  %v5938_v26 = vcombine.low %v131_v13, %v135_v14  ;;  %v5985_v11 = vcombine.high %v178_v4, %v182_v5  ;;  %v186_v13 = vld [vmem:[%s9293_s1 + $0x4d0] sm:$0xff] }
 0x13e   :  { %v5947_v28 = vcombine.high %v139_v22, %v143_v23  ;;  %v190_v14 = vld [vmem:[%s9293_s1 + $0x4f0] sm:$0xff] }
 0x140   :  { %4027 = vmatpush1.bf16.msra.mxu0 %v5888_v30  ;;  %4232 = vmatpush1.bf16.msra.mxu1 %v5890_v31  ;;  %v147_v30 = vld [vmem:[%s9293_s1 + $0x398] sm:$0xff] }
 0x141   :  { %4028 = vmatprep.subr.bf16.mxu0 %v5897_v32  ;;  %4233 = vmatprep.subr.bf16.mxu1 %v5899_v33  ;;  %v151_v31 = vld [vmem:[%s9293_s1 + $0x3b8] sm:$0xff]  ;;  %v5944_v32 = vcombine.low %v138_v19, %v142_v20  ;;  %v5946_v33 = vcombine.low %v139_v22, %v143_v23  ;;  %v194_v20 = vld [vmem:[%s9293_s1 + $0x510] sm:$0xff] }
 0x142   :  { %v5955_v37 = vcombine.high %v147_v30, %v151_v31  ;;  %v198_v22 = vld [vmem:[%s9293_s1 + $0x530] sm:$0xff]  ;;  %v199_v23 = vld [vmem:[%s9293_s1 + $0x538] sm:$0xff] }
 0x144   :  { %4029 = vmatpush1.bf16.msra.mxu0 %v5896_v40  ;;  %4234 = vmatpush1.bf16.msra.mxu1 %v5898_v42  ;;  %v155_v40 = vld [vmem:[%s9293_s1 + $0x3d8] sm:$0xff] }
 0x145   :  { %4030 = vmatprep.subr.bf16.mxu0 %v5905_v54  ;;  %4235 = vmatprep.subr.bf16.mxu1 %v5907_v43  ;;  %v159_v42 = vld [vmem:[%s9293_s1 + $0x3f8] sm:$0xff]  ;;  %v5952_v54 = vcombine.low %v146_v29, %v150_v60  ;;  %v5954_v43 = vcombine.low %v147_v30, %v151_v31  ;;  %v202_v29 = vld [vmem:[%s9293_s1 + $0x550] sm:$0xff] }
 0x146   :  { %v5963_v46 = vcombine.high %v155_v40, %v159_v42  ;;  %v206_v60 = vld [vmem:[%s9293_s1 + $0x570] sm:$0xff]  ;;  %v203_v30 = vld [vmem:[%s9293_s1 + $0x558] sm:$0xff] }
 0x147   :  { %v207_v31 = vld [vmem:[%s9293_s1 + $0x578] sm:$0xff] }
 0x148   :  { %4031 = vmatpush1.bf16.msra.mxu0 %v5904_v49  ;;  %4236 = vmatpush1.bf16.msra.mxu1 %v5906_v50  ;;  %v163_v49 = vld [vmem:[%s9293_s1 + $0x418] sm:$0xff] }
 0x149   :  { %4032 = vmatprep.subr.bf16.mxu0 %v5913_v52  ;;  %4237 = vmatprep.subr.bf16.mxu1 %v5915_v53  ;;  %v167_v50 = vld [vmem:[%s9293_s1 + $0x438] sm:$0xff]  ;;  %v5960_v52 = vcombine.low %v154_v38, %v158_v39  ;;  %v5962_v53 = vcombine.low %v155_v40, %v159_v42  ;;  %v210_v38 = vld [vmem:[%s9293_s1 + $0x590] sm:$0xff] }
 0x14a   :  { %v5971_v56 = vcombine.high %v163_v49, %v167_v50  ;;  %v214_v39 = vld [vmem:[%s9293_s1 + $0x5b0] sm:$0xff]  ;;  %v211_v40 = vld [vmem:[%s9293_s1 + $0x598] sm:$0xff] }
 0x14b   :  { %v215_v42 = vld [vmem:[%s9293_s1 + $0x5b8] sm:$0xff] }
 0x14c   :  { %4033 = vmatpush1.bf16.msra.mxu0 %v5912_v59  ;;  %4238 = vmatpush1.bf16.msra.mxu1 %v5914_v61  ;;  %v171_v59 = vld [vmem:[%s9293_s1 + $0x458] sm:$0xff] }
 0x14d   :  { %4034 = vmatprep.subr.bf16.mxu0 %v5921_v63  ;;  %4239 = vmatprep.subr.bf16.mxu1 %v5923_v2  ;;  %v175_v61 = vld [vmem:[%s9293_s1 + $0x478] sm:$0xff]  ;;  %v5968_v63 = vcombine.low %v162_v47, %v166_v48  ;;  %v5970_v2 = vcombine.low %v163_v49, %v167_v50  ;;  %v218_v47 = vld [vmem:[%s9293_s1 + $0x5d0] sm:$0xff] }
 0x14e   :  { %v5979_v3 = vcombine.high %v171_v59, %v175_v61  ;;  %v222_v48 = vld [vmem:[%s9293_s1 + $0x5f0] sm:$0xff]  ;;  %v219_v49 = vld [vmem:[%s9293_s1 + $0x5d8] sm:$0xff] }
 0x14f   :  { %v223_v50 = vld [vmem:[%s9293_s1 + $0x5f8] sm:$0xff] }
 0x150   :  { %4035 = vmatpush1.bf16.msra.mxu0 %v5920_v6  ;;  %4240 = vmatpush1.bf16.msra.mxu1 %v5922_v7  ;;  %v179_v6 = vld [vmem:[%s9293_s1 + $0x498] sm:$0xff] }
 0x151   :  { %4036 = vmatprep.subr.bf16.mxu0 %v5929_v8  ;;  %4241 = vmatprep.subr.bf16.mxu1 %v5931_v9  ;;  %v183_v7 = vld [vmem:[%s9293_s1 + $0x4b8] sm:$0xff]  ;;  %v5976_v8 = vcombine.low %v170_v57, %v174_v58  ;;  %v5978_v9 = vcombine.low %v171_v59, %v175_v61  ;;  %v226_v57 = vld [vmem:[%s9293_s1 + $0x610] sm:$0xff] }
 0x152   :  { %v5987_v12 = vcombine.high %v179_v6, %v183_v7  ;;  %v230_v58 = vld [vmem:[%s9293_s1 + $0x630] sm:$0xff]  ;;  %v227_v59 = vld [vmem:[%s9293_s1 + $0x618] sm:$0xff] }
 0x153   :  { %v231_v61 = vld [vmem:[%s9293_s1 + $0x638] sm:$0xff] }
 0x154   :  { %4037 = vmatpush1.bf16.msra.mxu0 %v5928_v15  ;;  %4242 = vmatpush1.bf16.msra.mxu1 %v5930_v16  ;;  %v191_v15 = vld [vmem:[%s9293_s1 + $0x4f8] sm:$0xff]  ;;  %v5984_v16 = vcombine.low %v178_v4, %v182_v5  ;;  %v234_v4 = vld [vmem:[%s9293_s1 + $0x650] sm:$0xff] }
 0x155   :  { %4038 = vmatprep.subr.bf16.mxu0 %v5937_v17  ;;  %4243 = vmatprep.subr.bf16.mxu1 %v5939_v18  ;;  %v5986_v17 = vcombine.low %v179_v6, %v183_v7  ;;  %v5993_v18 = vcombine.high %v186_v13, %v190_v14  ;;  %v238_v5 = vld [vmem:[%s9293_s1 + $0x670] sm:$0xff]  ;;  %v235_v6 = vld [vmem:[%s9293_s1 + $0x658] sm:$0xff] }
 0x156   :  { %v239_v7 = vld [vmem:[%s9293_s1 + $0x678] sm:$0xff] }
 0x158   :  { %4039 = vmatpush1.bf16.msra.mxu0 %v5936_v25  ;;  %4244 = vmatpush1.bf16.msra.mxu1 %v5938_v26  ;;  %v5992_v25 = vcombine.low %v186_v13, %v190_v14  ;;  %v242_v13 = vld [vmem:[%s9293_s1 + $0x690] sm:$0xff] }
 0x159   :  { %4040 = vmatprep.subr.bf16.mxu0 %v5945_v27  ;;  %4245 = vmatprep.subr.bf16.mxu1 %v5947_v28  ;;  %v6001_v27 = vcombine.high %v194_v20, %v198_v22  ;;  %v246_v14 = vld [vmem:[%s9293_s1 + $0x6b0] sm:$0xff] }
 0x15c   :  { %4041 = vmatpush1.bf16.msra.mxu0 %v5944_v32  ;;  %4246 = vmatpush1.bf16.msra.mxu1 %v5946_v33  ;;  %v6000_v32 = vcombine.low %v194_v20, %v198_v22  ;;  %v250_v20 = vld [vmem:[%s9293_s1 + $0x6d0] sm:$0xff] }
 0x15d   :  { %4042 = vmatprep.subr.bf16.mxu0 %v5953_v36  ;;  %4247 = vmatprep.subr.bf16.mxu1 %v5955_v37  ;;  %v6009_v36 = vcombine.high %v202_v29, %v206_v60  ;;  %v6011_v37 = vcombine.high %v203_v30, %v207_v31  ;;  %v254_v22 = vld [vmem:[%s9293_s1 + $0x6f0] sm:$0xff] }
 0x160   :  { %4043 = vmatpush1.bf16.msra.mxu0 %v5952_v54  ;;  %4248 = vmatpush1.bf16.msra.mxu1 %v5954_v43  ;;  %v6008_v54 = vcombine.low %v202_v29, %v206_v60  ;;  %v6010_v43 = vcombine.low %v203_v30, %v207_v31  ;;  %v258_v29 = vld [vmem:[%s9293_s1 + $0x710] sm:$0xff]  ;;  %v259_v30 = vld [vmem:[%s9293_s1 + $0x718] sm:$0xff] }
 0x161   :  { %4044 = vmatprep.subr.bf16.mxu0 %v5961_v45  ;;  %4249 = vmatprep.subr.bf16.mxu1 %v5963_v46  ;;  %v6017_v45 = vcombine.high %v210_v38, %v214_v39  ;;  %v6019_v46 = vcombine.high %v211_v40, %v215_v42  ;;  %v262_v60 = vld [vmem:[%s9293_s1 + $0x730] sm:$0xff]  ;;  %v263_v31 = vld [vmem:[%s9293_s1 + $0x738] sm:$0xff] }
 0x164   :  { %4045 = vmatpush1.bf16.msra.mxu0 %v5960_v52  ;;  %4250 = vmatpush1.bf16.msra.mxu1 %v5962_v53  ;;  %v6016_v52 = vcombine.low %v210_v38, %v214_v39  ;;  %v6018_v53 = vcombine.low %v211_v40, %v215_v42  ;;  %v266_v38 = vld [vmem:[%s9293_s1 + $0x750] sm:$0xff]  ;;  %v267_v40 = vld [vmem:[%s9293_s1 + $0x758] sm:$0xff] }
 0x165   :  { %4055 = vmatprep.subr.bf16.mxu0 %v5969_v55  ;;  %4260 = vmatprep.subr.bf16.mxu1 %v5971_v56  ;;  %v6025_v55 = vcombine.high %v218_v47, %v222_v48  ;;  %v6027_v56 = vcombine.high %v219_v49, %v223_v50  ;;  %v270_v39 = vld [vmem:[%s9293_s1 + $0x770] sm:$0xff]  ;;  %v271_v42 = vld [vmem:[%s9293_s1 + $0x778] sm:$0xff] }
 0x167   :  { %4047 = vmatmul.mubr.bf16.vlgmr.msra.gmra.mrb[4].mxu0 %v7228_v24  ;;  %4252 = vmatmul.mubr.bf16.vlgmr.msra.gmra.mrb[4].mxu1 %v7228_v24  ;;  %v187_v24 = vld [vmem:[%s9293_s1 + $0x4d8] sm:$0xff] }
 0x168   :  { %4056 = vmatpush1.bf16.msra.mxu0 %v5968_v63  ;;  %4261 = vmatpush1.bf16.msra.mxu1 %v5970_v2  ;;  %v5995_v19 = vcombine.high %v187_v24, %v191_v15  ;;  %v5994_v26 = vcombine.low %v187_v24, %v191_v15  ;;  %v6024_v63 = vcombine.low %v218_v47, %v222_v48  ;;  %v243_v24 = vld [vmem:[%s9293_s1 + $0x698] sm:$0xff]  ;;  %v274_v47 = vld [vmem:[%s9293_s1 + $0x790] sm:$0xff] }
 0x169   :  { %4057 = vmatprep.subr.bf16.mxu0 %v5977_v10  ;;  %4262 = vmatprep.subr.bf16.mxu1 %v5979_v3  ;;  %v6026_v2 = vcombine.low %v219_v49, %v223_v50  ;;  %v6033_v10 = vcombine.high %v226_v57, %v230_v58  ;;  %v6035_v3 = vcombine.high %v227_v59, %v231_v61  ;;  %v247_v15 = vld [vmem:[%s9293_s1 + $0x6b8] sm:$0xff]  ;;  %v278_v48 = vld [vmem:[%s9293_s1 + $0x7b0] sm:$0xff] }
 0x16a   :  { %4087 = vmatprep.mubr.bf16.mxu0 %v7250_v34  ;;  %4292 = vmatprep.mubr.bf16.mxu1 %v7250_v34  ;;  %v195_v34 = vld [vmem:[%s9293_s1 + $0x518] sm:$0xff] }
 0x16b   :  { %v6003_v28 = vcombine.high %v195_v34, %v199_v23  ;;  %v6002_v33 = vcombine.low %v195_v34, %v199_v23  ;;  %v251_v34 = vld [vmem:[%s9293_s1 + $0x6d8] sm:$0xff] }
 0x16c   :  { %4058 = vmatpush1.bf16.msra.mxu0 %v5976_v8  ;;  %4263 = vmatpush1.bf16.msra.mxu1 %v5978_v9  ;;  %v6032_v8 = vcombine.low %v226_v57, %v230_v58  ;;  %v6034_v9 = vcombine.low %v227_v59, %v231_v61  ;;  %v255_v23 = vld [vmem:[%s9293_s1 + $0x6f8] sm:$0xff]  ;;  %v282_v57 = vld [vmem:[%s9293_s1 + $0x7d0] sm:$0xff] }
 0x16d   :  { %4059 = vmatprep.subr.bf16.mxu0 %v5985_v11  ;;  %4264 = vmatprep.subr.bf16.mxu1 %v5987_v12  ;;  %v6041_v11 = vcombine.high %v234_v4, %v238_v5  ;;  %v6043_v12 = vcombine.high %v235_v6, %v239_v7  ;;  %v275_v49 = vld [vmem:[%s9293_s1 + $0x798] sm:$0xff]  ;;  %v286_v58 = vld [vmem:[%s9293_s1 + $0x7f0] sm:$0xff] }
 0x16e   :  { %v279_v50 = vld [vmem:[%s9293_s1 + $0x7b8] sm:$0xff] }
 0x16f   :  { %v283_v59 = vld [vmem:[%s9293_s1 + $0x7d8] sm:$0xff] }
 0x170   :  { %4060 = vmatpush1.bf16.msra.mxu0 %v5984_v16  ;;  %4265 = vmatpush1.bf16.msra.mxu1 %v5986_v17  ;;  %v6040_v16 = vcombine.low %v234_v4, %v238_v5  ;;  %v6042_v17 = vcombine.low %v235_v6, %v239_v7  ;;  %v287_v61 = vld [vmem:[%s9293_s1 + $0x7f8] sm:$0xff]  ;;  %v290_v4 = vld [vmem:[%s9293_s1 + $0x810] sm:$0xff] }
 0x171   :  { %4061 = vmatprep.subr.bf16.mxu0 %v5993_v18  ;;  %4266 = vmatprep.subr.bf16.mxu1 %v5995_v19  ;;  %v6049_v18 = vcombine.high %v242_v13, %v246_v14  ;;  %v6051_v19 = vcombine.high %v243_v24, %v247_v15  ;;  %v294_v5 = vld [vmem:[%s9293_s1 + $0x830] sm:$0xff]  ;;  %v291_v6 = vld [vmem:[%s9293_s1 + $0x818] sm:$0xff] }
 0x172   :  { %v295_v7 = vld [vmem:[%s9293_s1 + $0x838] sm:$0xff] }
 0x174   :  { %4062 = vmatpush1.bf16.msra.mxu0 %v5992_v25  ;;  %4267 = vmatpush1.bf16.msra.mxu1 %v5994_v26  ;;  %v6048_v25 = vcombine.low %v242_v13, %v246_v14  ;;  %v6050_v26 = vcombine.low %v243_v24, %v247_v15  ;;  %v298_v13 = vld [vmem:[%s9293_s1 + $0x850] sm:$0xff]  ;;  %v299_v24 = vld [vmem:[%s9293_s1 + $0x858] sm:$0xff] }
 0x175   :  { %4063 = vmatprep.subr.bf16.mxu0 %v6001_v27  ;;  %4268 = vmatprep.subr.bf16.mxu1 %v6003_v28  ;;  %v6057_v27 = vcombine.high %v250_v20, %v254_v22  ;;  %v6059_v28 = vcombine.high %v251_v34, %v255_v23  ;;  %v302_v14 = vld [vmem:[%s9293_s1 + $0x870] sm:$0xff]  ;;  %v303_v15 = vld [vmem:[%s9293_s1 + $0x878] sm:$0xff] }
 0x178   :  { %4064 = vmatpush1.bf16.msra.mxu0 %v6000_v32  ;;  %4269 = vmatpush1.bf16.msra.mxu1 %v6002_v33  ;;  %v6056_v32 = vcombine.low %v250_v20, %v254_v22  ;;  %v6058_v33 = vcombine.low %v251_v34, %v255_v23  ;;  %v306_v20 = vld [vmem:[%s9293_s1 + $0x890] sm:$0xff]  ;;  %v307_v34 = vld [vmem:[%s9293_s1 + $0x898] sm:$0xff] }
 0x179   :  { %4065 = vmatprep.subr.bf16.mxu0 %v6009_v36  ;;  %4270 = vmatprep.subr.bf16.mxu1 %v6011_v37  ;;  %v6065_v36 = vcombine.high %v258_v29, %v262_v60  ;;  %v6067_v37 = vcombine.high %v259_v30, %v263_v31  ;;  %v310_v22 = vld [vmem:[%s9293_s1 + $0x8b0] sm:$0xff]  ;;  %v311_v23 = vld [vmem:[%s9293_s1 + $0x8b8] sm:$0xff] }
 0x17c   :  { %4066 = vmatpush1.bf16.msra.mxu0 %v6008_v54  ;;  %4271 = vmatpush1.bf16.msra.mxu1 %v6010_v43  ;;  %v6064_v54 = vcombine.low %v258_v29, %v262_v60  ;;  %v6066_v43 = vcombine.low %v259_v30, %v263_v31  ;;  %v314_v29 = vld [vmem:[%s9293_s1 + $0x8d0] sm:$0xff]  ;;  %v319_v30 = vld [vmem:[%s9293_s1 + $0x8f8] sm:$0xff]  ;;  %v6112_v31 = vcombine.low %v306_v20, %v310_v22 }
 0x17d   :  { %4067 = vmatprep.subr.bf16.mxu0 %v6017_v45  ;;  %4272 = vmatprep.subr.bf16.mxu1 %v6019_v46  ;;  %v6073_v45 = vcombine.high %v266_v38, %v270_v39  ;;  %v6075_v46 = vcombine.high %v267_v40, %v271_v42  ;;  %v318_v60 = vld [vmem:[%s9293_s1 + $0x8f0] sm:$0xff] }
 0x180   :  { %4068 = vmatpush1.bf16.msra.mxu0 %v6016_v52  ;;  %4273 = vmatpush1.bf16.msra.mxu1 %v6018_v53  ;;  %v6072_v52 = vcombine.low %v266_v38, %v270_v39  ;;  %v6074_v53 = vcombine.low %v267_v40, %v271_v42  ;;  %v326_v38 = vld [vmem:[%s9293_s1 + $0x930] sm:$0xff]  ;;  %v327_v39 = vld [vmem:[%s9293_s1 + $0x938] sm:$0xff]  ;;  %v6120_v40 = vcombine.low %v314_v29, %v318_v60 }
 0x181   :  { %4069 = vmatprep.subr.bf16.mxu0 %v6025_v55  ;;  %4274 = vmatprep.subr.bf16.mxu1 %v6027_v56  ;;  %v6081_v55 = vcombine.high %v274_v47, %v278_v48  ;;  %v6083_v56 = vcombine.high %v275_v49, %v279_v50 }
 0x184   :  { %4070 = vmatpush1.bf16.msra.mxu0 %v6024_v63  ;;  %4275 = vmatpush1.bf16.msra.mxu1 %v6026_v2  ;;  %v6080_v63 = vcombine.low %v274_v47, %v278_v48  ;;  %v6082_v2 = vcombine.low %v275_v49, %v279_v50  ;;  %v331_v47 = vld [vmem:[%s9293_s1 + $0x958] sm:$0xff] }
 0x185   :  { %4071 = vmatprep.subr.bf16.mxu0 %v6033_v10  ;;  %4276 = vmatprep.subr.bf16.mxu1 %v6035_v3  ;;  %v6089_v10 = vcombine.high %v282_v57, %v286_v58  ;;  %v6091_v3 = vcombine.high %v283_v59, %v287_v61  ;;  %v335_v48 = vld [vmem:[%s9293_s1 + $0x978] sm:$0xff] }
 0x188   :  { %4072 = vmatpush1.bf16.msra.mxu0 %v6032_v8  ;;  %4277 = vmatpush1.bf16.msra.mxu1 %v6034_v9  ;;  %v6088_v8 = vcombine.low %v282_v57, %v286_v58  ;;  %v6090_v9 = vcombine.low %v283_v59, %v287_v61  ;;  %v339_v57 = vld [vmem:[%s9293_s1 + $0x998] sm:$0xff]  ;;  %v6138_v61 = vcombine.low %v331_v47, %v335_v48 }
 0x189   :  { %4073 = vmatprep.subr.bf16.mxu0 %v6041_v11  ;;  %4278 = vmatprep.subr.bf16.mxu1 %v6043_v12  ;;  %v6097_v11 = vcombine.high %v290_v4, %v294_v5  ;;  %v6099_v12 = vcombine.high %v291_v6, %v295_v7  ;;  %v343_v58 = vld [vmem:[%s9293_s1 + $0x9b8] sm:$0xff] }
 0x18c   :  { %4074 = vmatpush1.bf16.msra.mxu0 %v6040_v16  ;;  %4279 = vmatpush1.bf16.msra.mxu1 %v6042_v17  ;;  %v6096_v16 = vcombine.low %v290_v4, %v294_v5  ;;  %v6098_v17 = vcombine.low %v291_v6, %v295_v7  ;;  %v347_v4 = vld [vmem:[%s9293_s1 + $0x9d8] sm:$0xff]  ;;  %v6146_v7 = vcombine.low %v339_v57, %v343_v58 }
 0x18d   :  { %4075 = vmatprep.subr.bf16.mxu0 %v6049_v18  ;;  %4280 = vmatprep.subr.bf16.mxu1 %v6051_v19  ;;  %v6105_v18 = vcombine.high %v298_v13, %v302_v14  ;;  %v6107_v19 = vcombine.high %v299_v24, %v303_v15  ;;  %v351_v5 = vld [vmem:[%s9293_s1 + $0x9f8] sm:$0xff] }
 0x190   :  { %4076 = vmatpush1.bf16.msra.mxu0 %v6048_v25  ;;  %4281 = vmatpush1.bf16.msra.mxu1 %v6050_v26  ;;  %v6104_v25 = vcombine.low %v298_v13, %v302_v14  ;;  %v6106_v26 = vcombine.low %v299_v24, %v303_v15  ;;  %v355_v13 = vld [vmem:[%s9293_s1 + $0xa18] sm:$0xff]  ;;  %v6154_v15 = vcombine.low %v347_v4, %v351_v5 }
 0x191   :  { %4077 = vmatprep.subr.bf16.mxu0 %v6057_v27  ;;  %4282 = vmatprep.subr.bf16.mxu1 %v6059_v28  ;;  %v6113_v27 = vcombine.high %v306_v20, %v310_v22  ;;  %v6115_v28 = vcombine.high %v307_v34, %v311_v23  ;;  %v359_v14 = vld [vmem:[%s9293_s1 + $0xa38] sm:$0xff] }
 0x192   :  { %v363_v20 = vld [vmem:[%s9293_s1 + $0xa58] sm:$0xff] }
 0x193   :  { %v367_v22 = vld [vmem:[%s9293_s1 + $0xa78] sm:$0xff] }
 0x194   :  { %4078 = vmatpush1.bf16.msra.mxu0 %v6056_v32  ;;  %4283 = vmatpush1.bf16.msra.mxu1 %v6058_v33  ;;  %v6114_v32 = vcombine.low %v307_v34, %v311_v23  ;;  %v6121_v33 = vcombine.high %v314_v29, %v318_v60  ;;  %v6162_v23 = vcombine.low %v355_v13, %v359_v14  ;;  %v371_v29 = vld [vmem:[%s9293_s1 + $0xa98] sm:$0xff] }
 0x195   :  { %4079 = vmatprep.subr.bf16.mxu0 %v6065_v36  ;;  %4284 = vmatprep.subr.bf16.mxu1 %v6067_v37  ;;  %v322_v37 = vld [vmem:[%s9293_s1 + $0x910] sm:$0xff]  ;;  %v375_v60 = vld [vmem:[%s9293_s1 + $0xab8] sm:$0xff] }
 0x196   :  { %v6128_v49 = vcombine.low %v322_v37, %v326_v38 }
 0x198   :  { %4080 = vmatpush1.bf16.msra.mxu0 %v6064_v54  ;;  %4285 = vmatpush1.bf16.msra.mxu1 %v6066_v43  ;;  %v6129_v54 = vcombine.high %v322_v37, %v326_v38  ;;  %v379_v37 = vld [vmem:[%s9293_s1 + $0xad8] sm:$0xff] }
 0x199   :  { %4081 = vmatprep.subr.bf16.mxu0 %v6073_v45  ;;  %4286 = vmatprep.subr.bf16.mxu1 %v6075_v46  ;;  %v330_v45 = vld [vmem:[%s9293_s1 + $0x950] sm:$0xff]  ;;  %v383_v38 = vld [vmem:[%s9293_s1 + $0xaf8] sm:$0xff] }
 0x19a   :  { %v334_v46 = vld [vmem:[%s9293_s1 + $0x970] sm:$0xff] }
 0x19b   :  { %v6136_v59 = vcombine.low %v330_v45, %v334_v46 }
 0x19c   :  { %4082 = vmatpush1.bf16.msra.mxu0 %v6072_v52  ;;  %4287 = vmatpush1.bf16.msra.mxu1 %v6074_v53  ;;  %v6137_v52 = vcombine.high %v330_v45, %v334_v46  ;;  %v6139_v53 = vcombine.high %v331_v47, %v335_v48  ;;  %v387_v45 = vld [vmem:[%s9293_s1 + $0xb18] sm:$0xff]  ;;  %v6186_v48 = vcombine.low %v379_v37, %v383_v38 }
 0x19d   :  { %4083 = vmatprep.subr.bf16.mxu0 %v6081_v55  ;;  %4288 = vmatprep.subr.bf16.mxu1 %v6083_v56  ;;  %v338_v55 = vld [vmem:[%s9293_s1 + $0x990] sm:$0xff]  ;;  %v391_v46 = vld [vmem:[%s9293_s1 + $0xb38] sm:$0xff] }
 0x19e   :  { %v342_v56 = vld [vmem:[%s9293_s1 + $0x9b0] sm:$0xff] }
 0x19f   :  { %v6144_v6 = vcombine.low %v338_v55, %v342_v56 }
 0x1a0   :  { %4084 = vmatpush1.bf16.msra.mxu0 %v6080_v63  ;;  %4289 = vmatpush1.bf16.msra.mxu1 %v6082_v2  ;;  %v6145_v63 = vcombine.high %v338_v55, %v342_v56  ;;  %v6147_v2 = vcombine.high %v339_v57, %v343_v58  ;;  %v395_v55 = vld [vmem:[%s9293_s1 + $0xb58] sm:$0xff]  ;;  %v6194_v58 = vcombine.low %v387_v45, %v391_v46 }
 0x1a1   :  { %4085 = vmatprep.subr.bf16.mxu0 %v6089_v10  ;;  %4290 = vmatprep.subr.bf16.mxu1 %v6091_v3  ;;  %v346_v10 = vld [vmem:[%s9293_s1 + $0x9d0] sm:$0xff]  ;;  %v399_v56 = vld [vmem:[%s9293_s1 + $0xb78] sm:$0xff] }
 0x1a2   :  { %v350_v3 = vld [vmem:[%s9293_s1 + $0x9f0] sm:$0xff] }
 0x1a3   :  { %v6152_v24 = vcombine.low %v346_v10, %v350_v3 }
 0x1a4   :  { %4086 = vmatpush1.bf16.msra.mxu0 %v6088_v8  ;;  %4291 = vmatpush1.bf16.msra.mxu1 %v6090_v9  ;;  %v6153_v8 = vcombine.high %v346_v10, %v350_v3  ;;  %v6155_v9 = vcombine.high %v347_v4, %v351_v5  ;;  %v403_v10 = vld [vmem:[%s9293_s1 + $0xb98] sm:$0xff]  ;;  %v6202_v5 = vcombine.low %v395_v55, %v399_v56 }
 0x1a5   :  { %4096 = vmatprep.subr.bf16.mxu0 %v6097_v11  ;;  %4301 = vmatprep.subr.bf16.mxu1 %v6099_v12  ;;  %v354_v11 = vld [vmem:[%s9293_s1 + $0xa10] sm:$0xff]  ;;  %v407_v3 = vld [vmem:[%s9293_s1 + $0xbb8] sm:$0xff] }
 0x1a6   :  { %v358_v12 = vld [vmem:[%s9293_s1 + $0xa30] sm:$0xff] }
 0x1a7   :  { %4088 = vmatmul.mubr.bf16.vlgmr.msra.gmra.mrb[4].mxu0 %v7445_v41  ;;  %4293 = vmatmul.mubr.bf16.vlgmr.msra.gmra.mrb[4].mxu1 %v7445_v41  ;;  %v315_v41 = vld [vmem:[%s9293_s1 + $0x8d8] sm:$0xff]  ;;  %v6160_v34 = vcombine.low %v354_v11, %v358_v12 }
 0x1a8   :  { %4097 = vmatpush1.bf16.msra.mxu0 %v6096_v16  ;;  %4302 = vmatpush1.bf16.msra.mxu1 %v6098_v17  ;;  %v6123_v36 = vcombine.high %v315_v41, %v319_v30  ;;  %v6122_v42 = vcombine.low %v315_v41, %v319_v30  ;;  %v6161_v16 = vcombine.high %v354_v11, %v358_v12  ;;  %v411_v11 = vld [vmem:[%s9293_s1 + $0xbd8] sm:$0xff] }
 0x1a9   :  { %4098 = vmatprep.subr.bf16.mxu0 %v6105_v18  ;;  %4303 = vmatprep.subr.bf16.mxu1 %v6107_v19  ;;  %v6163_v17 = vcombine.high %v355_v13, %v359_v14  ;;  %v362_v18 = vld [vmem:[%s9293_s1 + $0xa50] sm:$0xff]  ;;  %v6170_v30 = vcombine.low %v363_v20, %v367_v22  ;;  %v415_v12 = vld [vmem:[%s9293_s1 + $0xbf8] sm:$0xff]  ;;  %v6210_v14 = vcombine.low %v403_v10, %v407_v3 }
 0x1aa   :  { %4128 = vmatprep.mubr.bf16.mxu0 %v7460_v51  ;;  %4333 = vmatprep.mubr.bf16.mxu1 %v7460_v51  ;;  %v323_v51 = vld [vmem:[%s9293_s1 + $0x918] sm:$0xff]  ;;  %v366_v19 = vld [vmem:[%s9293_s1 + $0xa70] sm:$0xff] }
 0x1ab   :  { %v6131_v43 = vcombine.high %v323_v51, %v327_v39  ;;  %v6130_v50 = vcombine.low %v323_v51, %v327_v39  ;;  %v6168_v41 = vcombine.low %v362_v18, %v366_v19  ;;  %v6178_v39 = vcombine.low %v371_v29, %v375_v60 }
 0x1ac   :  { %4099 = vmatpush1.bf16.msra.mxu0 %v6104_v25  ;;  %4304 = vmatpush1.bf16.msra.mxu1 %v6106_v26  ;;  %v6169_v25 = vcombine.high %v362_v18, %v366_v19  ;;  %v6171_v26 = vcombine.high %v363_v20, %v367_v22  ;;  %v419_v18 = vld [vmem:[%s9293_s1 + $0xc18] sm:$0xff]  ;;  %v6218_v22 = vcombine.low %v411_v11, %v415_v12 }
 0x1ad   :  { %4100 = vmatprep.subr.bf16.mxu0 %v6113_v27  ;;  %4305 = vmatprep.subr.bf16.mxu1 %v6115_v28  ;;  %v370_v27 = vld [vmem:[%s9293_s1 + $0xa90] sm:$0xff]  ;;  %v423_v19 = vld [vmem:[%s9293_s1 + $0xc38] sm:$0xff] }
 0x1ae   :  { %v374_v28 = vld [vmem:[%s9293_s1 + $0xab0] sm:$0xff] }
 0x1af   :  { %v6176_v51 = vcombine.low %v370_v27, %v374_v28 }
 0x1b0   :  { %4101 = vmatpush1.bf16.msra.mxu0 %v6112_v31  ;;  %4306 = vmatpush1.bf16.msra.mxu1 %v6114_v32  ;;  %v6177_v31 = vcombine.high %v370_v27, %v374_v28  ;;  %v6179_v32 = vcombine.high %v371_v29, %v375_v60  ;;  %v427_v27 = vld [vmem:[%s9293_s1 + $0xc58] sm:$0xff]  ;;  %v6226_v60 = vcombine.low %v419_v18, %v423_v19 }
 0x1b1   :  { %4102 = vmatprep.subr.bf16.mxu0 %v6121_v33  ;;  %4307 = vmatprep.subr.bf16.mxu1 %v6123_v36  ;;  %v378_v33 = vld [vmem:[%s9293_s1 + $0xad0] sm:$0xff]  ;;  %v431_v28 = vld [vmem:[%s9293_s1 + $0xc78] sm:$0xff] }
 0x1b2   :  { %v382_v36 = vld [vmem:[%s9293_s1 + $0xaf0] sm:$0xff] }
 0x1b3   :  { %v6184_v47 = vcombine.low %v378_v33, %v382_v36 }
 0x1b4   :  { %4103 = vmatpush1.bf16.msra.mxu0 %v6120_v40  ;;  %4308 = vmatpush1.bf16.msra.mxu1 %v6122_v42  ;;  %v6185_v40 = vcombine.high %v378_v33, %v382_v36  ;;  %v6187_v42 = vcombine.high %v379_v37, %v383_v38  ;;  %v435_v33 = vld [vmem:[%s9293_s1 + $0xc98] sm:$0xff]  ;;  %v6234_v38 = vcombine.low %v427_v27, %v431_v28 }
 0x1b5   :  { %4104 = vmatprep.subr.bf16.mxu0 %v6129_v54  ;;  %4309 = vmatprep.subr.bf16.mxu1 %v6131_v43  ;;  %v386_v54 = vld [vmem:[%s9293_s1 + $0xb10] sm:$0xff]  ;;  %v439_v36 = vld [vmem:[%s9293_s1 + $0xcb8] sm:$0xff] }
 0x1b6   :  { %v390_v43 = vld [vmem:[%s9293_s1 + $0xb30] sm:$0xff] }
 0x1b7   :  { %v6192_v57 = vcombine.low %v386_v54, %v390_v43 }
 0x1b8   :  { %4105 = vmatpush1.bf16.msra.mxu0 %v6128_v49  ;;  %4310 = vmatpush1.bf16.msra.mxu1 %v6130_v50  ;;  %v6193_v49 = vcombine.high %v386_v54, %v390_v43  ;;  %v6195_v50 = vcombine.high %v387_v45, %v391_v46  ;;  %v447_v54 = vld [vmem:[%s9293_s1 + $0xcf8] sm:$0xff]  ;;  %v6242_v45 = vcombine.low %v435_v33, %v439_v36 }
 0x1b9   :  { %4106 = vmatprep.subr.bf16.mxu0 %v6137_v52  ;;  %4311 = vmatprep.subr.bf16.mxu1 %v6139_v53  ;;  %v394_v52 = vld [vmem:[%s9293_s1 + $0xb50] sm:$0xff] }
 0x1ba   :  { %v398_v53 = vld [vmem:[%s9293_s1 + $0xb70] sm:$0xff] }
 0x1bb   :  { %v6200_v4 = vcombine.low %v394_v52, %v398_v53 }
 0x1bc   :  { %4107 = vmatpush1.bf16.msra.mxu0 %v6136_v59  ;;  %4312 = vmatpush1.bf16.msra.mxu1 %v6138_v61  ;;  %v6201_v59 = vcombine.high %v394_v52, %v398_v53  ;;  %v6203_v61 = vcombine.high %v395_v55, %v399_v56 }
 0x1bd   :  { %4108 = vmatprep.subr.bf16.mxu0 %v6145_v63  ;;  %4313 = vmatprep.subr.bf16.mxu1 %v6147_v2  ;;  %v402_v63 = vld [vmem:[%s9293_s1 + $0xb90] sm:$0xff] }
 0x1be   :  { %v406_v2 = vld [vmem:[%s9293_s1 + $0xbb0] sm:$0xff] }
 0x1bf   :  { %v6208_v13 = vcombine.low %v402_v63, %v406_v2 }
 0x1c0   :  { %4109 = vmatpush1.bf16.msra.mxu0 %v6144_v6  ;;  %4314 = vmatpush1.bf16.msra.mxu1 %v6146_v7  ;;  %v6209_v6 = vcombine.high %v402_v63, %v406_v2  ;;  %v6211_v7 = vcombine.high %v403_v10, %v407_v3 }
 0x1c1   :  { %4110 = vmatprep.subr.bf16.mxu0 %v6153_v8  ;;  %4315 = vmatprep.subr.bf16.mxu1 %v6155_v9  ;;  %v410_v8 = vld [vmem:[%s9293_s1 + $0xbd0] sm:$0xff] }
 0x1c2   :  { %v414_v9 = vld [vmem:[%s9293_s1 + $0xbf0] sm:$0xff] }
 0x1c3   :  { %v6216_v20 = vcombine.low %v410_v8, %v414_v9 }
 0x1c4   :  { %4111 = vmatpush1.bf16.msra.mxu0 %v6152_v24  ;;  %4316 = vmatpush1.bf16.msra.mxu1 %v6154_v15  ;;  %v6217_v24 = vcombine.high %v410_v8, %v414_v9  ;;  %v6219_v15 = vcombine.high %v411_v11, %v415_v12 }
 0x1c5   :  { %4112 = vmatprep.subr.bf16.mxu0 %v6161_v16  ;;  %4317 = vmatprep.subr.bf16.mxu1 %v6163_v17  ;;  %v418_v16 = vld [vmem:[%s9293_s1 + $0xc10] sm:$0xff] }
 0x1c6   :  { %v422_v17 = vld [vmem:[%s9293_s1 + $0xc30] sm:$0xff] }
 0x1c7   :  { %v6224_v29 = vcombine.low %v418_v16, %v422_v17 }
 0x1c8   :  { %4113 = vmatpush1.bf16.msra.mxu0 %v6160_v34  ;;  %4318 = vmatpush1.bf16.msra.mxu1 %v6162_v23  ;;  %v6225_v34 = vcombine.high %v418_v16, %v422_v17  ;;  %v6227_v23 = vcombine.high %v419_v18, %v423_v19  ;;  %v475_v17 = vld [vmem:[%s9293_s1 + $0xdd8] sm:$0xff] }
 0x1c9   :  { %4114 = vmatprep.subr.bf16.mxu0 %v6169_v25  ;;  %4319 = vmatprep.subr.bf16.mxu1 %v6171_v26  ;;  %v426_v25 = vld [vmem:[%s9293_s1 + $0xc50] sm:$0xff]  ;;  %v479_v18 = vld [vmem:[%s9293_s1 + $0xdf8] sm:$0xff] }
 0x1ca   :  { %v430_v26 = vld [vmem:[%s9293_s1 + $0xc70] sm:$0xff] }
 0x1cb   :  { %v6232_v37 = vcombine.low %v426_v25, %v430_v26 }
 0x1cc   :  { %4115 = vmatpush1.bf16.msra.mxu0 %v6168_v41  ;;  %4320 = vmatpush1.bf16.msra.mxu1 %v6170_v30  ;;  %v6233_v41 = vcombine.high %v426_v25, %v430_v26  ;;  %v6235_v30 = vcombine.high %v427_v27, %v431_v28  ;;  %v6283_v28 = vcombine.high %v475_v17, %v479_v18 }
 0x1cd   :  { %4116 = vmatprep.subr.bf16.mxu0 %v6177_v31  ;;  %4321 = vmatprep.subr.bf16.mxu1 %v6179_v32  ;;  %v434_v31 = vld [vmem:[%s9293_s1 + $0xc90] sm:$0xff] }
 0x1ce   :  { %v438_v32 = vld [vmem:[%s9293_s1 + $0xcb0] sm:$0xff] }
 0x1cf   :  { %v6240_v43 = vcombine.low %v434_v31, %v438_v32 }
 0x1d0   :  { %4117 = vmatpush1.bf16.msra.mxu0 %v6176_v51  ;;  %4322 = vmatpush1.bf16.msra.mxu1 %v6178_v39  ;;  %v6241_v51 = vcombine.high %v434_v31, %v438_v32  ;;  %v6243_v39 = vcombine.high %v435_v33, %v439_v36  ;;  %v6282_v32 = vcombine.low %v475_v17, %v479_v18 }
 0x1d1   :  { %4118 = vmatprep.subr.bf16.mxu0 %v6185_v40  ;;  %4323 = vmatprep.subr.bf16.mxu1 %v6187_v42  ;;  %v442_v40 = vld [vmem:[%s9293_s1 + $0xcd0] sm:$0xff] }
 0x1d2   :  { %v446_v42 = vld [vmem:[%s9293_s1 + $0xcf0] sm:$0xff] }
 0x1d3   :  { %v6249_v46 = vcombine.high %v442_v40, %v446_v42  ;;  %v6248_v52 = vcombine.low %v442_v40, %v446_v42 }
 0x1d4   :  { %4119 = vmatpush1.bf16.msra.mxu0 %v6184_v47  ;;  %4324 = vmatpush1.bf16.msra.mxu1 %v6186_v48  ;;  %v450_v48 = vld [vmem:[%s9293_s1 + $0xd10] sm:$0xff] }
 0x1d5   :  { %4120 = vmatprep.subr.bf16.mxu0 %v6193_v49  ;;  %4325 = vmatprep.subr.bf16.mxu1 %v6195_v50  ;;  %v454_v49 = vld [vmem:[%s9293_s1 + $0xd30] sm:$0xff]  ;;  %v455_v50 = vld [vmem:[%s9293_s1 + $0xd38] sm:$0xff] }
 0x1d6   :  { %v6257_v55 = vcombine.high %v450_v48, %v454_v49  ;;  %v6256_v63 = vcombine.low %v450_v48, %v454_v49 }
 0x1d8   :  { %4121 = vmatpush1.bf16.msra.mxu0 %v6192_v57  ;;  %4326 = vmatpush1.bf16.msra.mxu1 %v6194_v58  ;;  %v458_v57 = vld [vmem:[%s9293_s1 + $0xd50] sm:$0xff] }
 0x1d9   :  { %4122 = vmatprep.subr.bf16.mxu0 %v6201_v59  ;;  %4327 = vmatprep.subr.bf16.mxu1 %v6203_v61  ;;  %v462_v58 = vld [vmem:[%s9293_s1 + $0xd70] sm:$0xff]  ;;  %v459_v59 = vld [vmem:[%s9293_s1 + $0xd58] sm:$0xff] }
 0x1da   :  { %v463_v61 = vld [vmem:[%s9293_s1 + $0xd78] sm:$0xff]  ;;  %v6265_v10 = vcombine.high %v458_v57, %v462_v58  ;;  %v6264_v8 = vcombine.low %v458_v57, %v462_v58 }
 0x1db   :  { %v6267_v3 = vcombine.high %v459_v59, %v463_v61  ;;  %v6266_v9 = vcombine.low %v459_v59, %v463_v61 }
 0x1dc   :  { %4123 = vmatpush1.bf16.msra.mxu0 %v6200_v4  ;;  %4328 = vmatpush1.bf16.msra.mxu1 %v6202_v5  ;;  %v466_v4 = vld [vmem:[%s9293_s1 + $0xd90] sm:$0xff] }
 0x1dd   :  { %4124 = vmatprep.subr.bf16.mxu0 %v6209_v6  ;;  %4329 = vmatprep.subr.bf16.mxu1 %v6211_v7  ;;  %v470_v5 = vld [vmem:[%s9293_s1 + $0xdb0] sm:$0xff]  ;;  %v467_v6 = vld [vmem:[%s9293_s1 + $0xd98] sm:$0xff] }
 0x1de   :  { %v471_v7 = vld [vmem:[%s9293_s1 + $0xdb8] sm:$0xff]  ;;  %v6273_v11 = vcombine.high %v466_v4, %v470_v5 }
 0x1df   :  { %v6274_v25 = vcombine.low %v467_v6, %v471_v7 }
 0x1e0   :  { %4125 = vmatpush1.bf16.msra.mxu0 %v6208_v13  ;;  %4330 = vmatpush1.bf16.msra.mxu1 %v6210_v14  ;;  %v6275_v13 = vcombine.high %v467_v6, %v471_v7  ;;  %v474_v14 = vld [vmem:[%s9293_s1 + $0xdd0] sm:$0xff] }
 0x1e1   :  { %4126 = vmatprep.subr.bf16.mxu0 %v6217_v24  ;;  %4331 = vmatprep.subr.bf16.mxu1 %v6219_v15  ;;  %v478_v24 = vld [vmem:[%s9293_s1 + $0xdf0] sm:$0xff] }
 0x1e2   :  { %v6281_v26 = vcombine.high %v474_v14, %v478_v24  ;;  %v6280_v31 = vcombine.low %v474_v14, %v478_v24 }
 0x1e4   :  { %4127 = vmatpush1.bf16.msra.mxu0 %v6216_v20  ;;  %4332 = vmatpush1.bf16.msra.mxu1 %v6218_v22  ;;  %v6272_v22 = vcombine.low %v466_v4, %v470_v5 }
 0x1e5   :  { %4137 = vmatprep.subr.bf16.mxu0 %v6225_v34  ;;  %4342 = vmatprep.subr.bf16.mxu1 %v6227_v23 }
 0x1e7   :  { %4129 = vmatmul.mubr.bf16.vlgmr.msra.gmra.mrb[4].mxu0 %v7649_v1  ;;  %4334 = vmatmul.mubr.bf16.vlgmr.msra.gmra.mrb[4].mxu1 %v7649_v1  ;;  %v443_v1 = vld [vmem:[%s9293_s1 + $0xcd8] sm:$0xff] }
 0x1e8   :  { %4138 = vmatpush1.bf16.msra.mxu0 %v6224_v29  ;;  %4343 = vmatpush1.bf16.msra.mxu1 %v6226_v60  ;;  %v6251_v47 = vcombine.high %v443_v1, %v447_v54  ;;  %v6250_v53 = vcombine.low %v443_v1, %v447_v54  ;;  %v482_v29 = vld [vmem:[%s9293_s1 + $0xe10] sm:$0xff] }
 0x1e9   :  { %4139 = vmatprep.subr.bf16.mxu0 %v6233_v41  ;;  %4344 = vmatprep.subr.bf16.mxu1 %v6235_v30  ;;  %v486_v60 = vld [vmem:[%s9293_s1 + $0xe30] sm:$0xff]  ;;  %v483_v41 = vld [vmem:[%s9293_s1 + $0xe18] sm:$0xff] }
 0x1ea   :  { %4169 = vmatprep.mubr.bf16.mxu0 %v7659_v0  ;;  %4374 = vmatprep.mubr.bf16.mxu1 %v7659_v0  ;;  %v451_v0 = vld [vmem:[%s9293_s1 + $0xd18] sm:$0xff]  ;;  %v6289_v33 = vcombine.high %v482_v29, %v486_v60  ;;  %v6288_v40 = vcombine.low %v482_v29, %v486_v60  ;;  %v538_v29 = vld [vmem:[%s9293_s1 + $0xfd0] sm:$0xff] }
 0x1eb   :  { %v6259_v56 = vcombine.high %v451_v0, %v455_v50  ;;  %v6258_v2 = vcombine.low %v451_v0, %v455_v50  ;;  %v487_v30 = vld [vmem:[%s9293_s1 + $0xe38] sm:$0xff]  ;;  %v542_v60 = vld [vmem:[%s9293_s1 + $0xff0] sm:$0xff] }
 0x1ec   :  { %4140 = vmatpush1.bf16.msra.mxu0 %v6232_v37  ;;  %4345 = vmatpush1.bf16.msra.mxu1 %v6234_v38  ;;  %v6291_v36 = vcombine.high %v483_v41, %v487_v30  ;;  %v490_v37 = vld [vmem:[%s9293_s1 + $0xe50] sm:$0xff]  ;;  %v6290_v42 = vcombine.low %v483_v41, %v487_v30  ;;  %v539_v41 = vld [vmem:[%s9293_s1 + $0xfd8] sm:$0xff] }
 0x1ed   :  { %4141 = vmatprep.subr.bf16.mxu0 %v6241_v51  ;;  %4346 = vmatprep.subr.bf16.mxu1 %v6243_v39  ;;  %v494_v38 = vld [vmem:[%s9293_s1 + $0xe70] sm:$0xff]  ;;  %v491_v51 = vld [vmem:[%s9293_s1 + $0xe58] sm:$0xff] }
 0x1ee   :  { %v495_v39 = vld [vmem:[%s9293_s1 + $0xe78] sm:$0xff]  ;;  %v6297_v1 = vcombine.high %v490_v37, %v494_v38  ;;  %v6296_v48 = vcombine.low %v490_v37, %v494_v38  ;;  %v546_v37 = vld [vmem:[%s9293_s1 + $0x1010] sm:$0xff] }
 0x1ef   :  { %v6299_v54 = vcombine.high %v491_v51, %v495_v39  ;;  %v6298_v49 = vcombine.low %v491_v51, %v495_v39  ;;  %v543_v30 = vld [vmem:[%s9293_s1 + $0xff8] sm:$0xff]  ;;  %v550_v38 = vld [vmem:[%s9293_s1 + $0x1030] sm:$0xff] }
 0x1f0   :  { %4142 = vmatpush1.bf16.msra.mxu0 %v6240_v43  ;;  %4347 = vmatpush1.bf16.msra.mxu1 %v6242_v45  ;;  %v498_v43 = vld [vmem:[%s9293_s1 + $0xe90] sm:$0xff]  ;;  %v547_v51 = vld [vmem:[%s9293_s1 + $0x1018] sm:$0xff] }
 0x1f1   :  { %4143 = vmatprep.subr.bf16.mxu0 %v6249_v46  ;;  %4348 = vmatprep.subr.bf16.mxu1 %v6251_v47  ;;  %v502_v45 = vld [vmem:[%s9293_s1 + $0xeb0] sm:$0xff]  ;;  %v499_v46 = vld [vmem:[%s9293_s1 + $0xe98] sm:$0xff] }
 0x1f2   :  { %v503_v47 = vld [vmem:[%s9293_s1 + $0xeb8] sm:$0xff]  ;;  %v6305_v0 = vcombine.high %v498_v43, %v502_v45  ;;  %v6304_v57 = vcombine.low %v498_v43, %v502_v45  ;;  %v554_v43 = vld [vmem:[%s9293_s1 + $0x1050] sm:$0xff] }
 0x1f3   :  { %v6307_v50 = vcombine.high %v499_v46, %v503_v47  ;;  %v6306_v58 = vcombine.low %v499_v46, %v503_v47  ;;  %v551_v39 = vld [vmem:[%s9293_s1 + $0x1038] sm:$0xff]  ;;  %v558_v45 = vld [vmem:[%s9293_s1 + $0x1070] sm:$0xff] }
 0x1f4   :  { %4144 = vmatpush1.bf16.msra.mxu0 %v6248_v52  ;;  %4349 = vmatpush1.bf16.msra.mxu1 %v6250_v53  ;;  %v506_v52 = vld [vmem:[%s9293_s1 + $0xed0] sm:$0xff]  ;;  %v555_v46 = vld [vmem:[%s9293_s1 + $0x1058] sm:$0xff] }
 0x1f5   :  { %4145 = vmatprep.subr.bf16.mxu0 %v6257_v55  ;;  %4350 = vmatprep.subr.bf16.mxu1 %v6259_v56  ;;  %v510_v53 = vld [vmem:[%s9293_s1 + $0xef0] sm:$0xff]  ;;  %v507_v55 = vld [vmem:[%s9293_s1 + $0xed8] sm:$0xff] }
 0x1f6   :  { %v511_v56 = vld [vmem:[%s9293_s1 + $0xef8] sm:$0xff]  ;;  %v6313_v59 = vcombine.high %v506_v52, %v510_v53  ;;  %v6312_v4 = vcombine.low %v506_v52, %v510_v53  ;;  %v562_v52 = vld [vmem:[%s9293_s1 + $0x1090] sm:$0xff] }
 0x1f7   :  { %v6315_v61 = vcombine.high %v507_v55, %v511_v56  ;;  %v6314_v5 = vcombine.low %v507_v55, %v511_v56  ;;  %v559_v47 = vld [vmem:[%s9293_s1 + $0x1078] sm:$0xff]  ;;  %v566_v53 = vld [vmem:[%s9293_s1 + $0x10b0] sm:$0xff] }
 0x1f8   :  { %4146 = vmatpush1.bf16.msra.mxu0 %v6256_v63  ;;  %4351 = vmatpush1.bf16.msra.mxu1 %v6258_v2  ;;  %v514_v63 = vld [vmem:[%s9293_s1 + $0xf10] sm:$0xff]  ;;  %v563_v55 = vld [vmem:[%s9293_s1 + $0x1098] sm:$0xff] }
 0x1f9   :  { %4147 = vmatprep.subr.bf16.mxu0 %v6265_v10  ;;  %4352 = vmatprep.subr.bf16.mxu1 %v6267_v3  ;;  %v518_v2 = vld [vmem:[%s9293_s1 + $0xf30] sm:$0xff]  ;;  %v515_v10 = vld [vmem:[%s9293_s1 + $0xf18] sm:$0xff] }
 0x1fa   :  { %v8613_v12 = vpop.f32.mrb[0].mxu0  ;;  %v8621_v15 = vpop.f32.mrb[0].mxu1  ;;  %v519_v3 = vld [vmem:[%s9293_s1 + $0xf38] sm:$0xff]  ;;  %v6321_v6 = vcombine.high %v514_v63, %v518_v2  ;;  %v6320_v14 = vcombine.low %v514_v63, %v518_v2  ;;  %v570_v63 = vld [vmem:[%s9293_s1 + $0x10d0] sm:$0xff] }
 0x1fb   :  { %v8623_v16 = vpop.f32.mrb[1].mxu0  ;;  %v8631_v19 = vpop.f32.mrb[1].mxu1  ;;  %v6323_v7 = vcombine.high %v515_v10, %v519_v3  ;;  %v6322_v24 = vcombine.low %v515_v10, %v519_v3  ;;  %v567_v56 = vld [vmem:[%s9293_s1 + $0x10b8] sm:$0xff]  ;;  %v574_v2 = vld [vmem:[%s9293_s1 + $0x10f0] sm:$0xff]  ;;  %v6368_v3 = vcombine.low %v562_v52, %v566_v53 }
 0x1fc   :  { %v3806_v20 = vpop.f32.mrb[2].mxu0  ;;  %4148 = vmatpush1.bf16.msra.mxu0 %v6264_v8  ;;  %v4011_v34 = vpop.f32.mrb[2].mxu1  ;;  %4353 = vmatpush1.bf16.msra.mxu1 %v6266_v9  ;;  %v522_v8 = vld [vmem:[%s9293_s1 + $0xf50] sm:$0xff]  ;;  %v575_v10 = vld [vmem:[%s9293_s1 + $0x10f8] sm:$0xff] }
 0x1fd   :  { %v3807_v23 = vpop.f32.mrb[3].mxu0  ;;  %4149 = vmatprep.subr.bf16.mxu0 %v6273_v11  ;;  %v4012_v27 = vpop.f32.mrb[3].mxu1  ;;  %4354 = vmatprep.subr.bf16.mxu1 %v6275_v13  ;;  %v526_v9 = vld [vmem:[%s9293_s1 + $0xf70] sm:$0xff]  ;;  %v523_v11 = vld [vmem:[%s9293_s1 + $0xf58] sm:$0xff] }
 0x1fe   :  { %v527_v13 = vld [vmem:[%s9293_s1 + $0xf78] sm:$0xff]  ;;  %v6329_v17 = vcombine.high %v522_v8, %v526_v9  ;;  %v530_v20 = vld [vmem:[%s9293_s1 + $0xf90] sm:$0xff] }
 0x1ff   :  { %v6331_v18 = vcombine.high %v523_v11, %v527_v13  ;;  %v531_v34 = vld [vmem:[%s9293_s1 + $0xf98] sm:$0xff] }
 0x200   :  { %4150 = vmatpush1.bf16.msra.mxu0 %v6272_v22  ;;  %4355 = vmatpush1.bf16.msra.mxu1 %v6274_v25  ;;  %v534_v22 = vld [vmem:[%s9293_s1 + $0xfb0] sm:$0xff]  ;;  %v535_v23 = vld [vmem:[%s9293_s1 + $0xfb8] sm:$0xff]  ;;  %v6328_v25 = vcombine.low %v522_v8, %v526_v9 }
 0x201   :  { %4151 = vmatprep.subr.bf16.mxu0 %v6281_v26  ;;  %4356 = vmatprep.subr.bf16.mxu1 %v6283_v28  ;;  %v6330_v26 = vcombine.low %v523_v11, %v527_v13  ;;  %v6337_v27 = vcombine.high %v530_v20, %v534_v22  ;;  %v6339_v28 = vcombine.high %v531_v34, %v535_v23  ;;  %v582_v8 = vld [vmem:[%s9293_s1 + $0x1130] sm:$0xff]  ;;  %v583_v9 = vld [vmem:[%s9293_s1 + $0x1138] sm:$0xff] }
 0x202   :  { %v6376_v11 = vcombine.low %v570_v63, %v574_v2 }
 0x204   :  { %4152 = vmatpush1.bf16.msra.mxu0 %v6280_v31  ;;  %4357 = vmatpush1.bf16.msra.mxu1 %v6282_v32  ;;  %v6336_v31 = vcombine.low %v530_v20, %v534_v22  ;;  %v6338_v32 = vcombine.low %v531_v34, %v535_v23  ;;  %v587_v20 = vld [vmem:[%s9293_s1 + $0x1158] sm:$0xff] }
 0x205   :  { %4153 = vmatprep.subr.bf16.mxu0 %v6289_v33  ;;  %4358 = vmatprep.subr.bf16.mxu1 %v6291_v36  ;;  %v6345_v33 = vcombine.high %v538_v29, %v542_v60  ;;  %v6347_v36 = vcombine.high %v539_v41, %v543_v30  ;;  %v591_v22 = vld [vmem:[%s9293_s1 + $0x1178] sm:$0xff] }
 0x208   :  { %4154 = vmatpush1.bf16.msra.mxu0 %v6288_v40  ;;  %4359 = vmatpush1.bf16.msra.mxu1 %v6290_v42  ;;  %v6344_v40 = vcombine.low %v538_v29, %v542_v60  ;;  %v6346_v42 = vcombine.low %v539_v41, %v543_v30  ;;  %v616_v29 = vsub.s32 1, %v7061_v44  ;;  %v595_v60 = vld [vmem:[%s9293_s1 + $0x1198] sm:$0xff]  ;;  %v8821_v30 = vld [vmem:[%s9294_s2] sm:$0xff] }
 0x209   :  { %4155 = vmatprep.subr.bf16.mxu0 %v6297_v1  ;;  %4360 = vmatprep.subr.bf16.mxu1 %v6299_v54  ;;  %v6353_v1 = vcombine.high %v546_v37, %v550_v38  ;;  %v6355_v54 = vcombine.high %v547_v51, %v551_v39  ;;  %v599_v41 = vld [vmem:[%s9293_s1 + $0x11b8] sm:$0xff] }
 0x20c   :  { %4156 = vmatpush1.bf16.msra.mxu0 %v6296_v48  ;;  %4361 = vmatpush1.bf16.msra.mxu1 %v6298_v49  ;;  %v6352_v48 = vcombine.low %v546_v37, %v550_v38  ;;  %v6354_v49 = vcombine.low %v547_v51, %v551_v39  ;;  %v6403_v37 = vcombine.high %v595_v60, %v599_v41  ;;  %v602_v38 = vld [vmem:[%s9293_s1 + $0x11d0] sm:$0xff] }
 0x20d   :  { %4157 = vmatprep.subr.bf16.mxu0 %v6305_v0  ;;  %4362 = vmatprep.subr.bf16.mxu1 %v6307_v50  ;;  %v6361_v0 = vcombine.high %v554_v43, %v558_v45  ;;  %v6363_v50 = vcombine.high %v555_v46, %v559_v47  ;;  %v606_v51 = vld [vmem:[%s9293_s1 + $0x11f0] sm:$0xff]  ;;  %v617_v39 = vrot.slane %v8821_v30, %v616_v29 }
 0x210   :  { %4158 = vmatpush1.bf16.msra.mxu0 %v6304_v57  ;;  %4363 = vmatpush1.bf16.msra.mxu1 %v6306_v58  ;;  %v6360_v57 = vcombine.low %v554_v43, %v558_v45  ;;  %v6362_v58 = vcombine.low %v555_v46, %v559_v47  ;;  %v6402_v43 = vcombine.low %v595_v60, %v599_v41  ;;  %v6826_v60 = vld [vmem:[%s9295_s3 + $0xf8] sm:$0xff]  }
 0x211   :  { %4159 = vmatprep.subr.bf16.mxu0 %v6313_v59  ;;  %4364 = vmatprep.subr.bf16.mxu1 %v6315_v61  ;;  %v6369_v59 = vcombine.high %v562_v52, %v566_v53  ;;  %v6371_v61 = vcombine.high %v563_v55, %v567_v56  ;;  %v6409_v45 = vcombine.high %v602_v38, %v606_v51  ;;  %v6798_v52 = vld [vmem:[%s9295_s3 + $0xc0] sm:$0xff]  }
 0x212   :  { %v6719_v47 = vadd.f32 %v8623_v16, %v617_v39  ;;  %v6799_v16 = vld [vmem:[%s9295_s3] sm:$0xff]  }
 0x214   :  { %4160 = vmatpush1.bf16.msra.mxu0 %v6312_v4  ;;  %4365 = vmatpush1.bf16.msra.mxu1 %v6314_v5  ;;  %v6370_v4 = vcombine.low %v563_v55, %v567_v56  ;;  %v6377_v5 = vcombine.high %v570_v63, %v574_v2  ;;  %v4425_v53 = vmax.f32 %v6719_v47, 0.0  ;;  %v6801_v56 = vld [vmem:[%s9295_s3 + $0x48] sm:$0xff]   ;;  %v6805_v2 = vld [vmem:[%s9295_s3 + $0x50] sm:$0xff]   ;;  %v6841_v47 = vld [vmem:[%s9295_s3 + $0x158] sm:$0xff]  }
 0x215   :  { %4161 = vmatprep.subr.bf16.mxu0 %v6321_v6  ;;  %4366 = vmatprep.subr.bf16.mxu1 %v6323_v7  ;;  %v578_v7 = vld [vmem:[%s9293_s1 + $0x1110] sm:$0xff]  ;;  %v6804_v63 = vld [vmem:[%s9295_s3 + $0x88] sm:$0xff]  }
 0x216   :  { %v6384_v34 = vcombine.low %v578_v7, %v582_v8 }
 0x218   :  { %4162 = vmatpush1.bf16.msra.mxu0 %v6320_v14  ;;  %4367 = vmatpush1.bf16.msra.mxu1 %v6322_v24  ;;  %v6385_v14 = vcombine.high %v578_v7, %v582_v8  ;;  %v6813_v7 = vld [vmem:[%s9295_s3 + $0x60] sm:$0xff]  }
 0x219   :  { %4163 = vmatprep.subr.bf16.mxu0 %v6329_v17  ;;  %4368 = vmatprep.subr.bf16.mxu1 %v6331_v18  ;;  %v586_v17 = vld [vmem:[%s9293_s1 + $0x1150] sm:$0xff]  ;;  %v6814_v8 = vld [vmem:[%s9295_s3 + $0xe0] sm:$0xff]  }
 0x21a   :  { %v590_v18 = vld [vmem:[%s9293_s1 + $0x1170] sm:$0xff] }
 0x21c   :  { %4164 = vmatpush1.bf16.msra.mxu0 %v6328_v25  ;;  %4369 = vmatpush1.bf16.msra.mxu1 %v6330_v26  ;;  %v6393_v25 = vcombine.high %v586_v17, %v590_v18  ;;  %v6395_v26 = vcombine.high %v587_v20, %v591_v22 }
 0x21d   :  { %4165 = vmatprep.subr.bf16.mxu0 %v6337_v27  ;;  %4370 = vmatprep.subr.bf16.mxu1 %v6339_v28  ;;  %v594_v27 = vld [vmem:[%s9293_s1 + $0x1190] sm:$0xff] }
 0x21e   :  { %v598_v28 = vld [vmem:[%s9293_s1 + $0x11b0] sm:$0xff] }
 0x220   :  { %4166 = vmatpush1.bf16.msra.mxu0 %v6336_v31  ;;  %4371 = vmatpush1.bf16.msra.mxu1 %v6338_v32  ;;  %v624_v31 = vsub.s32 3, %v7061_v44  ;;  %v6392_v32 = vcombine.low %v586_v17, %v590_v18  ;;  %v6819_v17 = vld [vmem:[%s9295_s3 + $0x28] sm:$0xff]  }
 0x221   :  { %4167 = vmatprep.subr.bf16.mxu0 %v6345_v33  ;;  %4372 = vmatprep.subr.bf16.mxu1 %v6347_v36  ;;  %v6394_v33 = vcombine.low %v587_v20, %v591_v22  ;;  %v6401_v36 = vcombine.high %v594_v27, %v598_v28  ;;  %v6820_v20 = vld [vmem:[%s9295_s3 + $0xa8] sm:$0xff]   ;;  %v6821_v22 = vld [vmem:[%s9295_s3 + $0x70] sm:$0xff]  }
 0x224   :  { %4168 = vmatpush1.bf16.msra.mxu0 %v6344_v40  ;;  %4373 = vmatpush1.bf16.msra.mxu1 %v6346_v42  ;;  %v603_v40 = vld [vmem:[%s9293_s1 + $0x11d8] sm:$0xff] }
 0x225   :  { %4178 = vmatprep.subr.bf16.mxu0 %v6353_v1  ;;  %4383 = vmatprep.subr.bf16.mxu1 %v6355_v54  ;;  %v607_v42 = vld [vmem:[%s9293_s1 + $0x11f8] sm:$0xff]  ;;  %v625_v1 = vrot.slane %v8821_v30, %v624_v31  ;;  %v6400_v54 = vcombine.low %v594_v27, %v598_v28  ;;  %v6824_v27 = vld [vmem:[%s9295_s3 + $0xb0] sm:$0xff]  }
 0x226   :  { %v6411_v46 = vcombine.high %v603_v40, %v607_v42  ;;  %v6825_v28 = vld [vmem:[%s9295_s3 + $0x78] sm:$0xff]  }
 0x227   :  { %4170 = vmatmul.mubr.bf16.vlgmr.msra.gmra.mrb[4].mxu0 %v7847_v21  ;;  %4375 = vmatmul.mubr.bf16.vlgmr.msra.gmra.mrb[4].mxu1 %v7847_v21  ;;  %v571_v21 = vld [vmem:[%s9293_s1 + $0x10d8] sm:$0xff] }
 0x228   :  { %4179 = vmatpush1.bf16.msra.mxu0 %v6352_v48  ;;  %4384 = vmatpush1.bf16.msra.mxu1 %v6354_v49  ;;  %v6379_v6 = vcombine.high %v571_v21, %v575_v10  ;;  %v6378_v13 = vcombine.low %v571_v21, %v575_v10  ;;  %v6721_v48 = vadd.f32 %v8631_v19, %v625_v1  ;;  %v6800_v19 = vld [vmem:[%s9295_s3 + $0x80] sm:$0xff]   ;;  %v6807_v21 = vld [vmem:[%s9295_s3 + $0x10] sm:$0xff]   ;;  %v6828_v31 = vld [vmem:[%s9295_s3 + $0xb8] sm:$0xff]  }
 0x229   :  { %4180 = vmatprep.subr.bf16.mxu0 %v6361_v0  ;;  %4385 = vmatprep.subr.bf16.mxu1 %v6363_v50  ;;  %v6408_v49 = vcombine.low %v602_v38, %v606_v51  ;;  %v6410_v0 = vcombine.low %v603_v40, %v607_v42  ;;  %v6797_v50 = vld [vmem:[%s9295_s3 + $0x40] sm:$0xff]   ;;  %v6808_v10 = vld [vmem:[%s9295_s3 + $0x90] sm:$0xff]   ;;  %v6833_v51 = vld [vmem:[%s9295_s3 + $0x148] sm:$0xff]  }
 0x22a   :  { %4210 = vmatprep.mubr.bf16.mxu0 %v6950_v62  ;;  %4415 = vmatprep.mubr.bf16.mxu1 %v6950_v62  ;;  %v579_v62 = vld [vmem:[%s9293_s1 + $0x1118] sm:$0xff]  ;;  %v4427_v55 = vmax.f32 %v6721_v48, 0.0  ;;  %v6832_v38 = vld [vmem:[%s9295_s3 + $0x180] sm:$0xff]   ;;  %v6834_v40 = vld [vmem:[%s9295_s3 + $0x1c8] sm:$0xff]  }
 0x22b   :  { %v6387_v24 = vcombine.high %v579_v62, %v583_v9  ;;  %v6386_v23 = vcombine.low %v579_v62, %v583_v9  ;;  %v6815_v62 = vld [vmem:[%s9295_s3 + $0x20] sm:$0xff]   ;;  %v612_v9 = vsub.s32 0, %v7061_v44  ;;  %v6835_v42 = vld [vmem:[%s9295_s3 + $0x108] sm:$0xff]   ;;  %v6842_v48 = vld [vmem:[%s9295_s3 + $0x1d8] sm:$0xff]  }
 0x22c   :  { %4181 = vmatpush1.bf16.msra.mxu0 %v6360_v57  ;;  %4386 = vmatpush1.bf16.msra.mxu1 %v6362_v58  ;;  %v8855_v57 = vpack.c.bf16 %v4425_v53, %v4425_v53  ;;  %v6802_v58 = vld [vmem:[%s9295_s3 + $0xc8] sm:$0xff]   ;;  %v6847_v53 = vld [vmem:[%s9295_s3 + $0x120] sm:$0xff]  }
 0x22d   :  { %4182 = vmatprep.subr.bf16.mxu0 %v6369_v59  ;;  %4387 = vmatprep.subr.bf16.mxu1 %v6371_v61  ;;  %v8861_v59 = vpack.c.bf16 %v4427_v55, %v4427_v55  ;;  %v6803_v61 = vld [vmem:[%s9295_s3 + $0x8] sm:$0xff]   ;;  %v613_v18 = vrot.slane %v8821_v30, %v612_v9  ;;  %v6848_v55 = vld [vmem:[%s9295_s3 + $0x1a0] sm:$0xff]   ;;  %v640_v9 = vsub.s32 7, %v7061_v44 }
 0x22e   :  { %v6836_v1 = vld [vmem:[%s9295_s3 + $0x188] sm:$0xff]  }
 0x230   :  { %4183 = vmatpush1.bf16.msra.mxu0 %v6368_v3  ;;  %4388 = vmatpush1.bf16.msra.mxu1 %v6370_v4  ;;  %v6809_v3 = vld [vmem:[%s9295_s3 + $0x58] sm:$0xff]  }
 0x231   :  { %4184 = vmatprep.subr.bf16.mxu0 %v6377_v5  ;;  %4389 = vmatprep.subr.bf16.mxu1 %v6379_v6  ;;  %v6810_v4 = vld [vmem:[%s9295_s3 + $0xd8] sm:$0xff]  }
 0x232   :  { %v6811_v5 = vld [vmem:[%s9295_s3 + $0x18] sm:$0xff]  }
 0x233   :  { %v6812_v6 = vld [vmem:[%s9295_s3 + $0x98] sm:$0xff]  }
 0x234   :  { %4185 = vmatpush1.bf16.msra.mxu0 %v6376_v11  ;;  %4390 = vmatpush1.bf16.msra.mxu1 %v6378_v13  ;;  %v6816_v11 = vld [vmem:[%s9295_s3 + $0xa0] sm:$0xff]   ;;  %v6817_v13 = vld [vmem:[%s9295_s3 + $0x68] sm:$0xff]  }
 0x235   :  { %4186 = vmatprep.subr.bf16.mxu0 %v6385_v14  ;;  %4391 = vmatprep.subr.bf16.mxu1 %v6387_v24  ;;  %v620_v14 = vsub.s32 2, %v7061_v44  ;;  %v6818_v24 = vld [vmem:[%s9295_s3 + $0xe8] sm:$0xff]  }
 0x238   :  { %4187 = vmatpush1.bf16.msra.mxu0 %v6384_v34  ;;  %4392 = vmatpush1.bf16.msra.mxu1 %v6386_v23  ;;  %v621_v34 = vrot.slane %v8821_v30, %v620_v14  ;;  %v6822_v23 = vld [vmem:[%s9295_s3 + $0xf0] sm:$0xff]  }
 0x239   :  { %4188 = vmatprep.subr.bf16.mxu0 %v6393_v25  ;;  %4393 = vmatprep.subr.bf16.mxu1 %v6395_v26  ;;  %v6823_v25 = vld [vmem:[%s9295_s3 + $0x30] sm:$0xff]   ;;  %v6718_v26 = vadd.f32 %v8613_v12, %v613_v18  ;;  %v6827_v12 = vld [vmem:[%s9295_s3 + $0x38] sm:$0xff]  }
 0x23a   :  { %v6720_v29 = vadd.f32 %v8621_v15, %v621_v34  ;;  %v6829_v15 = vld [vmem:[%s9295_s3 + $0x140] sm:$0xff]  }
 0x23b   :  { %v4424_v41 = vmax.f32 %v6718_v26, 0.0 }
 0x23c   :  { %4189 = vmatpush1.bf16.msra.mxu0 %v6392_v32  ;;  %4394 = vmatpush1.bf16.msra.mxu1 %v6394_v33  ;;  %v4426_v32 = vmax.f32 %v6720_v29, 0.0  ;;  %v6830_v33 = vld [vmem:[%s9295_s3 + $0x1c0] sm:$0xff]  }
 0x23d   :  { %4190 = vmatprep.subr.bf16.mxu0 %v6401_v36  ;;  %4395 = vmatprep.subr.bf16.mxu1 %v6403_v37  ;;  %v6831_v36 = vld [vmem:[%s9295_s3 + $0x100] sm:$0xff]   ;;  %v8959_v37 = vpack.c.bf16 %v4424_v41, %v4424_v41 }
 0x23e   :  { %v8967_v39 = vpack.c.bf16 %v4426_v32, %v4426_v32 }
 0x240   :  { %4191 = vmatpush1.bf16.msra.mxu0 %v6400_v54  ;;  %4396 = vmatpush1.bf16.msra.mxu1 %v6402_v43  ;;  %v6837_v54 = vld [vmem:[%s9295_s3 + $0x150] sm:$0xff]  }
 0x241   :  { %4192 = vmatprep.subr.bf16.mxu0 %v6409_v45  ;;  %4397 = vmatprep.subr.bf16.mxu1 %v6411_v46  ;;  %v6838_v43 = vld [vmem:[%s9295_s3 + $0x1d0] sm:$0xff]  }
 0x242   :  { %v6839_v45 = vld [vmem:[%s9295_s3 + $0x110] sm:$0xff]  }
 0x243   :  { %v6840_v46 = vld [vmem:[%s9295_s3 + $0x190] sm:$0xff]  }
 0x244   :  { %4193 = vmatpush1.bf16.msra.mxu0 %v6408_v49  ;;  %4398 = vmatpush1.bf16.msra.mxu1 %v6410_v0  ;;  %v6843_v49 = vld [vmem:[%s9295_s3 + $0x118] sm:$0xff]  }
 0x245   :  { %6542 = vmatprep.subr.bf16.mxu0 %v6797_v50  ;;  %6564 = vmatprep.subr.bf16.mxu1 %v6798_v52  ;;  %v6844_v0 = vld [vmem:[%s9295_s3 + $0x198] sm:$0xff]   ;;  %v6845_v50 = vld [vmem:[%s9295_s3 + $0x160] sm:$0xff]  }
 0x246   :  { %v6846_v52 = vld [vmem:[%s9295_s3 + $0x1e0] sm:$0xff]  }
 0x247   :  { %4211 = vmatmul.mubr.bf16.vlgmr.msra.gmra.mrb[4].mxu0 %v7953_v35  ;;  %4416 = vmatmul.mubr.bf16.vlgmr.msra.gmra.mrb[4].mxu1 %v7953_v35  ;;  %v6806_v35 = vld [vmem:[%s9295_s3 + $0xd0] sm:$0xff]  }
 0x248   :  { %6543 = vmatpush3.bf16.msra.mxu0 %v6799_v16  ;;  %4991 = vmatprep.mubr.bf16.mxu0 %v8855_v57  ;;  %v6849_v16 = vld [vmem:[%s9295_s3 + $0x168] sm:$0xff]  }
 0x249   :  { %6565 = vmatpush3.bf16.msra.mxu1 %v6800_v19  ;;  %5031 = vmatprep.mubr.bf16.mxu1 %v8861_v59  ;;  %v6850_v19 = vld [vmem:[%s9295_s3 + $0x1e8] sm:$0xff]  }
 0x24a   :  { %6544 = vmatprep.subr.bf16.mxu0 %v6801_v56  ;;  %6566 = vmatprep.subr.bf16.mxu1 %v6802_v58  ;;  %v6851_v56 = vld [vmem:[%s9295_s3 + $0x128] sm:$0xff]  }
 0x24b   :  { %v6852_v58 = vld [vmem:[%s9295_s3 + $0x1a8] sm:$0xff]  }
 0x24c   :  { %6545 = vmatpush3.bf16.msra.mxu0 %v6803_v61  ;;  %v6853_v61 = vld [vmem:[%s9295_s3 + $0x170] sm:$0xff]  }
 0x24d   :  { %6567 = vmatpush3.bf16.msra.mxu1 %v6804_v63  ;;  %6546 = vmatprep.subr.bf16.mxu0 %v6805_v2  ;;  %v6854_v63 = vld [vmem:[%s9295_s3 + $0x1f0] sm:$0xff]  }
 0x24e   :  { %6568 = vmatprep.subr.bf16.mxu1 %v6806_v35  ;;  %v6855_v2 = vld [vmem:[%s9295_s3 + $0x130] sm:$0xff]  }
 0x24f   :  { %v6856_v35 = vld [vmem:[%s9295_s3 + $0x1b0] sm:$0xff]  }
 0x250   :  { %6547 = vmatpush3.bf16.msra.mxu0 %v6807_v21  ;;  %v6857_v21 = vld [vmem:[%s9295_s3 + $0x178] sm:$0xff]  }
 0x251   :  { %6569 = vmatpush3.bf16.msra.mxu1 %v6808_v10  ;;  %6548 = vmatprep.subr.bf16.mxu0 %v6809_v3  ;;  %v6858_v10 = vld [vmem:[%s9295_s3 + $0x1f8] sm:$0xff]  }
 0x252   :  { %6570 = vmatprep.subr.bf16.mxu1 %v6810_v4  ;;  %v6859_v3 = vld [vmem:[%s9295_s3 + $0x138] sm:$0xff]  }
 0x253   :  { %v6860_v4 = vld [vmem:[%s9295_s3 + $0x1b8] sm:$0xff]  }
 0x254   :  { %6549 = vmatpush3.bf16.msra.mxu0 %v6811_v5  ;;  %v6861_v5 = vld [vmem:[%s9297_s5 + $0x40] sm:$0xff]  }
 0x255   :  { %6571 = vmatpush3.bf16.msra.mxu1 %v6812_v6  ;;  %6550 = vmatprep.subr.bf16.mxu0 %v6813_v7  ;;  %v6862_v6 = vld [vmem:[%s9297_s5 + $0xc0] sm:$0xff]   ;;  %v628_v7 = vsub.s32 4, %v7061_v44 }
 0x256   :  { %6572 = vmatprep.subr.bf16.mxu1 %v6814_v8  ;;  %v636_v8 = vsub.s32 6, %v7061_v44 }
 0x258   :  { %6551 = vmatpush3.bf16.msra.mxu0 %v6815_v62  ;;  %v632_v62 = vsub.s32 5, %v7061_v44 }
 0x259   :  { %6573 = vmatpush3.bf16.msra.mxu1 %v6816_v11  ;;  %6552 = vmatprep.subr.bf16.mxu0 %v6817_v13  ;;  %v629_v11 = vrot.slane %v8821_v30, %v628_v7  ;;  %v637_v13 = vrot.slane %v8821_v30, %v636_v8  ;;  %v6891_v8 = vld [vmem:[%s9297_s5 + $0x38] sm:$0xff]  }
 0x25a   :  { %6574 = vmatprep.subr.bf16.mxu1 %v6818_v24  ;;  %v633_v14 = vrot.slane %v8821_v30, %v632_v62  ;;  %v641_v24 = vrot.slane %v8821_v30, %v640_v9  ;;  %v6863_v30 = vld [vmem:[%s9297_s5] sm:$0xff]  }
 0x25c   :  { %6553 = vmatpush3.bf16.msra.mxu0 %v6819_v17 }
 0x25d   :  { %6575 = vmatpush3.bf16.msra.mxu1 %v6820_v20  ;;  %6554 = vmatprep.subr.bf16.mxu0 %v6821_v22 }
 0x25e   :  { %6576 = vmatprep.subr.bf16.mxu1 %v6822_v23 }
 0x260   :  { %6555 = vmatpush3.bf16.msra.mxu0 %v6823_v25 }
 0x261   :  { %6577 = vmatpush3.bf16.msra.mxu1 %v6824_v27  ;;  %6556 = vmatprep.subr.bf16.mxu0 %v6825_v28 }
 0x262   :  { %6578 = vmatprep.subr.bf16.mxu1 %v6826_v60 }
 0x264   :  { %6557 = vmatpush3.bf16.msra.mxu0 %v6827_v12 }
 0x265   :  { %6579 = vmatpush3.bf16.msra.mxu1 %v6828_v31  ;;  %6586 = vmatprep.subr.bf16.mxu0 %v6829_v15 }
 0x266   :  { %6608 = vmatprep.subr.bf16.mxu1 %v6830_v33 }
 0x267   :  { %4992 = vmatmul.mubr.bf16.vlgmr.msra.gmra.mrb[8].mxu0 %v8959_v37 }
 0x268   :  { %5032 = vmatmul.mubr.bf16.vlgmr.msra.gmra.mrb[8].mxu1 %v8967_v39  ;;  %6587 = vmatpush3.bf16.msra.mxu0 %v6831_v36  ;;  %v6864_v36 = vld [vmem:[%s9297_s5 + $0x80] sm:$0xff]  }
 0x269   :  { %6609 = vmatpush3.bf16.msra.mxu1 %v6832_v38  ;;  %6588 = vmatprep.subr.bf16.mxu0 %v6833_v51  ;;  %v6865_v51 = vld [vmem:[%s9297_s5 + $0x48] sm:$0xff]  }
 0x26a   :  { %6610 = vmatprep.subr.bf16.mxu1 %v6834_v40  ;;  %v6866_v40 = vld [vmem:[%s9297_s5 + $0xc8] sm:$0xff]  }
 0x26c   :  { %6589 = vmatpush3.bf16.msra.mxu0 %v6835_v42  ;;  %v6867_v42 = vld [vmem:[%s9297_s5 + $0x8] sm:$0xff]  }
 0x26d   :  { %6611 = vmatpush3.bf16.msra.mxu1 %v6836_v1  ;;  %6590 = vmatprep.subr.bf16.mxu0 %v6837_v54  ;;  %v6868_v1 = vld [vmem:[%s9297_s5 + $0x88] sm:$0xff]   ;;  %v6869_v54 = vld [vmem:[%s9297_s5 + $0x50] sm:$0xff]  }
 0x26e   :  { %6612 = vmatprep.subr.bf16.mxu1 %v6838_v43  ;;  %v6870_v43 = vld [vmem:[%s9297_s5 + $0xd0] sm:$0xff]  }
 0x270   :  { %6591 = vmatpush3.bf16.msra.mxu0 %v6839_v45  ;;  %v6872_v45 = vld [vmem:[%s9297_s5 + $0x90] sm:$0xff]  }
 0x271   :  { %6613 = vmatpush3.bf16.msra.mxu1 %v6840_v46  ;;  %6592 = vmatprep.subr.bf16.mxu0 %v6841_v47  ;;  %v6874_v46 = vld [vmem:[%s9297_s5 + $0xd8] sm:$0xff]  }
 0x272   :  { %6614 = vmatprep.subr.bf16.mxu1 %v6842_v48  ;;  %v6875_v47 = vld [vmem:[%s9297_s5 + $0x18] sm:$0xff]  }
 0x273   :  { %v6876_v48 = vld [vmem:[%s9297_s5 + $0x98] sm:$0xff]  }
 0x274   :  { %6593 = vmatpush3.bf16.msra.mxu0 %v6843_v49  ;;  %v6877_v49 = vld [vmem:[%s9297_s5 + $0x60] sm:$0xff]  }
 0x275   :  { %6615 = vmatpush3.bf16.msra.mxu1 %v6844_v0  ;;  %6594 = vmatprep.subr.bf16.mxu0 %v6845_v50  ;;  %v6878_v0 = vld [vmem:[%s9297_s5 + $0xe0] sm:$0xff]  }
 0x276   :  { %6616 = vmatprep.subr.bf16.mxu1 %v6846_v52  ;;  %v6879_v50 = vld [vmem:[%s9297_s5 + $0x20] sm:$0xff]  }
 0x277   :  { %v6880_v52 = vld [vmem:[%s9297_s5 + $0xa0] sm:$0xff]  }
 0x278   :  { %6595 = vmatpush3.bf16.msra.mxu0 %v6847_v53  ;;  %v6881_v53 = vld [vmem:[%s9297_s5 + $0x68] sm:$0xff]  }
 0x279   :  { %6617 = vmatpush3.bf16.msra.mxu1 %v6848_v55  ;;  %6596 = vmatprep.subr.bf16.mxu0 %v6849_v16  ;;  %v6882_v55 = vld [vmem:[%s9297_s5 + $0xe8] sm:$0xff]  }
 0x27a   :  { %6618 = vmatprep.subr.bf16.mxu1 %v6850_v19  ;;  %v6883_v16 = vld [vmem:[%s9297_s5 + $0x28] sm:$0xff]  }
 0x27b   :  { %v6884_v19 = vld [vmem:[%s9297_s5 + $0xa8] sm:$0xff]  }
 0x27c   :  { %6597 = vmatpush3.bf16.msra.mxu0 %v6851_v56  ;;  %v6885_v56 = vld [vmem:[%s9297_s5 + $0x70] sm:$0xff]  }
 0x27d   :  { %6619 = vmatpush3.bf16.msra.mxu1 %v6852_v58  ;;  %6598 = vmatprep.subr.bf16.mxu0 %v6853_v61  ;;  %v6886_v58 = vld [vmem:[%s9297_s5 + $0xf0] sm:$0xff]  }
 0x27e   :  { %6620 = vmatprep.subr.bf16.mxu1 %v6854_v63  ;;  %v6887_v61 = vld [vmem:[%s9297_s5 + $0x30] sm:$0xff]  }
 0x27f   :  { %v6888_v63 = vld [vmem:[%s9297_s5 + $0xb0] sm:$0xff]  }
 0x280   :  { %6599 = vmatpush3.bf16.msra.mxu0 %v6855_v2  ;;  %v6889_v2 = vld [vmem:[%s9297_s5 + $0x78] sm:$0xff]  }
 0x281   :  { %6621 = vmatpush3.bf16.msra.mxu1 %v6856_v35  ;;  %6600 = vmatprep.subr.bf16.mxu0 %v6857_v21  ;;  %v6890_v21 = vld [vmem:[%s9297_s5 + $0xf8] sm:$0xff]  }
 0x282   :  { %6622 = vmatprep.subr.bf16.mxu1 %v6858_v10 }
 0x284   :  { %6601 = vmatpush3.bf16.msra.mxu0 %v6859_v3  ;;  %v6412_v3 = vld [vmem:[#allocation2] ss:$0 sm:$0xff] }
 0x285   :  { %6623 = vmatpush3.bf16.msra.mxu1 %v6860_v4  ;;  %6630 = vmatprep.subr.bf16.mxu0 %v6861_v5 }
 0x286   :  { %6652 = vmatprep.subr.bf16.mxu1 %v6862_v6 }
 0x31a   :  { %v4212_v17 = vpop.f32.mrb[4].mxu0  ;;  %v4417_v20 = vpop.f32.mrb[4].mxu1 }
 0x31b   :  { %v6722_v18 = vadd.f32 %v4212_v17, %v629_v11  ;;  %v4214_v22 = vpop.f32.mrb[5].mxu0  ;;  %v6724_v34 = vadd.f32 %v4417_v20, %v637_v13  ;;  %v4419_v25 = vpop.f32.mrb[5].mxu1  ;;  %v6892_v13 = vld [vmem:[%s9297_s5 + $0xb8] sm:$0xff]  }
 0x31c   :  { %v6723_v23 = vadd.f32 %v4214_v22, %v633_v14  ;;  %v4216_v26 = vpop.f32.mrb[6].mxu0  ;;  %v6725_v28 = vadd.f32 %v4419_v25, %v641_v24  ;;  %v4421_v29 = vpop.f32.mrb[6].mxu1  ;;  %v6893_v14 = vld [vmem:[%s9297_s5 + $0x140] sm:$0xff]   ;;  %v6898_v25 = vld [vmem:[%s9297_s5 + $0x1c8] sm:$0xff]  }
 0x31d   :  { %v4428_v27 = vmax.f32 %v6722_v18, 0.0  ;;  %v4217_v44 = vpop.f32.mrb[7].mxu0  ;;  %v4430_v60 = vmax.f32 %v6724_v34, 0.0  ;;  %v4422_v41 = vpop.f32.mrb[7].mxu1  ;;  %v6894_v18 = vld [vmem:[%s9297_s5 + $0x1c0] sm:$0xff]   ;;  %v6899_v26 = vld [vmem:[%s9297_s5 + $0x108] sm:$0xff]  }
 0x31e   :  { %v4429_v12 = vmax.f32 %v6723_v23, 0.0  ;;  %v4431_v31 = vmax.f32 %v6725_v28, 0.0  ;;  %v6895_v22 = vld [vmem:[%s9297_s5 + $0x100] sm:$0xff]   ;;  %v6897_v23 = vld [vmem:[%s9297_s5 + $0x148] sm:$0xff]   ;;  %v6903_v28 = vld [vmem:[%s9297_s5 + $0x110] sm:$0xff]  }
 0x31f   :  { %v9071_v32 = vpack.c.bf16 %v4428_v27, %v4428_v27  ;;  %v9078_v38 = vpack.c.bf16 %v4430_v60, %v4430_v60  ;;  %v6896_v34 = vld [vmem:[%s9297_s5 + $0x180] sm:$0xff]   ;;  %v6900_v27 = vld [vmem:[%s9297_s5 + $0x188] sm:$0xff]   ;;  %v6904_v29 = vld [vmem:[%s9297_s5 + $0x190] sm:$0xff]  }
 0x320   :  { %v9066_v15 = vpack.c.bf16 %v4429_v12, %v4429_v12  ;;  %v9073_v33 = vpack.c.bf16 %v4431_v31, %v4431_v31  ;;  %v6905_v44 = vld [vmem:[%s9297_s5 + $0x158] sm:$0xff]   ;;  %v6909_v31 = vld [vmem:[%s9297_s5 + $0x160] sm:$0xff]  }
 0x321   :  { %v6906_v60 = vld [vmem:[%s9297_s5 + $0x1d8] sm:$0xff]  }
 0x322   :  { %5071 = vmatprep.mubr.bf16.mxu0 %v9066_v15  ;;  %5111 = vmatprep.mubr.bf16.mxu1 %v9073_v33  ;;  %v6907_v12 = vld [vmem:[%s9297_s5 + $0x118] sm:$0xff]  }
 0x323   :  { %5072 = vmatmul.mubr.bf16.vlgmr.msra.gmra.mrb[12].mxu0 %v9071_v32  ;;  %5112 = vmatmul.mubr.bf16.vlgmr.msra.gmra.mrb[12].mxu1 %v9078_v38  ;;  %v6908_v41 = vld [vmem:[%s9297_s5 + $0x198] sm:$0xff]  }
 0x324   :  { %6631 = vmatpush3.bf16.msra.mxu0 %v6863_v30  ;;  %6653 = vmatpush3.bf16.msra.mxu1 %v6864_v36  ;;  %v6911_v30 = vld [vmem:[%s9297_s5 + $0x120] sm:$0xff]   ;;  %v6913_v36 = vld [vmem:[%s9297_s5 + $0x168] sm:$0xff]  }
 0x325   :  { %5670 = vmatprep.mubr.bf16.mxu0 %v8855_v57  ;;  %5710 = vmatprep.mubr.bf16.mxu1 %v8861_v59  ;;  %v6871_v57 = vld [vmem:[%s9297_s5 + $0x10] sm:$0xff]   ;;  %v6873_v59 = vld [vmem:[%s9297_s5 + $0x58] sm:$0xff]  }
 0x326   :  { %6632 = vmatprep.subr.bf16.mxu0 %v6865_v51  ;;  %6654 = vmatprep.subr.bf16.mxu1 %v6866_v40  ;;  %v6914_v51 = vld [vmem:[%s9297_s5 + $0x1e8] sm:$0xff]  }
 0x327   :  { %v6915_v40 = vld [vmem:[%s9297_s5 + $0x128] sm:$0xff]  }
 0x328   :  { %6633 = vmatpush3.bf16.msra.mxu0 %v6867_v42  ;;  %6655 = vmatpush3.bf16.msra.mxu1 %v6868_v1  ;;  %v6916_v42 = vld [vmem:[%s9297_s5 + $0x1a8] sm:$0xff]   ;;  %v6917_v1 = vld [vmem:[%s9297_s5 + $0x170] sm:$0xff]  }
 0x329   :  { %6634 = vmatprep.subr.bf16.mxu0 %v6869_v54  ;;  %6656 = vmatprep.subr.bf16.mxu1 %v6870_v43  ;;  %v6918_v54 = vld [vmem:[%s9297_s5 + $0x1f0] sm:$0xff]  }
 0x32a   :  { %v6919_v43 = vld [vmem:[%s9297_s5 + $0x130] sm:$0xff]  }
 0x32c   :  { %6635 = vmatpush3.bf16.msra.mxu0 %v6871_v57  ;;  %6657 = vmatpush3.bf16.msra.mxu1 %v6872_v45  ;;  %v6920_v57 = vld [vmem:[%s9297_s5 + $0x1b0] sm:$0xff]   ;;  %v6921_v45 = vld [vmem:[%s9297_s5 + $0x178] sm:$0xff]  }
 0x32d   :  { %6636 = vmatprep.subr.bf16.mxu0 %v6873_v59  ;;  %6658 = vmatprep.subr.bf16.mxu1 %v6874_v46  ;;  %v6922_v59 = vld [vmem:[%s9297_s5 + $0x1f8] sm:$0xff]  }
 0x32e   :  { %v6923_v46 = vld [vmem:[%s9297_s5 + $0x138] sm:$0xff]  }
 0x330   :  { %6637 = vmatpush3.bf16.msra.mxu0 %v6875_v47  ;;  %6659 = vmatpush3.bf16.msra.mxu1 %v6876_v48  ;;  %v6924_v47 = vld [vmem:[%s9297_s5 + $0x1b8] sm:$0xff]  }
 0x331   :  { %6638 = vmatprep.subr.bf16.mxu0 %v6877_v49  ;;  %6660 = vmatprep.subr.bf16.mxu1 %v6878_v0 }
 0x334   :  { %6639 = vmatpush3.bf16.msra.mxu0 %v6879_v50  ;;  %6661 = vmatpush3.bf16.msra.mxu1 %v6880_v52 }
 0x335   :  { %6640 = vmatprep.subr.bf16.mxu0 %v6881_v53  ;;  %6662 = vmatprep.subr.bf16.mxu1 %v6882_v55 }
 0x338   :  { %6641 = vmatpush3.bf16.msra.mxu0 %v6883_v16  ;;  %6663 = vmatpush3.bf16.msra.mxu1 %v6884_v19 }
 0x339   :  { %6642 = vmatprep.subr.bf16.mxu0 %v6885_v56  ;;  %6664 = vmatprep.subr.bf16.mxu1 %v6886_v58 }
 0x33a   :  { %v6558_v35 = vpop.f32.mrb[8].mxu0 }
 0x33b   :  { %v6580_v10 = vpop.f32.mrb[8].mxu1  ;;  %v6559_v4 = vpop.f32.mrb[9].mxu0 }
 0x33c   :  { %v6560_v5 = vadd.f32 %v6559_v4, %v6558_v35  ;;  %v6581_v6 = vpop.f32.mrb[9].mxu1  ;;  %6643 = vmatpush3.bf16.msra.mxu0 %v6887_v61  ;;  %v6561_v7 = vpop.f32.mrb[10].mxu0  ;;  %6665 = vmatpush3.bf16.msra.mxu1 %v6888_v63 }
 0x33d   :  { %v6582_v62 = vadd.f32 %v6581_v6, %v6580_v10  ;;  %v6583_v9 = vpop.f32.mrb[10].mxu1  ;;  %v6562_v11 = vpop.f32.mrb[11].mxu0  ;;  %6644 = vmatprep.subr.bf16.mxu0 %v6889_v2  ;;  %6666 = vmatprep.subr.bf16.mxu1 %v6890_v21 }
 0x33e   :  { %v4994_v24 = vadd.f32 %v6560_v5, %v6412_v3  ;;  %v6584_v17 = vpop.f32.mrb[11].mxu1 }
 0x340   :  { %v9176_v20 = vadd.f32 %v6582_v62, %v4994_v24  ;;  %6645 = vmatpush3.bf16.msra.mxu0 %v6891_v8  ;;  %6667 = vmatpush3.bf16.msra.mxu1 %v6892_v13 }
 0x341   :  { %6674 = vmatprep.subr.bf16.mxu0 %v6893_v14  ;;  %6696 = vmatprep.subr.bf16.mxu1 %v6894_v18 }
 0x343   :  { %5671 = vmatmul.mubr.bf16.vlgmr.msra.gmra.mrb[16].mxu0 %v8959_v37  ;;  %5711 = vmatmul.mubr.bf16.vlgmr.msra.gmra.mrb[16].mxu1 %v8967_v39  ;;  %v6901_v37 = vld [vmem:[%s9297_s5 + $0x150] sm:$0xff]  }
 0x344   :  { %6675 = vmatpush3.bf16.msra.mxu0 %v6895_v22  ;;  %5750 = vmatprep.mubr.bf16.mxu0 %v9066_v15  ;;  %v6902_v39 = vld [vmem:[%s9297_s5 + $0x1d0] sm:$0xff]   ;;  %v6910_v15 = vld [vmem:[%s9297_s5 + $0x1e0] sm:$0xff]  }
 0x345   :  { %6697 = vmatpush3.bf16.msra.mxu1 %v6896_v34  ;;  %5790 = vmatprep.mubr.bf16.mxu1 %v9073_v33  ;;  %v6912_v33 = vld [vmem:[%s9297_s5 + $0x1a0] sm:$0xff]  }
 0x346   :  { %6676 = vmatprep.subr.bf16.mxu0 %v6897_v23  ;;  %6698 = vmatprep.subr.bf16.mxu1 %v6898_v25 }
 0x348   :  { %6677 = vmatpush3.bf16.msra.mxu0 %v6899_v26 }
 0x349   :  { %6699 = vmatpush3.bf16.msra.mxu1 %v6900_v27  ;;  %6678 = vmatprep.subr.bf16.mxu0 %v6901_v37 }
 0x34a   :  { %6700 = vmatprep.subr.bf16.mxu1 %v6902_v39 }
 0x34c   :  { %6679 = vmatpush3.bf16.msra.mxu0 %v6903_v28 }
 0x34d   :  { %6701 = vmatpush3.bf16.msra.mxu1 %v6904_v29  ;;  %6680 = vmatprep.subr.bf16.mxu0 %v6905_v44 }
 0x34e   :  { %6702 = vmatprep.subr.bf16.mxu1 %v6906_v60 }
 0x350   :  { %6681 = vmatpush3.bf16.msra.mxu0 %v6907_v12 }
 0x351   :  { %6703 = vmatpush3.bf16.msra.mxu1 %v6908_v41  ;;  %6682 = vmatprep.subr.bf16.mxu0 %v6909_v31 }
 0x352   :  { %6704 = vmatprep.subr.bf16.mxu1 %v6910_v15 }
 0x354   :  { %6683 = vmatpush3.bf16.msra.mxu0 %v6911_v30 }
 0x355   :  { %6705 = vmatpush3.bf16.msra.mxu1 %v6912_v33  ;;  %6684 = vmatprep.subr.bf16.mxu0 %v6913_v36 }
 0x356   :  { %6706 = vmatprep.subr.bf16.mxu1 %v6914_v51 }
 0x358   :  { %6685 = vmatpush3.bf16.msra.mxu0 %v6915_v40 }
 0x359   :  { %6707 = vmatpush3.bf16.msra.mxu1 %v6916_v42  ;;  %6686 = vmatprep.subr.bf16.mxu0 %v6917_v1 }
 0x35a   :  { %6708 = vmatprep.subr.bf16.mxu1 %v6918_v54 }
 0x35c   :  { %6687 = vmatpush3.bf16.msra.mxu0 %v6919_v43 }
 0x35d   :  { %6709 = vmatpush3.bf16.msra.mxu1 %v6920_v57  ;;  %6688 = vmatprep.subr.bf16.mxu0 %v6921_v45 }
 0x35e   :  { %6710 = vmatprep.subr.bf16.mxu1 %v6922_v59 }
 0x360   :  { %6689 = vmatpush3.bf16.msra.mxu0 %v6923_v46 }
 0x361   :  { %6711 = vmatpush3.bf16.msra.mxu1 %v6924_v47 }
 0x363   :  { %5751 = vmatmul.mubr.bf16.vlgmr.msra.gmra.mrb[20].mxu0 %v9071_v32  ;;  %v6477_v32 = vld [vmem:[%s9298_s6] ss:$0 sm:$0xff] }
 0x364   :  { %5791 = vmatmul.mubr.bf16.vlgmr.msra.gmra.mrb[20].mxu1 %v9078_v38 }
 0x3f6   :  { %v6602_v48 = vpop.f32.mrb[12].mxu0  ;;  %v6624_v49 = vpop.f32.mrb[12].mxu1 }
 0x3f7   :  { %v6603_v0 = vpop.f32.mrb[13].mxu0  ;;  %v6625_v52 = vpop.f32.mrb[13].mxu1 }
 0x3f8   :  { %v6604_v50 = vadd.f32 %v6603_v0, %v6602_v48  ;;  %v6605_v53 = vpop.f32.mrb[14].mxu0  ;;  %v6626_v55 = vadd.f32 %v6625_v52, %v6624_v49  ;;  %v6627_v16 = vpop.f32.mrb[14].mxu1 }
 0x3f9   :  { %v6606_v19 = vpop.f32.mrb[15].mxu0  ;;  %v6628_v58 = vpop.f32.mrb[15].mxu1 }
 0x3fa   :  { %v5074_v56 = vadd.f32 %v6604_v50, %v9176_v20 }
 0x3fc   :  { %v5114_v61 = vadd.f32 %v6626_v55, %v5074_v56 }
 0x416   :  { %v6646_v63 = vpop.f32.mrb[16].mxu0  ;;  %v6668_v2 = vpop.f32.mrb[16].mxu1 }
 0x417   :  { %v6647_v38 = vpop.f32.mrb[17].mxu0  ;;  %v6669_v21 = vpop.f32.mrb[17].mxu1 }
 0x418   :  { %v6648_v35 = vadd.f32 %v6647_v38, %v6646_v63  ;;  %v6649_v10 = vpop.f32.mrb[18].mxu0  ;;  %v6670_v3 = vadd.f32 %v6669_v21, %v6668_v2  ;;  %v6671_v4 = vpop.f32.mrb[18].mxu1 }
 0x419   :  { %v6650_v5 = vpop.f32.mrb[19].mxu0  ;;  %v6672_v7 = vpop.f32.mrb[19].mxu1 }
 0x41a   :  { %v5673_v6 = vadd.f32 %v6648_v35, %v6477_v32 }
 0x41c   :  { %v5713_v8 = vadd.f32 %v6670_v3, %v5673_v6 }
 0x436   :  { %v6690_v62 = vpop.f32.mrb[20].mxu0 }
 0x437   :  { %v6712_v9 = vpop.f32.mrb[20].mxu1  ;;  %v6691_v11 = vpop.f32.mrb[21].mxu0 }
 0x438   :  { %v6692_v13 = vadd.f32 %v6691_v11, %v6690_v62  ;;  %v6713_v14 = vpop.f32.mrb[21].mxu1  ;;  %v6693_v24 = vpop.f32.mrb[22].mxu0 }
 0x439   :  { %v6714_v17 = vadd.f32 %v6713_v14, %v6712_v9  ;;  %v6715_v18 = vpop.f32.mrb[22].mxu1  ;;  %v6694_v20 = vpop.f32.mrb[23].mxu0 }
 0x43a   :  { %v5753_v22 = vadd.f32 %v6692_v13, %v5713_v8  ;;  %v6716_v34 = vpop.f32.mrb[23].mxu1 }
 0x43c   :  { %v5793_v23 = vadd.f32 %v6714_v17, %v5753_v22 }
 0x43e   :  { %v5799_v25 = vsel %vm5798_vm0, %v5793_v23, 0.0 }
 0x43f   :  { %5800 = vadd.xlane.f32.xlu0 %v5799_v25 }
 0x455   :  { %5816 = vperm.xlu0 %6795, %v5114_v61  }
 0x4cc   :  { %v5801_v26 = vpop.xlane.xlu0 %5800 }
 0x4cd   :  { %v5802_v27 = vrot.slane %v5801_v26, 4 }
 0x4cf   :  { %v5803_v37 = vadd.f32 %v5802_v27, %v5801_v26 }
 0x4d1   :  { %v5804_v39 = vrot.slane %v5803_v37, 2 }
 0x4d3   :  { %v5805_v28 = vadd.f32 %v5804_v39, %v5803_v37 }
 0x4d4   :  { %v5817_v41 = vpop.permute.xlu0 %5816 }
 0x4d5   :  { %v5806_v29 = vrot.slane %v5805_v28, 1 }
 0x4d7   :  { %v5807_v44 = vadd.f32 %v5806_v29, %v5805_v28 }
 0x4d9   :  { %6790 = vpush %v5807_v44 }
 0x50a   :  { %s6791_s6 = spop %6790 }
 0x50b   :  { %s5811_s16 = smul.f32 0.083333336, %s6791_s6 }
 0x50d   :  { %v5812_v60 = vstv %s5811_s16 }
 0x50e   :  { %v5813_v12 = vsub.f32 %v5793_v23, %v5812_v60 }
 0x510   :  { %v5819_v31 = vadd.f32 %v5817_v41, %v5813_v12 }
 0x512   :  { %5820 = vst.msk [vmem:[#allocation3] sm:$0x3] %vm5798_vm0, %v5819_v31 }
 0x513   :  { %6936 = shalt.err (!%p6933_p4)
}
 0x514   :  { %s6937_s21 = scalar_lea.hbm %s9299_s7, 32 }
 0x515   :  { %p6938_p5 = scmp.ne.s32.totalorder %s9299_s7, %s6937_s21  ;;  %p6941_p6 = scmp.lt.u32.totalorder %s6937_s21, %s9299_s7 }
 0x517   :  { %p6943_p7 = pnand %p6941_p6, %p6938_p5 }
 0x519   :  { %6946 = shalt.err (!%p6943_p7)
}
 0x51a   :  { %5830 = dma.vmem_to_hbm [thread:$0]  %s5828_s18, 32, %s9299_s7, [#allocation4]  }
 0x51b   :  { %6947 = dma.done.wait [#allocation4], 32  }
 0x51c   :  { %6948 = vsyncadd [#allocation4], 4294967264 }
 0x51d   :  { %5834 = vsyncpa [#allocation4], 1 }

</bundles_post_ra>
